<compile_context>
chip_gen: v6e
topology: v6e:2x2x1
jax: 0.10.0
libtpu: 0.0.40
codegen_flags: <defaults>
</compile_context>

<pallas_src>
import functools

import jax
import jax.numpy as jnp
from jax import lax
from jax.experimental import pallas as pl
from jax.experimental.pallas import tpu as pltpu


def _round_up(x, m):
    return (x + m - 1) // m * m


def _cdiv(a, b):
    return (a + b - 1) // b


def _sobel_kernel(w_ref, x_ref, h_ref, o_ref, *, th, cb, wi_pad, wo_pad, wb):
    # w_ref: SMEM f32[81]                 flattened (co, ci, kh, kw) row-major
    # x_ref: VMEM f32[1, 3, th, wi_pad]   input rows  [t*th, (t+1)*th)
    # h_ref: VMEM f32[1, 3, cb, wi_pad]   halo rows   [(t+1)*th, (t+1)*th + cb)
    # o_ref: VMEM f32[1, 3, th, wo_pad]   output rows [t*th, (t+1)*th)
    n_chunks = th // cb

    def process(r0, get_window):
        # get_window(ci, c0, wbw) -> (R >= cb+2, wbw) input rows [r0, r0+cb+2).
        for c0 in range(0, wo_pad, wb):                       # static column blocks
            cur_wb = min(wb, wo_pad - c0)                     # multiple of 128
            wbw = min(cur_wb + 128, wi_pad - c0)              # multiple of 128
            accs = [jnp.zeros((cb, cur_wb), jnp.float32) for _ in range(3)]
            for ci in range(3):
                # Hoist only the 27 weights of the current ci (cheap scalar slds,
                # co-issued with the VALU work; avoids 81 live splats).
                wci = [[[w_ref[((co * 3 + ci) * 3 + kh) * 3 + kw]
                         for kw in range(3)] for kh in range(3)] for co in range(3)]
                win = get_window(ci, c0, wbw)
                for kw in range(3):
                    if kw == 0:
                        xs = win[:, :cur_wb]
                    else:
                        # Lane shift by kw on the XLU; any circular wrap only hits
                        # columns >= Wo, which the wrapper discards.
                        xs = pltpu.roll(win, shift=wbw - kw, axis=1)[:, :cur_wb]
                    for kh in range(3):
                        slab = xs[kh:kh + cb, :]              # cheap sublane slice
                        for co in range(3):
                            accs[co] = accs[co] + wci[co][kh][kw] * slab
            for co in range(3):
                # Lane-dense (cur_wb multiple of 128) unmasked store.
                o_ref[0, co, pl.ds(r0, cb), pl.ds(c0, cur_wb)] = accs[co]

    # Chunks whose cb+2 input rows lie fully inside the main block.
    n_main = n_chunks - 1
    if n_main > 0:
        def body(i, carry):
            r0 = pl.multiple_of(i * cb, cb)
            process(r0, lambda ci, c0, wbw:
                    x_ref[0, ci, pl.ds(r0, cb + 2), pl.ds(c0, wbw)])
            return carry
        lax.fori_loop(0, n_main, body, 0, unroll=min(n_main, 4))

    # Last chunk: stitch its 2 extra rows from the halo block (8-row aligned
    # concat; rows beyond cb+2 of the window are never read).
    def last_window(ci, c0, wbw):
        main = x_ref[0, ci, pl.ds(th - cb, cb), pl.ds(c0, wbw)]
        halo = h_ref[0, ci, pl.ds(0, cb), pl.ds(c0, wbw)]
        return jnp.concatenate([main, halo], axis=0)          # (2*cb, wbw)
    process((n_chunks - 1) * cb, last_window)


def sobel_net_forward(x, weight, *, tile_h=128, col_block=512):
    """VALID 3x3 conv, 3->3 channels, NCHW (Soble_Net forward).

    x: [N, 3, H, W] float; weight: [3, 3, 3, 3] (cout, cin, kh, kw).
    """
    N, C, H, W = x.shape
    assert C == 3 and H >= 3 and W >= 3
    Ho, Wo = H - 2, W - 2

    RB = 8                                     # row chunk & halo rows (f32 sublane tile)
    WI_PAD = _round_up(W, 128)                 # lane-padded input width
    WO_PAD = _round_up(Wo, 128)                # lane-dense stored output width (<= WI_PAD)
    WB = min(_round_up(col_block, 128), WO_PAD)

    # TH quantization: smallest 8-aligned tile covering Ho in cdiv(Ho, tile_h) tiles.
    nT = max(1, _cdiv(Ho, max(tile_h, RB)))
    TH = _round_up(_cdiv(Ho, nT), RB)

    # Keep the double-buffered working set comfortably inside v7x's 64 MiB VMEM.
    def _dbuf_bytes(th):
        return 2 * 4 * 3 * ((th + RB) * WI_PAD + th * WO_PAD)
    while TH > RB and _dbuf_bytes(TH) > (36 << 20):
        TH -= RB

    nTH = _cdiv(Ho, TH)
    Ho_pad = nTH * TH
    Hp = Ho_pad + RB                           # so the last tile's halo block is in-bounds

    # Single cheap zero-pad (no gather): rows for the halo tail, columns to lane width.
    x_pad = jnp.pad(x.astype(jnp.float32),
                    ((0, 0), (0, 0), (0, Hp - H), (0, WI_PAD - W)))
    w_flat = weight.astype(jnp.float32).reshape(-1)            # 81 scalars for SMEM

    kernel = functools.partial(_sobel_kernel, th=TH, cb=RB,
                               wi_pad=WI_PAD, wo_pad=WO_PAD, wb=WB)

    th_blocks = TH // RB
    block_in = 3 * TH * WI_PAD * 4
    block_halo = 3 * RB * WI_PAD * 4
    block_out = 3 * TH * WO_PAD * 4
    vmem_limit = int(min(max(2 * (block_in + block_halo + block_out) + (8 << 20),
                             32 << 20), 48 << 20))
    flops = 2 * 27 * 3 * N * Ho * Wo
    bytes_accessed = int(N * 3 * Hp * WI_PAD * 4 + N * nTH * block_halo
                         + N * 3 * Ho_pad * WO_PAD * 4 + w_flat.size * 4)

    out_pad = pl.pallas_call(
        kernel,
        out_shape=jax.ShapeDtypeStruct((N, 3, Ho_pad, WO_PAD), jnp.float32),
        grid=(N, nTH),
        in_specs=[
            pl.BlockSpec(memory_space=pltpu.MemorySpace.SMEM),                    # weights
            pl.BlockSpec((1, 3, TH, WI_PAD), lambda n, t: (n, 0, t, 0)),          # main rows
            pl.BlockSpec((1, 3, RB, WI_PAD),
                         lambda n, t: (n, 0, (t + 1) * th_blocks, 0)),            # row halo
        ],
        out_specs=pl.BlockSpec((1, 3, TH, WO_PAD), lambda n, t: (n, 0, t, 0)),    # lane-dense
        compiler_params=pltpu.CompilerParams(
            dimension_semantics=("parallel", "parallel"),
            vmem_limit_bytes=vmem_limit,
        ),
        cost_estimate=pl.CostEstimate(flops=flops, transcendentals=0,
                                      bytes_accessed=bytes_accessed),
    )(w_flat, x_pad, x_pad)

    return out_pad[:, :, :Ho, :Wo]


if __name__ == "__main__":
    key = jax.random.PRNGKey(0)
    kx, kw = jax.random.split(key)

    # Conv2d(3, 3, 3, bias=False) weight: [3, 3, 3, 3], PyTorch-style init bound.
    fan_in = 3 * 3 * 3
    bound = 1.0 / (fan_in ** 0.5)
    weight = jax.random.uniform(kw, (3, 3, 3, 3), jnp.float32,
                                minval=-bound, maxval=bound)

    # Small example input consistent with the module (3 input channels).
    x = jax.random.normal(kx, (2, 3, 16, 16), jnp.float32)
    out = jax.block_until_ready(sobel_net_forward(x, weight))

    ref = lax.conv_general_dilated(
        x, weight, window_strides=(1, 1), padding="VALID",
        dimension_numbers=("NCHW", "OIHW", "NCHW"))
    assert out.shape == (2, 3, 14, 14), out.shape
    assert jnp.allclose(out, ref, atol=1e-4, rtol=1e-4)

    # Second shape: exercises multiple row tiles, the cross-tile halo stitch and
    # more than one lane block (including the roll-wrap edge case).
    x2 = jax.random.normal(kx, (1, 3, 21, 140), jnp.float32)
    out2 = jax.block_until_ready(
        sobel_net_forward(x2, weight, tile_h=8, col_block=128))
    ref2 = lax.conv_general_dilated(
        x2, weight, window_strides=(1, 1), padding="VALID",
        dimension_numbers=("NCHW", "OIHW", "NCHW"))
    assert out2.shape == (1, 3, 19, 138), out2.shape
    assert jnp.allclose(out2, ref2, atol=1e-4, rtol=1e-4)

    print("KERNEL_OK")
</pallas_src>

<mosaic_0001>
module attributes {stable_mosaic.version = 11 : i64} {
  func.func @_sobel_kernel(%arg0: i32, %arg1: i32, %arg2: memref<81xf32, #tpu.memory_space<smem>>, %arg3: memref<1x3x16x128xf32, #tpu.memory_space<vmem>>, %arg4: memref<1x3x8x128xf32, #tpu.memory_space<vmem>>, %arg5: memref<1x3x16x128xf32, #tpu.memory_space<vmem>>) attributes {dimension_semantics = [#tpu.dimension_semantics<parallel>, #tpu.dimension_semantics<parallel>], iteration_bounds = array<i64: 2, 1>, scalar_prefetch = 0 : i64, scratch_operands = 0 : i64, tpu.core_type = #tpu.core_type<tc>, window_params = [{transform_indices = @transform_0, window_bounds = array<i64: 81>}, {transform_indices = @transform_1, window_bounds = array<i64: 1, 3, 16, 128>}, {transform_indices = @transform_2, window_bounds = array<i64: 1, 3, 8, 128>}, {transform_indices = @transform_3, window_bounds = array<i64: 1, 3, 16, 128>}]} {
    %c0_i32 = arith.constant 0 : i32
    %c8_i32 = arith.constant 8 : i32
    %0 = arith.muli %c0_i32, %c8_i32 : i32
    %1 = tpu.assume_multiple %0, 8 : i32
    %cst = arith.constant 0.000000e+00 : f32
    %2 = vector.broadcast %cst : f32 to vector<8x128xf32>
    %cst_0 = arith.constant 0.000000e+00 : f32
    %3 = vector.broadcast %cst_0 : f32 to vector<8x128xf32>
    %cst_1 = arith.constant 0.000000e+00 : f32
    %4 = vector.broadcast %cst_1 : f32 to vector<8x128xf32>
    %c0 = arith.constant 0 : index
    %5 = memref.load %arg2[%c0] : memref<81xf32, #tpu.memory_space<smem>>
    %c1 = arith.constant 1 : index
    %6 = memref.load %arg2[%c1] : memref<81xf32, #tpu.memory_space<smem>>
    %c2 = arith.constant 2 : index
    %7 = memref.load %arg2[%c2] : memref<81xf32, #tpu.memory_space<smem>>
    %c3 = arith.constant 3 : index
    %8 = memref.load %arg2[%c3] : memref<81xf32, #tpu.memory_space<smem>>
    %c4 = arith.constant 4 : index
    %9 = memref.load %arg2[%c4] : memref<81xf32, #tpu.memory_space<smem>>
    %c5 = arith.constant 5 : index
    %10 = memref.load %arg2[%c5] : memref<81xf32, #tpu.memory_space<smem>>
    %c6 = arith.constant 6 : index
    %11 = memref.load %arg2[%c6] : memref<81xf32, #tpu.memory_space<smem>>
    %c7 = arith.constant 7 : index
    %12 = memref.load %arg2[%c7] : memref<81xf32, #tpu.memory_space<smem>>
    %c8 = arith.constant 8 : index
    %13 = memref.load %arg2[%c8] : memref<81xf32, #tpu.memory_space<smem>>
    %c27 = arith.constant 27 : index
    %14 = memref.load %arg2[%c27] : memref<81xf32, #tpu.memory_space<smem>>
    %c28 = arith.constant 28 : index
    %15 = memref.load %arg2[%c28] : memref<81xf32, #tpu.memory_space<smem>>
    %c29 = arith.constant 29 : index
    %16 = memref.load %arg2[%c29] : memref<81xf32, #tpu.memory_space<smem>>
    %c30 = arith.constant 30 : index
    %17 = memref.load %arg2[%c30] : memref<81xf32, #tpu.memory_space<smem>>
    %c31 = arith.constant 31 : index
    %18 = memref.load %arg2[%c31] : memref<81xf32, #tpu.memory_space<smem>>
    %c32 = arith.constant 32 : index
    %19 = memref.load %arg2[%c32] : memref<81xf32, #tpu.memory_space<smem>>
    %c33 = arith.constant 33 : index
    %20 = memref.load %arg2[%c33] : memref<81xf32, #tpu.memory_space<smem>>
    %c34 = arith.constant 34 : index
    %21 = memref.load %arg2[%c34] : memref<81xf32, #tpu.memory_space<smem>>
    %c35 = arith.constant 35 : index
    %22 = memref.load %arg2[%c35] : memref<81xf32, #tpu.memory_space<smem>>
    %c54 = arith.constant 54 : index
    %23 = memref.load %arg2[%c54] : memref<81xf32, #tpu.memory_space<smem>>
    %c55 = arith.constant 55 : index
    %24 = memref.load %arg2[%c55] : memref<81xf32, #tpu.memory_space<smem>>
    %c56 = arith.constant 56 : index
    %25 = memref.load %arg2[%c56] : memref<81xf32, #tpu.memory_space<smem>>
    %c57 = arith.constant 57 : index
    %26 = memref.load %arg2[%c57] : memref<81xf32, #tpu.memory_space<smem>>
    %c58 = arith.constant 58 : index
    %27 = memref.load %arg2[%c58] : memref<81xf32, #tpu.memory_space<smem>>
    %c59 = arith.constant 59 : index
    %28 = memref.load %arg2[%c59] : memref<81xf32, #tpu.memory_space<smem>>
    %c60 = arith.constant 60 : index
    %29 = memref.load %arg2[%c60] : memref<81xf32, #tpu.memory_space<smem>>
    %c61 = arith.constant 61 : index
    %30 = memref.load %arg2[%c61] : memref<81xf32, #tpu.memory_space<smem>>
    %c62 = arith.constant 62 : index
    %31 = memref.load %arg2[%c62] : memref<81xf32, #tpu.memory_space<smem>>
    %c0_2 = arith.constant 0 : index
    %c0_3 = arith.constant 0 : index
    %32 = arith.index_cast %1 : i32 to index
    %c0_4 = arith.constant 0 : index
    %33 = vector.load %arg3[%c0_2, %c0_3, %32, %c0_4] : memref<1x3x16x128xf32, #tpu.memory_space<vmem>>, vector<1x1x10x128xf32>
    %34 = vector.shape_cast %33 : vector<1x1x10x128xf32> to vector<10x128xf32>
    %35 = vector.extract_strided_slice %34 {offsets = [0, 0], sizes = [8, 128], strides = [1, 1]} : vector<10x128xf32> to vector<8x128xf32>
    %36 = vector.broadcast %5 : f32 to vector<8x128xf32>
    %37 = arith.mulf %36, %35 : vector<8x128xf32>
    %38 = arith.addf %2, %37 : vector<8x128xf32>
    %39 = vector.broadcast %14 : f32 to vector<8x128xf32>
    %40 = arith.mulf %39, %35 : vector<8x128xf32>
    %41 = arith.addf %3, %40 : vector<8x128xf32>
    %42 = vector.broadcast %23 : f32 to vector<8x128xf32>
    %43 = arith.mulf %42, %35 : vector<8x128xf32>
    %44 = arith.addf %4, %43 : vector<8x128xf32>
    %45 = vector.extract_strided_slice %34 {offsets = [1, 0], sizes = [8, 128], strides = [1, 1]} : vector<10x128xf32> to vector<8x128xf32>
    %46 = vector.broadcast %8 : f32 to vector<8x128xf32>
    %47 = arith.mulf %46, %45 : vector<8x128xf32>
    %48 = arith.addf %38, %47 : vector<8x128xf32>
    %49 = vector.broadcast %17 : f32 to vector<8x128xf32>
    %50 = arith.mulf %49, %45 : vector<8x128xf32>
    %51 = arith.addf %41, %50 : vector<8x128xf32>
    %52 = vector.broadcast %26 : f32 to vector<8x128xf32>
    %53 = arith.mulf %52, %45 : vector<8x128xf32>
    %54 = arith.addf %44, %53 : vector<8x128xf32>
    %55 = vector.extract_strided_slice %34 {offsets = [2, 0], sizes = [8, 128], strides = [1, 1]} : vector<10x128xf32> to vector<8x128xf32>
    %56 = vector.broadcast %11 : f32 to vector<8x128xf32>
    %57 = arith.mulf %56, %55 : vector<8x128xf32>
    %58 = arith.addf %48, %57 : vector<8x128xf32>
    %59 = vector.broadcast %20 : f32 to vector<8x128xf32>
    %60 = arith.mulf %59, %55 : vector<8x128xf32>
    %61 = arith.addf %51, %60 : vector<8x128xf32>
    %62 = vector.broadcast %29 : f32 to vector<8x128xf32>
    %63 = arith.mulf %62, %55 : vector<8x128xf32>
    %64 = arith.addf %54, %63 : vector<8x128xf32>
    %c127_i32 = arith.constant 127 : i32
    %65 = tpu.dynamic_rotate %34 by %c127_i32 dim 1 : vector<10x128xf32>, i32 -> vector<10x128xf32>
    %66 = vector.extract_strided_slice %65 {offsets = [0, 0], sizes = [8, 128], strides = [1, 1]} : vector<10x128xf32> to vector<8x128xf32>
    %67 = vector.broadcast %6 : f32 to vector<8x128xf32>
    %68 = arith.mulf %67, %66 : vector<8x128xf32>
    %69 = arith.addf %58, %68 : vector<8x128xf32>
    %70 = vector.broadcast %15 : f32 to vector<8x128xf32>
    %71 = arith.mulf %70, %66 : vector<8x128xf32>
    %72 = arith.addf %61, %71 : vector<8x128xf32>
    %73 = vector.broadcast %24 : f32 to vector<8x128xf32>
    %74 = arith.mulf %73, %66 : vector<8x128xf32>
    %75 = arith.addf %64, %74 : vector<8x128xf32>
    %76 = vector.extract_strided_slice %65 {offsets = [1, 0], sizes = [8, 128], strides = [1, 1]} : vector<10x128xf32> to vector<8x128xf32>
    %77 = vector.broadcast %9 : f32 to vector<8x128xf32>
    %78 = arith.mulf %77, %76 : vector<8x128xf32>
    %79 = arith.addf %69, %78 : vector<8x128xf32>
    %80 = vector.broadcast %18 : f32 to vector<8x128xf32>
    %81 = arith.mulf %80, %76 : vector<8x128xf32>
    %82 = arith.addf %72, %81 : vector<8x128xf32>
    %83 = vector.broadcast %27 : f32 to vector<8x128xf32>
    %84 = arith.mulf %83, %76 : vector<8x128xf32>
    %85 = arith.addf %75, %84 : vector<8x128xf32>
    %86 = vector.extract_strided_slice %65 {offsets = [2, 0], sizes = [8, 128], strides = [1, 1]} : vector<10x128xf32> to vector<8x128xf32>
    %87 = vector.broadcast %12 : f32 to vector<8x128xf32>
    %88 = arith.mulf %87, %86 : vector<8x128xf32>
    %89 = arith.addf %79, %88 : vector<8x128xf32>
    %90 = vector.broadcast %21 : f32 to vector<8x128xf32>
    %91 = arith.mulf %90, %86 : vector<8x128xf32>
    %92 = arith.addf %82, %91 : vector<8x128xf32>
    %93 = vector.broadcast %30 : f32 to vector<8x128xf32>
    %94 = arith.mulf %93, %86 : vector<8x128xf32>
    %95 = arith.addf %85, %94 : vector<8x128xf32>
    %c126_i32 = arith.constant 126 : i32
    %96 = tpu.dynamic_rotate %34 by %c126_i32 dim 1 : vector<10x128xf32>, i32 -> vector<10x128xf32>
    %97 = vector.extract_strided_slice %96 {offsets = [0, 0], sizes = [8, 128], strides = [1, 1]} : vector<10x128xf32> to vector<8x128xf32>
    %98 = vector.broadcast %7 : f32 to vector<8x128xf32>
    %99 = arith.mulf %98, %97 : vector<8x128xf32>
    %100 = arith.addf %89, %99 : vector<8x128xf32>
    %101 = vector.broadcast %16 : f32 to vector<8x128xf32>
    %102 = arith.mulf %101, %97 : vector<8x128xf32>
    %103 = arith.addf %92, %102 : vector<8x128xf32>
    %104 = vector.broadcast %25 : f32 to vector<8x128xf32>
    %105 = arith.mulf %104, %97 : vector<8x128xf32>
    %106 = arith.addf %95, %105 : vector<8x128xf32>
    %107 = vector.extract_strided_slice %96 {offsets = [1, 0], sizes = [8, 128], strides = [1, 1]} : vector<10x128xf32> to vector<8x128xf32>
    %108 = vector.broadcast %10 : f32 to vector<8x128xf32>
    %109 = arith.mulf %108, %107 : vector<8x128xf32>
    %110 = arith.addf %100, %109 : vector<8x128xf32>
    %111 = vector.broadcast %19 : f32 to vector<8x128xf32>
    %112 = arith.mulf %111, %107 : vector<8x128xf32>
    %113 = arith.addf %103, %112 : vector<8x128xf32>
    %114 = vector.broadcast %28 : f32 to vector<8x128xf32>
    %115 = arith.mulf %114, %107 : vector<8x128xf32>
    %116 = arith.addf %106, %115 : vector<8x128xf32>
    %117 = vector.extract_strided_slice %96 {offsets = [2, 0], sizes = [8, 128], strides = [1, 1]} : vector<10x128xf32> to vector<8x128xf32>
    %118 = vector.broadcast %13 : f32 to vector<8x128xf32>
    %119 = arith.mulf %118, %117 : vector<8x128xf32>
    %120 = arith.addf %110, %119 : vector<8x128xf32>
    %121 = vector.broadcast %22 : f32 to vector<8x128xf32>
    %122 = arith.mulf %121, %117 : vector<8x128xf32>
    %123 = arith.addf %113, %122 : vector<8x128xf32>
    %124 = vector.broadcast %31 : f32 to vector<8x128xf32>
    %125 = arith.mulf %124, %117 : vector<8x128xf32>
    %126 = arith.addf %116, %125 : vector<8x128xf32>
    %c9 = arith.constant 9 : index
    %127 = memref.load %arg2[%c9] : memref<81xf32, #tpu.memory_space<smem>>
    %c10 = arith.constant 10 : index
    %128 = memref.load %arg2[%c10] : memref<81xf32, #tpu.memory_space<smem>>
    %c11 = arith.constant 11 : index
    %129 = memref.load %arg2[%c11] : memref<81xf32, #tpu.memory_space<smem>>
    %c12 = arith.constant 12 : index
    %130 = memref.load %arg2[%c12] : memref<81xf32, #tpu.memory_space<smem>>
    %c13 = arith.constant 13 : index
    %131 = memref.load %arg2[%c13] : memref<81xf32, #tpu.memory_space<smem>>
    %c14 = arith.constant 14 : index
    %132 = memref.load %arg2[%c14] : memref<81xf32, #tpu.memory_space<smem>>
    %c15 = arith.constant 15 : index
    %133 = memref.load %arg2[%c15] : memref<81xf32, #tpu.memory_space<smem>>
    %c16 = arith.constant 16 : index
    %134 = memref.load %arg2[%c16] : memref<81xf32, #tpu.memory_space<smem>>
    %c17 = arith.constant 17 : index
    %135 = memref.load %arg2[%c17] : memref<81xf32, #tpu.memory_space<smem>>
    %c36 = arith.constant 36 : index
    %136 = memref.load %arg2[%c36] : memref<81xf32, #tpu.memory_space<smem>>
    %c37 = arith.constant 37 : index
    %137 = memref.load %arg2[%c37] : memref<81xf32, #tpu.memory_space<smem>>
    %c38 = arith.constant 38 : index
    %138 = memref.load %arg2[%c38] : memref<81xf32, #tpu.memory_space<smem>>
    %c39 = arith.constant 39 : index
    %139 = memref.load %arg2[%c39] : memref<81xf32, #tpu.memory_space<smem>>
    %c40 = arith.constant 40 : index
    %140 = memref.load %arg2[%c40] : memref<81xf32, #tpu.memory_space<smem>>
    %c41 = arith.constant 41 : index
    %141 = memref.load %arg2[%c41] : memref<81xf32, #tpu.memory_space<smem>>
    %c42 = arith.constant 42 : index
    %142 = memref.load %arg2[%c42] : memref<81xf32, #tpu.memory_space<smem>>
    %c43 = arith.constant 43 : index
    %143 = memref.load %arg2[%c43] : memref<81xf32, #tpu.memory_space<smem>>
    %c44 = arith.constant 44 : index
    %144 = memref.load %arg2[%c44] : memref<81xf32, #tpu.memory_space<smem>>
    %c63 = arith.constant 63 : index
    %145 = memref.load %arg2[%c63] : memref<81xf32, #tpu.memory_space<smem>>
    %c64 = arith.constant 64 : index
    %146 = memref.load %arg2[%c64] : memref<81xf32, #tpu.memory_space<smem>>
    %c65 = arith.constant 65 : index
    %147 = memref.load %arg2[%c65] : memref<81xf32, #tpu.memory_space<smem>>
    %c66 = arith.constant 66 : index
    %148 = memref.load %arg2[%c66] : memref<81xf32, #tpu.memory_space<smem>>
    %c67 = arith.constant 67 : index
    %149 = memref.load %arg2[%c67] : memref<81xf32, #tpu.memory_space<smem>>
    %c68 = arith.constant 68 : index
    %150 = memref.load %arg2[%c68] : memref<81xf32, #tpu.memory_space<smem>>
    %c69 = arith.constant 69 : index
    %151 = memref.load %arg2[%c69] : memref<81xf32, #tpu.memory_space<smem>>
    %c70 = arith.constant 70 : index
    %152 = memref.load %arg2[%c70] : memref<81xf32, #tpu.memory_space<smem>>
    %c71 = arith.constant 71 : index
    %153 = memref.load %arg2[%c71] : memref<81xf32, #tpu.memory_space<smem>>
    %c0_5 = arith.constant 0 : index
    %c1_6 = arith.constant 1 : index
    %154 = arith.index_cast %1 : i32 to index
    %c0_7 = arith.constant 0 : index
    %155 = vector.load %arg3[%c0_5, %c1_6, %154, %c0_7] : memref<1x3x16x128xf32, #tpu.memory_space<vmem>>, vector<1x1x10x128xf32>
    %156 = vector.shape_cast %155 : vector<1x1x10x128xf32> to vector<10x128xf32>
    %157 = vector.extract_strided_slice %156 {offsets = [0, 0], sizes = [8, 128], strides = [1, 1]} : vector<10x128xf32> to vector<8x128xf32>
    %158 = vector.broadcast %127 : f32 to vector<8x128xf32>
    %159 = arith.mulf %158, %157 : vector<8x128xf32>
    %160 = arith.addf %120, %159 : vector<8x128xf32>
    %161 = vector.broadcast %136 : f32 to vector<8x128xf32>
    %162 = arith.mulf %161, %157 : vector<8x128xf32>
    %163 = arith.addf %123, %162 : vector<8x128xf32>
    %164 = vector.broadcast %145 : f32 to vector<8x128xf32>
    %165 = arith.mulf %164, %157 : vector<8x128xf32>
    %166 = arith.addf %126, %165 : vector<8x128xf32>
    %167 = vector.extract_strided_slice %156 {offsets = [1, 0], sizes = [8, 128], strides = [1, 1]} : vector<10x128xf32> to vector<8x128xf32>
    %168 = vector.broadcast %130 : f32 to vector<8x128xf32>
    %169 = arith.mulf %168, %167 : vector<8x128xf32>
    %170 = arith.addf %160, %169 : vector<8x128xf32>
    %171 = vector.broadcast %139 : f32 to vector<8x128xf32>
    %172 = arith.mulf %171, %167 : vector<8x128xf32>
    %173 = arith.addf %163, %172 : vector<8x128xf32>
    %174 = vector.broadcast %148 : f32 to vector<8x128xf32>
    %175 = arith.mulf %174, %167 : vector<8x128xf32>
    %176 = arith.addf %166, %175 : vector<8x128xf32>
    %177 = vector.extract_strided_slice %156 {offsets = [2, 0], sizes = [8, 128], strides = [1, 1]} : vector<10x128xf32> to vector<8x128xf32>
    %178 = vector.broadcast %133 : f32 to vector<8x128xf32>
    %179 = arith.mulf %178, %177 : vector<8x128xf32>
    %180 = arith.addf %170, %179 : vector<8x128xf32>
    %181 = vector.broadcast %142 : f32 to vector<8x128xf32>
    %182 = arith.mulf %181, %177 : vector<8x128xf32>
    %183 = arith.addf %173, %182 : vector<8x128xf32>
    %184 = vector.broadcast %151 : f32 to vector<8x128xf32>
    %185 = arith.mulf %184, %177 : vector<8x128xf32>
    %186 = arith.addf %176, %185 : vector<8x128xf32>
    %c127_i32_8 = arith.constant 127 : i32
    %187 = tpu.dynamic_rotate %156 by %c127_i32_8 dim 1 : vector<10x128xf32>, i32 -> vector<10x128xf32>
    %188 = vector.extract_strided_slice %187 {offsets = [0, 0], sizes = [8, 128], strides = [1, 1]} : vector<10x128xf32> to vector<8x128xf32>
    %189 = vector.broadcast %128 : f32 to vector<8x128xf32>
    %190 = arith.mulf %189, %188 : vector<8x128xf32>
    %191 = arith.addf %180, %190 : vector<8x128xf32>
    %192 = vector.broadcast %137 : f32 to vector<8x128xf32>
    %193 = arith.mulf %192, %188 : vector<8x128xf32>
    %194 = arith.addf %183, %193 : vector<8x128xf32>
    %195 = vector.broadcast %146 : f32 to vector<8x128xf32>
    %196 = arith.mulf %195, %188 : vector<8x128xf32>
    %197 = arith.addf %186, %196 : vector<8x128xf32>
    %198 = vector.extract_strided_slice %187 {offsets = [1, 0], sizes = [8, 128], strides = [1, 1]} : vector<10x128xf32> to vector<8x128xf32>
    %199 = vector.broadcast %131 : f32 to vector<8x128xf32>
    %200 = arith.mulf %199, %198 : vector<8x128xf32>
    %201 = arith.addf %191, %200 : vector<8x128xf32>
    %202 = vector.broadcast %140 : f32 to vector<8x128xf32>
    %203 = arith.mulf %202, %198 : vector<8x128xf32>
    %204 = arith.addf %194, %203 : vector<8x128xf32>
    %205 = vector.broadcast %149 : f32 to vector<8x128xf32>
    %206 = arith.mulf %205, %198 : vector<8x128xf32>
    %207 = arith.addf %197, %206 : vector<8x128xf32>
    %208 = vector.extract_strided_slice %187 {offsets = [2, 0], sizes = [8, 128], strides = [1, 1]} : vector<10x128xf32> to vector<8x128xf32>
    %209 = vector.broadcast %134 : f32 to vector<8x128xf32>
    %210 = arith.mulf %209, %208 : vector<8x128xf32>
    %211 = arith.addf %201, %210 : vector<8x128xf32>
    %212 = vector.broadcast %143 : f32 to vector<8x128xf32>
    %213 = arith.mulf %212, %208 : vector<8x128xf32>
    %214 = arith.addf %204, %213 : vector<8x128xf32>
    %215 = vector.broadcast %152 : f32 to vector<8x128xf32>
    %216 = arith.mulf %215, %208 : vector<8x128xf32>
    %217 = arith.addf %207, %216 : vector<8x128xf32>
    %c126_i32_9 = arith.constant 126 : i32
    %218 = tpu.dynamic_rotate %156 by %c126_i32_9 dim 1 : vector<10x128xf32>, i32 -> vector<10x128xf32>
    %219 = vector.extract_strided_slice %218 {offsets = [0, 0], sizes = [8, 128], strides = [1, 1]} : vector<10x128xf32> to vector<8x128xf32>
    %220 = vector.broadcast %129 : f32 to vector<8x128xf32>
    %221 = arith.mulf %220, %219 : vector<8x128xf32>
    %222 = arith.addf %211, %221 : vector<8x128xf32>
    %223 = vector.broadcast %138 : f32 to vector<8x128xf32>
    %224 = arith.mulf %223, %219 : vector<8x128xf32>
    %225 = arith.addf %214, %224 : vector<8x128xf32>
    %226 = vector.broadcast %147 : f32 to vector<8x128xf32>
    %227 = arith.mulf %226, %219 : vector<8x128xf32>
    %228 = arith.addf %217, %227 : vector<8x128xf32>
    %229 = vector.extract_strided_slice %218 {offsets = [1, 0], sizes = [8, 128], strides = [1, 1]} : vector<10x128xf32> to vector<8x128xf32>
    %230 = vector.broadcast %132 : f32 to vector<8x128xf32>
    %231 = arith.mulf %230, %229 : vector<8x128xf32>
    %232 = arith.addf %222, %231 : vector<8x128xf32>
    %233 = vector.broadcast %141 : f32 to vector<8x128xf32>
    %234 = arith.mulf %233, %229 : vector<8x128xf32>
    %235 = arith.addf %225, %234 : vector<8x128xf32>
    %236 = vector.broadcast %150 : f32 to vector<8x128xf32>
    %237 = arith.mulf %236, %229 : vector<8x128xf32>
    %238 = arith.addf %228, %237 : vector<8x128xf32>
    %239 = vector.extract_strided_slice %218 {offsets = [2, 0], sizes = [8, 128], strides = [1, 1]} : vector<10x128xf32> to vector<8x128xf32>
    %240 = vector.broadcast %135 : f32 to vector<8x128xf32>
    %241 = arith.mulf %240, %239 : vector<8x128xf32>
    %242 = arith.addf %232, %241 : vector<8x128xf32>
    %243 = vector.broadcast %144 : f32 to vector<8x128xf32>
    %244 = arith.mulf %243, %239 : vector<8x128xf32>
    %245 = arith.addf %235, %244 : vector<8x128xf32>
    %246 = vector.broadcast %153 : f32 to vector<8x128xf32>
    %247 = arith.mulf %246, %239 : vector<8x128xf32>
    %248 = arith.addf %238, %247 : vector<8x128xf32>
    %c18 = arith.constant 18 : index
    %249 = memref.load %arg2[%c18] : memref<81xf32, #tpu.memory_space<smem>>
    %c19 = arith.constant 19 : index
    %250 = memref.load %arg2[%c19] : memref<81xf32, #tpu.memory_space<smem>>
    %c20 = arith.constant 20 : index
    %251 = memref.load %arg2[%c20] : memref<81xf32, #tpu.memory_space<smem>>
    %c21 = arith.constant 21 : index
    %252 = memref.load %arg2[%c21] : memref<81xf32, #tpu.memory_space<smem>>
    %c22 = arith.constant 22 : index
    %253 = memref.load %arg2[%c22] : memref<81xf32, #tpu.memory_space<smem>>
    %c23 = arith.constant 23 : index
    %254 = memref.load %arg2[%c23] : memref<81xf32, #tpu.memory_space<smem>>
    %c24 = arith.constant 24 : index
    %255 = memref.load %arg2[%c24] : memref<81xf32, #tpu.memory_space<smem>>
    %c25 = arith.constant 25 : index
    %256 = memref.load %arg2[%c25] : memref<81xf32, #tpu.memory_space<smem>>
    %c26 = arith.constant 26 : index
    %257 = memref.load %arg2[%c26] : memref<81xf32, #tpu.memory_space<smem>>
    %c45 = arith.constant 45 : index
    %258 = memref.load %arg2[%c45] : memref<81xf32, #tpu.memory_space<smem>>
    %c46 = arith.constant 46 : index
    %259 = memref.load %arg2[%c46] : memref<81xf32, #tpu.memory_space<smem>>
    %c47 = arith.constant 47 : index
    %260 = memref.load %arg2[%c47] : memref<81xf32, #tpu.memory_space<smem>>
    %c48 = arith.constant 48 : index
    %261 = memref.load %arg2[%c48] : memref<81xf32, #tpu.memory_space<smem>>
    %c49 = arith.constant 49 : index
    %262 = memref.load %arg2[%c49] : memref<81xf32, #tpu.memory_space<smem>>
    %c50 = arith.constant 50 : index
    %263 = memref.load %arg2[%c50] : memref<81xf32, #tpu.memory_space<smem>>
    %c51 = arith.constant 51 : index
    %264 = memref.load %arg2[%c51] : memref<81xf32, #tpu.memory_space<smem>>
    %c52 = arith.constant 52 : index
    %265 = memref.load %arg2[%c52] : memref<81xf32, #tpu.memory_space<smem>>
    %c53 = arith.constant 53 : index
    %266 = memref.load %arg2[%c53] : memref<81xf32, #tpu.memory_space<smem>>
    %c72 = arith.constant 72 : index
    %267 = memref.load %arg2[%c72] : memref<81xf32, #tpu.memory_space<smem>>
    %c73 = arith.constant 73 : index
    %268 = memref.load %arg2[%c73] : memref<81xf32, #tpu.memory_space<smem>>
    %c74 = arith.constant 74 : index
    %269 = memref.load %arg2[%c74] : memref<81xf32, #tpu.memory_space<smem>>
    %c75 = arith.constant 75 : index
    %270 = memref.load %arg2[%c75] : memref<81xf32, #tpu.memory_space<smem>>
    %c76 = arith.constant 76 : index
    %271 = memref.load %arg2[%c76] : memref<81xf32, #tpu.memory_space<smem>>
    %c77 = arith.constant 77 : index
    %272 = memref.load %arg2[%c77] : memref<81xf32, #tpu.memory_space<smem>>
    %c78 = arith.constant 78 : index
    %273 = memref.load %arg2[%c78] : memref<81xf32, #tpu.memory_space<smem>>
    %c79 = arith.constant 79 : index
    %274 = memref.load %arg2[%c79] : memref<81xf32, #tpu.memory_space<smem>>
    %c80 = arith.constant 80 : index
    %275 = memref.load %arg2[%c80] : memref<81xf32, #tpu.memory_space<smem>>
    %c0_10 = arith.constant 0 : index
    %c2_11 = arith.constant 2 : index
    %276 = arith.index_cast %1 : i32 to index
    %c0_12 = arith.constant 0 : index
    %277 = vector.load %arg3[%c0_10, %c2_11, %276, %c0_12] : memref<1x3x16x128xf32, #tpu.memory_space<vmem>>, vector<1x1x10x128xf32>
    %278 = vector.shape_cast %277 : vector<1x1x10x128xf32> to vector<10x128xf32>
    %279 = vector.extract_strided_slice %278 {offsets = [0, 0], sizes = [8, 128], strides = [1, 1]} : vector<10x128xf32> to vector<8x128xf32>
    %280 = vector.broadcast %249 : f32 to vector<8x128xf32>
    %281 = arith.mulf %280, %279 : vector<8x128xf32>
    %282 = arith.addf %242, %281 : vector<8x128xf32>
    %283 = vector.broadcast %258 : f32 to vector<8x128xf32>
    %284 = arith.mulf %283, %279 : vector<8x128xf32>
    %285 = arith.addf %245, %284 : vector<8x128xf32>
    %286 = vector.broadcast %267 : f32 to vector<8x128xf32>
    %287 = arith.mulf %286, %279 : vector<8x128xf32>
    %288 = arith.addf %248, %287 : vector<8x128xf32>
    %289 = vector.extract_strided_slice %278 {offsets = [1, 0], sizes = [8, 128], strides = [1, 1]} : vector<10x128xf32> to vector<8x128xf32>
    %290 = vector.broadcast %252 : f32 to vector<8x128xf32>
    %291 = arith.mulf %290, %289 : vector<8x128xf32>
    %292 = arith.addf %282, %291 : vector<8x128xf32>
    %293 = vector.broadcast %261 : f32 to vector<8x128xf32>
    %294 = arith.mulf %293, %289 : vector<8x128xf32>
    %295 = arith.addf %285, %294 : vector<8x128xf32>
    %296 = vector.broadcast %270 : f32 to vector<8x128xf32>
    %297 = arith.mulf %296, %289 : vector<8x128xf32>
    %298 = arith.addf %288, %297 : vector<8x128xf32>
    %299 = vector.extract_strided_slice %278 {offsets = [2, 0], sizes = [8, 128], strides = [1, 1]} : vector<10x128xf32> to vector<8x128xf32>
    %300 = vector.broadcast %255 : f32 to vector<8x128xf32>
    %301 = arith.mulf %300, %299 : vector<8x128xf32>
    %302 = arith.addf %292, %301 : vector<8x128xf32>
    %303 = vector.broadcast %264 : f32 to vector<8x128xf32>
    %304 = arith.mulf %303, %299 : vector<8x128xf32>
    %305 = arith.addf %295, %304 : vector<8x128xf32>
    %306 = vector.broadcast %273 : f32 to vector<8x128xf32>
    %307 = arith.mulf %306, %299 : vector<8x128xf32>
    %308 = arith.addf %298, %307 : vector<8x128xf32>
    %c127_i32_13 = arith.constant 127 : i32
    %309 = tpu.dynamic_rotate %278 by %c127_i32_13 dim 1 : vector<10x128xf32>, i32 -> vector<10x128xf32>
    %310 = vector.extract_strided_slice %309 {offsets = [0, 0], sizes = [8, 128], strides = [1, 1]} : vector<10x128xf32> to vector<8x128xf32>
    %311 = vector.broadcast %250 : f32 to vector<8x128xf32>
    %312 = arith.mulf %311, %310 : vector<8x128xf32>
    %313 = arith.addf %302, %312 : vector<8x128xf32>
    %314 = vector.broadcast %259 : f32 to vector<8x128xf32>
    %315 = arith.mulf %314, %310 : vector<8x128xf32>
    %316 = arith.addf %305, %315 : vector<8x128xf32>
    %317 = vector.broadcast %268 : f32 to vector<8x128xf32>
    %318 = arith.mulf %317, %310 : vector<8x128xf32>
    %319 = arith.addf %308, %318 : vector<8x128xf32>
    %320 = vector.extract_strided_slice %309 {offsets = [1, 0], sizes = [8, 128], strides = [1, 1]} : vector<10x128xf32> to vector<8x128xf32>
    %321 = vector.broadcast %253 : f32 to vector<8x128xf32>
    %322 = arith.mulf %321, %320 : vector<8x128xf32>
    %323 = arith.addf %313, %322 : vector<8x128xf32>
    %324 = vector.broadcast %262 : f32 to vector<8x128xf32>
    %325 = arith.mulf %324, %320 : vector<8x128xf32>
    %326 = arith.addf %316, %325 : vector<8x128xf32>
    %327 = vector.broadcast %271 : f32 to vector<8x128xf32>
    %328 = arith.mulf %327, %320 : vector<8x128xf32>
    %329 = arith.addf %319, %328 : vector<8x128xf32>
    %330 = vector.extract_strided_slice %309 {offsets = [2, 0], sizes = [8, 128], strides = [1, 1]} : vector<10x128xf32> to vector<8x128xf32>
    %331 = vector.broadcast %256 : f32 to vector<8x128xf32>
    %332 = arith.mulf %331, %330 : vector<8x128xf32>
    %333 = arith.addf %323, %332 : vector<8x128xf32>
    %334 = vector.broadcast %265 : f32 to vector<8x128xf32>
    %335 = arith.mulf %334, %330 : vector<8x128xf32>
    %336 = arith.addf %326, %335 : vector<8x128xf32>
    %337 = vector.broadcast %274 : f32 to vector<8x128xf32>
    %338 = arith.mulf %337, %330 : vector<8x128xf32>
    %339 = arith.addf %329, %338 : vector<8x128xf32>
    %c126_i32_14 = arith.constant 126 : i32
    %340 = tpu.dynamic_rotate %278 by %c126_i32_14 dim 1 : vector<10x128xf32>, i32 -> vector<10x128xf32>
    %341 = vector.extract_strided_slice %340 {offsets = [0, 0], sizes = [8, 128], strides = [1, 1]} : vector<10x128xf32> to vector<8x128xf32>
    %342 = vector.broadcast %251 : f32 to vector<8x128xf32>
    %343 = arith.mulf %342, %341 : vector<8x128xf32>
    %344 = arith.addf %333, %343 : vector<8x128xf32>
    %345 = vector.broadcast %260 : f32 to vector<8x128xf32>
    %346 = arith.mulf %345, %341 : vector<8x128xf32>
    %347 = arith.addf %336, %346 : vector<8x128xf32>
    %348 = vector.broadcast %269 : f32 to vector<8x128xf32>
    %349 = arith.mulf %348, %341 : vector<8x128xf32>
    %350 = arith.addf %339, %349 : vector<8x128xf32>
    %351 = vector.extract_strided_slice %340 {offsets = [1, 0], sizes = [8, 128], strides = [1, 1]} : vector<10x128xf32> to vector<8x128xf32>
    %352 = vector.broadcast %254 : f32 to vector<8x128xf32>
    %353 = arith.mulf %352, %351 : vector<8x128xf32>
    %354 = arith.addf %344, %353 : vector<8x128xf32>
    %355 = vector.broadcast %263 : f32 to vector<8x128xf32>
    %356 = arith.mulf %355, %351 : vector<8x128xf32>
    %357 = arith.addf %347, %356 : vector<8x128xf32>
    %358 = vector.broadcast %272 : f32 to vector<8x128xf32>
    %359 = arith.mulf %358, %351 : vector<8x128xf32>
    %360 = arith.addf %350, %359 : vector<8x128xf32>
    %361 = vector.extract_strided_slice %340 {offsets = [2, 0], sizes = [8, 128], strides = [1, 1]} : vector<10x128xf32> to vector<8x128xf32>
    %362 = vector.broadcast %257 : f32 to vector<8x128xf32>
    %363 = arith.mulf %362, %361 : vector<8x128xf32>
    %364 = arith.addf %354, %363 : vector<8x128xf32>
    %365 = vector.broadcast %266 : f32 to vector<8x128xf32>
    %366 = arith.mulf %365, %361 : vector<8x128xf32>
    %367 = arith.addf %357, %366 : vector<8x128xf32>
    %368 = vector.broadcast %275 : f32 to vector<8x128xf32>
    %369 = arith.mulf %368, %361 : vector<8x128xf32>
    %370 = arith.addf %360, %369 : vector<8x128xf32>
    %c0_15 = arith.constant 0 : index
    %c0_16 = arith.constant 0 : index
    %371 = arith.index_cast %1 : i32 to index
    %c0_17 = arith.constant 0 : index
    %372 = vector.load %arg5[%c0_15, %c0_16, %371, %c0_17] : memref<1x3x16x128xf32, #tpu.memory_space<vmem>>, vector<1x1x8x128xf32>
    %373 = vector.shape_cast %372 : vector<1x1x8x128xf32> to vector<8x128xf32>
    %374 = vector.shape_cast %364 : vector<8x128xf32> to vector<1x1x8x128xf32>
    tpu.vector_store %arg5[%c0_15, %c0_16, %371, %c0_17], %374 {strides = array<i32>} : memref<1x3x16x128xf32, #tpu.memory_space<vmem>>, vector<1x1x8x128xf32>,
    %c0_18 = arith.constant 0 : index
    %c1_19 = arith.constant 1 : index
    %375 = arith.index_cast %1 : i32 to index
    %c0_20 = arith.constant 0 : index
    %376 = vector.load %arg5[%c0_18, %c1_19, %375, %c0_20] : memref<1x3x16x128xf32, #tpu.memory_space<vmem>>, vector<1x1x8x128xf32>
    %377 = vector.shape_cast %376 : vector<1x1x8x128xf32> to vector<8x128xf32>
    %378 = vector.shape_cast %367 : vector<8x128xf32> to vector<1x1x8x128xf32>
    tpu.vector_store %arg5[%c0_18, %c1_19, %375, %c0_20], %378 {strides = array<i32>} : memref<1x3x16x128xf32, #tpu.memory_space<vmem>>, vector<1x1x8x128xf32>,
    %c0_21 = arith.constant 0 : index
    %c2_22 = arith.constant 2 : index
    %379 = arith.index_cast %1 : i32 to index
    %c0_23 = arith.constant 0 : index
    %380 = vector.load %arg5[%c0_21, %c2_22, %379, %c0_23] : memref<1x3x16x128xf32, #tpu.memory_space<vmem>>, vector<1x1x8x128xf32>
    %381 = vector.shape_cast %380 : vector<1x1x8x128xf32> to vector<8x128xf32>
    %382 = vector.shape_cast %370 : vector<8x128xf32> to vector<1x1x8x128xf32>
    tpu.vector_store %arg5[%c0_21, %c2_22, %379, %c0_23], %382 {strides = array<i32>} : memref<1x3x16x128xf32, #tpu.memory_space<vmem>>, vector<1x1x8x128xf32>,
    %c1_i32 = arith.constant 1 : i32
    %cst_24 = arith.constant 0.000000e+00 : f32
    %383 = vector.broadcast %cst_24 : f32 to vector<8x128xf32>
    %cst_25 = arith.constant 0.000000e+00 : f32
    %384 = vector.broadcast %cst_25 : f32 to vector<8x128xf32>
    %cst_26 = arith.constant 0.000000e+00 : f32
    %385 = vector.broadcast %cst_26 : f32 to vector<8x128xf32>
    %c0_27 = arith.constant 0 : index
    %386 = memref.load %arg2[%c0_27] : memref<81xf32, #tpu.memory_space<smem>>
    %c1_28 = arith.constant 1 : index
    %387 = memref.load %arg2[%c1_28] : memref<81xf32, #tpu.memory_space<smem>>
    %c2_29 = arith.constant 2 : index
    %388 = memref.load %arg2[%c2_29] : memref<81xf32, #tpu.memory_space<smem>>
    %c3_30 = arith.constant 3 : index
    %389 = memref.load %arg2[%c3_30] : memref<81xf32, #tpu.memory_space<smem>>
    %c4_31 = arith.constant 4 : index
    %390 = memref.load %arg2[%c4_31] : memref<81xf32, #tpu.memory_space<smem>>
    %c5_32 = arith.constant 5 : index
    %391 = memref.load %arg2[%c5_32] : memref<81xf32, #tpu.memory_space<smem>>
    %c6_33 = arith.constant 6 : index
    %392 = memref.load %arg2[%c6_33] : memref<81xf32, #tpu.memory_space<smem>>
    %c7_34 = arith.constant 7 : index
    %393 = memref.load %arg2[%c7_34] : memref<81xf32, #tpu.memory_space<smem>>
    %c8_35 = arith.constant 8 : index
    %394 = memref.load %arg2[%c8_35] : memref<81xf32, #tpu.memory_space<smem>>
    %c27_36 = arith.constant 27 : index
    %395 = memref.load %arg2[%c27_36] : memref<81xf32, #tpu.memory_space<smem>>
    %c28_37 = arith.constant 28 : index
    %396 = memref.load %arg2[%c28_37] : memref<81xf32, #tpu.memory_space<smem>>
    %c29_38 = arith.constant 29 : index
    %397 = memref.load %arg2[%c29_38] : memref<81xf32, #tpu.memory_space<smem>>
    %c30_39 = arith.constant 30 : index
    %398 = memref.load %arg2[%c30_39] : memref<81xf32, #tpu.memory_space<smem>>
    %c31_40 = arith.constant 31 : index
    %399 = memref.load %arg2[%c31_40] : memref<81xf32, #tpu.memory_space<smem>>
    %c32_41 = arith.constant 32 : index
    %400 = memref.load %arg2[%c32_41] : memref<81xf32, #tpu.memory_space<smem>>
    %c33_42 = arith.constant 33 : index
    %401 = memref.load %arg2[%c33_42] : memref<81xf32, #tpu.memory_space<smem>>
    %c34_43 = arith.constant 34 : index
    %402 = memref.load %arg2[%c34_43] : memref<81xf32, #tpu.memory_space<smem>>
    %c35_44 = arith.constant 35 : index
    %403 = memref.load %arg2[%c35_44] : memref<81xf32, #tpu.memory_space<smem>>
    %c54_45 = arith.constant 54 : index
    %404 = memref.load %arg2[%c54_45] : memref<81xf32, #tpu.memory_space<smem>>
    %c55_46 = arith.constant 55 : index
    %405 = memref.load %arg2[%c55_46] : memref<81xf32, #tpu.memory_space<smem>>
    %c56_47 = arith.constant 56 : index
    %406 = memref.load %arg2[%c56_47] : memref<81xf32, #tpu.memory_space<smem>>
    %c57_48 = arith.constant 57 : index
    %407 = memref.load %arg2[%c57_48] : memref<81xf32, #tpu.memory_space<smem>>
    %c58_49 = arith.constant 58 : index
    %408 = memref.load %arg2[%c58_49] : memref<81xf32, #tpu.memory_space<smem>>
    %c59_50 = arith.constant 59 : index
    %409 = memref.load %arg2[%c59_50] : memref<81xf32, #tpu.memory_space<smem>>
    %c60_51 = arith.constant 60 : index
    %410 = memref.load %arg2[%c60_51] : memref<81xf32, #tpu.memory_space<smem>>
    %c61_52 = arith.constant 61 : index
    %411 = memref.load %arg2[%c61_52] : memref<81xf32, #tpu.memory_space<smem>>
    %c62_53 = arith.constant 62 : index
    %412 = memref.load %arg2[%c62_53] : memref<81xf32, #tpu.memory_space<smem>>
    %c0_54 = arith.constant 0 : index
    %c0_55 = arith.constant 0 : index
    %c8_56 = arith.constant 8 : index
    %c0_57 = arith.constant 0 : index
    %413 = vector.load %arg3[%c0_54, %c0_55, %c8_56, %c0_57] : memref<1x3x16x128xf32, #tpu.memory_space<vmem>>, vector<1x1x8x128xf32>
    %414 = vector.shape_cast %413 : vector<1x1x8x128xf32> to vector<8x128xf32>
    %c0_58 = arith.constant 0 : index
    %c0_59 = arith.constant 0 : index
    %c0_60 = arith.constant 0 : index
    %c0_61 = arith.constant 0 : index
    %415 = vector.load %arg4[%c0_58, %c0_59, %c0_60, %c0_61] : memref<1x3x8x128xf32, #tpu.memory_space<vmem>>, vector<1x1x8x128xf32>
    %416 = vector.shape_cast %415 : vector<1x1x8x128xf32> to vector<8x128xf32>
    %417 = tpu.concatenate %414, %416 in 0 : vector<8x128xf32>, vector<8x128xf32> -> vector<16x128xf32>
    %418 = vector.extract_strided_slice %417 {offsets = [0, 0], sizes = [8, 128], strides = [1, 1]} : vector<16x128xf32> to vector<8x128xf32>
    %419 = vector.broadcast %386 : f32 to vector<8x128xf32>
    %420 = arith.mulf %419, %418 : vector<8x128xf32>
    %421 = arith.addf %383, %420 : vector<8x128xf32>
    %422 = vector.broadcast %395 : f32 to vector<8x128xf32>
    %423 = arith.mulf %422, %418 : vector<8x128xf32>
    %424 = arith.addf %384, %423 : vector<8x128xf32>
    %425 = vector.broadcast %404 : f32 to vector<8x128xf32>
    %426 = arith.mulf %425, %418 : vector<8x128xf32>
    %427 = arith.addf %385, %426 : vector<8x128xf32>
    %428 = vector.extract_strided_slice %417 {offsets = [1, 0], sizes = [8, 128], strides = [1, 1]} : vector<16x128xf32> to vector<8x128xf32>
    %429 = vector.broadcast %389 : f32 to vector<8x128xf32>
    %430 = arith.mulf %429, %428 : vector<8x128xf32>
    %431 = arith.addf %421, %430 : vector<8x128xf32>
    %432 = vector.broadcast %398 : f32 to vector<8x128xf32>
    %433 = arith.mulf %432, %428 : vector<8x128xf32>
    %434 = arith.addf %424, %433 : vector<8x128xf32>
    %435 = vector.broadcast %407 : f32 to vector<8x128xf32>
    %436 = arith.mulf %435, %428 : vector<8x128xf32>
    %437 = arith.addf %427, %436 : vector<8x128xf32>
    %438 = vector.extract_strided_slice %417 {offsets = [2, 0], sizes = [8, 128], strides = [1, 1]} : vector<16x128xf32> to vector<8x128xf32>
    %439 = vector.broadcast %392 : f32 to vector<8x128xf32>
    %440 = arith.mulf %439, %438 : vector<8x128xf32>
    %441 = arith.addf %431, %440 : vector<8x128xf32>
    %442 = vector.broadcast %401 : f32 to vector<8x128xf32>
    %443 = arith.mulf %442, %438 : vector<8x128xf32>
    %444 = arith.addf %434, %443 : vector<8x128xf32>
    %445 = vector.broadcast %410 : f32 to vector<8x128xf32>
    %446 = arith.mulf %445, %438 : vector<8x128xf32>
    %447 = arith.addf %437, %446 : vector<8x128xf32>
    %c127_i32_62 = arith.constant 127 : i32
    %448 = tpu.dynamic_rotate %417 by %c127_i32_62 dim 1 : vector<16x128xf32>, i32 -> vector<16x128xf32>
    %449 = vector.extract_strided_slice %448 {offsets = [0, 0], sizes = [8, 128], strides = [1, 1]} : vector<16x128xf32> to vector<8x128xf32>
    %450 = vector.broadcast %387 : f32 to vector<8x128xf32>
    %451 = arith.mulf %450, %449 : vector<8x128xf32>
    %452 = arith.addf %441, %451 : vector<8x128xf32>
    %453 = vector.broadcast %396 : f32 to vector<8x128xf32>
    %454 = arith.mulf %453, %449 : vector<8x128xf32>
    %455 = arith.addf %444, %454 : vector<8x128xf32>
    %456 = vector.broadcast %405 : f32 to vector<8x128xf32>
    %457 = arith.mulf %456, %449 : vector<8x128xf32>
    %458 = arith.addf %447, %457 : vector<8x128xf32>
    %459 = vector.extract_strided_slice %448 {offsets = [1, 0], sizes = [8, 128], strides = [1, 1]} : vector<16x128xf32> to vector<8x128xf32>
    %460 = vector.broadcast %390 : f32 to vector<8x128xf32>
    %461 = arith.mulf %460, %459 : vector<8x128xf32>
    %462 = arith.addf %452, %461 : vector<8x128xf32>
    %463 = vector.broadcast %399 : f32 to vector<8x128xf32>
    %464 = arith.mulf %463, %459 : vector<8x128xf32>
    %465 = arith.addf %455, %464 : vector<8x128xf32>
    %466 = vector.broadcast %408 : f32 to vector<8x128xf32>
    %467 = arith.mulf %466, %459 : vector<8x128xf32>
    %468 = arith.addf %458, %467 : vector<8x128xf32>
    %469 = vector.extract_strided_slice %448 {offsets = [2, 0], sizes = [8, 128], strides = [1, 1]} : vector<16x128xf32> to vector<8x128xf32>
    %470 = vector.broadcast %393 : f32 to vector<8x128xf32>
    %471 = arith.mulf %470, %469 : vector<8x128xf32>
    %472 = arith.addf %462, %471 : vector<8x128xf32>
    %473 = vector.broadcast %402 : f32 to vector<8x128xf32>
    %474 = arith.mulf %473, %469 : vector<8x128xf32>
    %475 = arith.addf %465, %474 : vector<8x128xf32>
    %476 = vector.broadcast %411 : f32 to vector<8x128xf32>
    %477 = arith.mulf %476, %469 : vector<8x128xf32>
    %478 = arith.addf %468, %477 : vector<8x128xf32>
    %c126_i32_63 = arith.constant 126 : i32
    %479 = tpu.dynamic_rotate %417 by %c126_i32_63 dim 1 : vector<16x128xf32>, i32 -> vector<16x128xf32>
    %480 = vector.extract_strided_slice %479 {offsets = [0, 0], sizes = [8, 128], strides = [1, 1]} : vector<16x128xf32> to vector<8x128xf32>
    %481 = vector.broadcast %388 : f32 to vector<8x128xf32>
    %482 = arith.mulf %481, %480 : vector<8x128xf32>
    %483 = arith.addf %472, %482 : vector<8x128xf32>
    %484 = vector.broadcast %397 : f32 to vector<8x128xf32>
    %485 = arith.mulf %484, %480 : vector<8x128xf32>
    %486 = arith.addf %475, %485 : vector<8x128xf32>
    %487 = vector.broadcast %406 : f32 to vector<8x128xf32>
    %488 = arith.mulf %487, %480 : vector<8x128xf32>
    %489 = arith.addf %478, %488 : vector<8x128xf32>
    %490 = vector.extract_strided_slice %479 {offsets = [1, 0], sizes = [8, 128], strides = [1, 1]} : vector<16x128xf32> to vector<8x128xf32>
    %491 = vector.broadcast %391 : f32 to vector<8x128xf32>
    %492 = arith.mulf %491, %490 : vector<8x128xf32>
    %493 = arith.addf %483, %492 : vector<8x128xf32>
    %494 = vector.broadcast %400 : f32 to vector<8x128xf32>
    %495 = arith.mulf %494, %490 : vector<8x128xf32>
    %496 = arith.addf %486, %495 : vector<8x128xf32>
    %497 = vector.broadcast %409 : f32 to vector<8x128xf32>
    %498 = arith.mulf %497, %490 : vector<8x128xf32>
    %499 = arith.addf %489, %498 : vector<8x128xf32>
    %500 = vector.extract_strided_slice %479 {offsets = [2, 0], sizes = [8, 128], strides = [1, 1]} : vector<16x128xf32> to vector<8x128xf32>
    %501 = vector.broadcast %394 : f32 to vector<8x128xf32>
    %502 = arith.mulf %501, %500 : vector<8x128xf32>
    %503 = arith.addf %493, %502 : vector<8x128xf32>
    %504 = vector.broadcast %403 : f32 to vector<8x128xf32>
    %505 = arith.mulf %504, %500 : vector<8x128xf32>
    %506 = arith.addf %496, %505 : vector<8x128xf32>
    %507 = vector.broadcast %412 : f32 to vector<8x128xf32>
    %508 = arith.mulf %507, %500 : vector<8x128xf32>
    %509 = arith.addf %499, %508 : vector<8x128xf32>
    %c9_64 = arith.constant 9 : index
    %510 = memref.load %arg2[%c9_64] : memref<81xf32, #tpu.memory_space<smem>>
    %c10_65 = arith.constant 10 : index
    %511 = memref.load %arg2[%c10_65] : memref<81xf32, #tpu.memory_space<smem>>
    %c11_66 = arith.constant 11 : index
    %512 = memref.load %arg2[%c11_66] : memref<81xf32, #tpu.memory_space<smem>>
    %c12_67 = arith.constant 12 : index
    %513 = memref.load %arg2[%c12_67] : memref<81xf32, #tpu.memory_space<smem>>
    %c13_68 = arith.constant 13 : index
    %514 = memref.load %arg2[%c13_68] : memref<81xf32, #tpu.memory_space<smem>>
    %c14_69 = arith.constant 14 : index
    %515 = memref.load %arg2[%c14_69] : memref<81xf32, #tpu.memory_space<smem>>
    %c15_70 = arith.constant 15 : index
    %516 = memref.load %arg2[%c15_70] : memref<81xf32, #tpu.memory_space<smem>>
    %c16_71 = arith.constant 16 : index
    %517 = memref.load %arg2[%c16_71] : memref<81xf32, #tpu.memory_space<smem>>
    %c17_72 = arith.constant 17 : index
    %518 = memref.load %arg2[%c17_72] : memref<81xf32, #tpu.memory_space<smem>>
    %c36_73 = arith.constant 36 : index
    %519 = memref.load %arg2[%c36_73] : memref<81xf32, #tpu.memory_space<smem>>
    %c37_74 = arith.constant 37 : index
    %520 = memref.load %arg2[%c37_74] : memref<81xf32, #tpu.memory_space<smem>>
    %c38_75 = arith.constant 38 : index
    %521 = memref.load %arg2[%c38_75] : memref<81xf32, #tpu.memory_space<smem>>
    %c39_76 = arith.constant 39 : index
    %522 = memref.load %arg2[%c39_76] : memref<81xf32, #tpu.memory_space<smem>>
    %c40_77 = arith.constant 40 : index
    %523 = memref.load %arg2[%c40_77] : memref<81xf32, #tpu.memory_space<smem>>
    %c41_78 = arith.constant 41 : index
    %524 = memref.load %arg2[%c41_78] : memref<81xf32, #tpu.memory_space<smem>>
    %c42_79 = arith.constant 42 : index
    %525 = memref.load %arg2[%c42_79] : memref<81xf32, #tpu.memory_space<smem>>
    %c43_80 = arith.constant 43 : index
    %526 = memref.load %arg2[%c43_80] : memref<81xf32, #tpu.memory_space<smem>>
    %c44_81 = arith.constant 44 : index
    %527 = memref.load %arg2[%c44_81] : memref<81xf32, #tpu.memory_space<smem>>
    %c63_82 = arith.constant 63 : index
    %528 = memref.load %arg2[%c63_82] : memref<81xf32, #tpu.memory_space<smem>>
    %c64_83 = arith.constant 64 : index
    %529 = memref.load %arg2[%c64_83] : memref<81xf32, #tpu.memory_space<smem>>
    %c65_84 = arith.constant 65 : index
    %530 = memref.load %arg2[%c65_84] : memref<81xf32, #tpu.memory_space<smem>>
    %c66_85 = arith.constant 66 : index
    %531 = memref.load %arg2[%c66_85] : memref<81xf32, #tpu.memory_space<smem>>
    %c67_86 = arith.constant 67 : index
    %532 = memref.load %arg2[%c67_86] : memref<81xf32, #tpu.memory_space<smem>>
    %c68_87 = arith.constant 68 : index
    %533 = memref.load %arg2[%c68_87] : memref<81xf32, #tpu.memory_space<smem>>
    %c69_88 = arith.constant 69 : index
    %534 = memref.load %arg2[%c69_88] : memref<81xf32, #tpu.memory_space<smem>>
    %c70_89 = arith.constant 70 : index
    %535 = memref.load %arg2[%c70_89] : memref<81xf32, #tpu.memory_space<smem>>
    %c71_90 = arith.constant 71 : index
    %536 = memref.load %arg2[%c71_90] : memref<81xf32, #tpu.memory_space<smem>>
    %c0_91 = arith.constant 0 : index
    %c1_92 = arith.constant 1 : index
    %c8_93 = arith.constant 8 : index
    %c0_94 = arith.constant 0 : index
    %537 = vector.load %arg3[%c0_91, %c1_92, %c8_93, %c0_94] : memref<1x3x16x128xf32, #tpu.memory_space<vmem>>, vector<1x1x8x128xf32>
    %538 = vector.shape_cast %537 : vector<1x1x8x128xf32> to vector<8x128xf32>
    %c0_95 = arith.constant 0 : index
    %c1_96 = arith.constant 1 : index
    %c0_97 = arith.constant 0 : index
    %c0_98 = arith.constant 0 : index
    %539 = vector.load %arg4[%c0_95, %c1_96, %c0_97, %c0_98] : memref<1x3x8x128xf32, #tpu.memory_space<vmem>>, vector<1x1x8x128xf32>
    %540 = vector.shape_cast %539 : vector<1x1x8x128xf32> to vector<8x128xf32>
    %541 = tpu.concatenate %538, %540 in 0 : vector<8x128xf32>, vector<8x128xf32> -> vector<16x128xf32>
    %542 = vector.extract_strided_slice %541 {offsets = [0, 0], sizes = [8, 128], strides = [1, 1]} : vector<16x128xf32> to vector<8x128xf32>
    %543 = vector.broadcast %510 : f32 to vector<8x128xf32>
    %544 = arith.mulf %543, %542 : vector<8x128xf32>
    %545 = arith.addf %503, %544 : vector<8x128xf32>
    %546 = vector.broadcast %519 : f32 to vector<8x128xf32>
    %547 = arith.mulf %546, %542 : vector<8x128xf32>
    %548 = arith.addf %506, %547 : vector<8x128xf32>
    %549 = vector.broadcast %528 : f32 to vector<8x128xf32>
    %550 = arith.mulf %549, %542 : vector<8x128xf32>
    %551 = arith.addf %509, %550 : vector<8x128xf32>
    %552 = vector.extract_strided_slice %541 {offsets = [1, 0], sizes = [8, 128], strides = [1, 1]} : vector<16x128xf32> to vector<8x128xf32>
    %553 = vector.broadcast %513 : f32 to vector<8x128xf32>
    %554 = arith.mulf %553, %552 : vector<8x128xf32>
    %555 = arith.addf %545, %554 : vector<8x128xf32>
    %556 = vector.broadcast %522 : f32 to vector<8x128xf32>
    %557 = arith.mulf %556, %552 : vector<8x128xf32>
    %558 = arith.addf %548, %557 : vector<8x128xf32>
    %559 = vector.broadcast %531 : f32 to vector<8x128xf32>
    %560 = arith.mulf %559, %552 : vector<8x128xf32>
    %561 = arith.addf %551, %560 : vector<8x128xf32>
    %562 = vector.extract_strided_slice %541 {offsets = [2, 0], sizes = [8, 128], strides = [1, 1]} : vector<16x128xf32> to vector<8x128xf32>
    %563 = vector.broadcast %516 : f32 to vector<8x128xf32>
    %564 = arith.mulf %563, %562 : vector<8x128xf32>
    %565 = arith.addf %555, %564 : vector<8x128xf32>
    %566 = vector.broadcast %525 : f32 to vector<8x128xf32>
    %567 = arith.mulf %566, %562 : vector<8x128xf32>
    %568 = arith.addf %558, %567 : vector<8x128xf32>
    %569 = vector.broadcast %534 : f32 to vector<8x128xf32>
    %570 = arith.mulf %569, %562 : vector<8x128xf32>
    %571 = arith.addf %561, %570 : vector<8x128xf32>
    %c127_i32_99 = arith.constant 127 : i32
    %572 = tpu.dynamic_rotate %541 by %c127_i32_99 dim 1 : vector<16x128xf32>, i32 -> vector<16x128xf32>
    %573 = vector.extract_strided_slice %572 {offsets = [0, 0], sizes = [8, 128], strides = [1, 1]} : vector<16x128xf32> to vector<8x128xf32>
    %574 = vector.broadcast %511 : f32 to vector<8x128xf32>
    %575 = arith.mulf %574, %573 : vector<8x128xf32>
    %576 = arith.addf %565, %575 : vector<8x128xf32>
    %577 = vector.broadcast %520 : f32 to vector<8x128xf32>
    %578 = arith.mulf %577, %573 : vector<8x128xf32>
    %579 = arith.addf %568, %578 : vector<8x128xf32>
    %580 = vector.broadcast %529 : f32 to vector<8x128xf32>
    %581 = arith.mulf %580, %573 : vector<8x128xf32>
    %582 = arith.addf %571, %581 : vector<8x128xf32>
    %583 = vector.extract_strided_slice %572 {offsets = [1, 0], sizes = [8, 128], strides = [1, 1]} : vector<16x128xf32> to vector<8x128xf32>
    %584 = vector.broadcast %514 : f32 to vector<8x128xf32>
    %585 = arith.mulf %584, %583 : vector<8x128xf32>
    %586 = arith.addf %576, %585 : vector<8x128xf32>
    %587 = vector.broadcast %523 : f32 to vector<8x128xf32>
    %588 = arith.mulf %587, %583 : vector<8x128xf32>
    %589 = arith.addf %579, %588 : vector<8x128xf32>
    %590 = vector.broadcast %532 : f32 to vector<8x128xf32>
    %591 = arith.mulf %590, %583 : vector<8x128xf32>
    %592 = arith.addf %582, %591 : vector<8x128xf32>
    %593 = vector.extract_strided_slice %572 {offsets = [2, 0], sizes = [8, 128], strides = [1, 1]} : vector<16x128xf32> to vector<8x128xf32>
    %594 = vector.broadcast %517 : f32 to vector<8x128xf32>
    %595 = arith.mulf %594, %593 : vector<8x128xf32>
    %596 = arith.addf %586, %595 : vector<8x128xf32>
    %597 = vector.broadcast %526 : f32 to vector<8x128xf32>
    %598 = arith.mulf %597, %593 : vector<8x128xf32>
    %599 = arith.addf %589, %598 : vector<8x128xf32>
    %600 = vector.broadcast %535 : f32 to vector<8x128xf32>
    %601 = arith.mulf %600, %593 : vector<8x128xf32>
    %602 = arith.addf %592, %601 : vector<8x128xf32>
    %c126_i32_100 = arith.constant 126 : i32
    %603 = tpu.dynamic_rotate %541 by %c126_i32_100 dim 1 : vector<16x128xf32>, i32 -> vector<16x128xf32>
    %604 = vector.extract_strided_slice %603 {offsets = [0, 0], sizes = [8, 128], strides = [1, 1]} : vector<16x128xf32> to vector<8x128xf32>
    %605 = vector.broadcast %512 : f32 to vector<8x128xf32>
    %606 = arith.mulf %605, %604 : vector<8x128xf32>
    %607 = arith.addf %596, %606 : vector<8x128xf32>
    %608 = vector.broadcast %521 : f32 to vector<8x128xf32>
    %609 = arith.mulf %608, %604 : vector<8x128xf32>
    %610 = arith.addf %599, %609 : vector<8x128xf32>
    %611 = vector.broadcast %530 : f32 to vector<8x128xf32>
    %612 = arith.mulf %611, %604 : vector<8x128xf32>
    %613 = arith.addf %602, %612 : vector<8x128xf32>
    %614 = vector.extract_strided_slice %603 {offsets = [1, 0], sizes = [8, 128], strides = [1, 1]} : vector<16x128xf32> to vector<8x128xf32>
    %615 = vector.broadcast %515 : f32 to vector<8x128xf32>
    %616 = arith.mulf %615, %614 : vector<8x128xf32>
    %617 = arith.addf %607, %616 : vector<8x128xf32>
    %618 = vector.broadcast %524 : f32 to vector<8x128xf32>
    %619 = arith.mulf %618, %614 : vector<8x128xf32>
    %620 = arith.addf %610, %619 : vector<8x128xf32>
    %621 = vector.broadcast %533 : f32 to vector<8x128xf32>
    %622 = arith.mulf %621, %614 : vector<8x128xf32>
    %623 = arith.addf %613, %622 : vector<8x128xf32>
    %624 = vector.extract_strided_slice %603 {offsets = [2, 0], sizes = [8, 128], strides = [1, 1]} : vector<16x128xf32> to vector<8x128xf32>
    %625 = vector.broadcast %518 : f32 to vector<8x128xf32>
    %626 = arith.mulf %625, %624 : vector<8x128xf32>
    %627 = arith.addf %617, %626 : vector<8x128xf32>
    %628 = vector.broadcast %527 : f32 to vector<8x128xf32>
    %629 = arith.mulf %628, %624 : vector<8x128xf32>
    %630 = arith.addf %620, %629 : vector<8x128xf32>
    %631 = vector.broadcast %536 : f32 to vector<8x128xf32>
    %632 = arith.mulf %631, %624 : vector<8x128xf32>
    %633 = arith.addf %623, %632 : vector<8x128xf32>
    %c18_101 = arith.constant 18 : index
    %634 = memref.load %arg2[%c18_101] : memref<81xf32, #tpu.memory_space<smem>>
    %c19_102 = arith.constant 19 : index
    %635 = memref.load %arg2[%c19_102] : memref<81xf32, #tpu.memory_space<smem>>
    %c20_103 = arith.constant 20 : index
    %636 = memref.load %arg2[%c20_103] : memref<81xf32, #tpu.memory_space<smem>>
    %c21_104 = arith.constant 21 : index
    %637 = memref.load %arg2[%c21_104] : memref<81xf32, #tpu.memory_space<smem>>
    %c22_105 = arith.constant 22 : index
    %638 = memref.load %arg2[%c22_105] : memref<81xf32, #tpu.memory_space<smem>>
    %c23_106 = arith.constant 23 : index
    %639 = memref.load %arg2[%c23_106] : memref<81xf32, #tpu.memory_space<smem>>
    %c24_107 = arith.constant 24 : index
    %640 = memref.load %arg2[%c24_107] : memref<81xf32, #tpu.memory_space<smem>>
    %c25_108 = arith.constant 25 : index
    %641 = memref.load %arg2[%c25_108] : memref<81xf32, #tpu.memory_space<smem>>
    %c26_109 = arith.constant 26 : index
    %642 = memref.load %arg2[%c26_109] : memref<81xf32, #tpu.memory_space<smem>>
    %c45_110 = arith.constant 45 : index
    %643 = memref.load %arg2[%c45_110] : memref<81xf32, #tpu.memory_space<smem>>
    %c46_111 = arith.constant 46 : index
    %644 = memref.load %arg2[%c46_111] : memref<81xf32, #tpu.memory_space<smem>>
    %c47_112 = arith.constant 47 : index
    %645 = memref.load %arg2[%c47_112] : memref<81xf32, #tpu.memory_space<smem>>
    %c48_113 = arith.constant 48 : index
    %646 = memref.load %arg2[%c48_113] : memref<81xf32, #tpu.memory_space<smem>>
    %c49_114 = arith.constant 49 : index
    %647 = memref.load %arg2[%c49_114] : memref<81xf32, #tpu.memory_space<smem>>
    %c50_115 = arith.constant 50 : index
    %648 = memref.load %arg2[%c50_115] : memref<81xf32, #tpu.memory_space<smem>>
    %c51_116 = arith.constant 51 : index
    %649 = memref.load %arg2[%c51_116] : memref<81xf32, #tpu.memory_space<smem>>
    %c52_117 = arith.constant 52 : index
    %650 = memref.load %arg2[%c52_117] : memref<81xf32, #tpu.memory_space<smem>>
    %c53_118 = arith.constant 53 : index
    %651 = memref.load %arg2[%c53_118] : memref<81xf32, #tpu.memory_space<smem>>
    %c72_119 = arith.constant 72 : index
    %652 = memref.load %arg2[%c72_119] : memref<81xf32, #tpu.memory_space<smem>>
    %c73_120 = arith.constant 73 : index
    %653 = memref.load %arg2[%c73_120] : memref<81xf32, #tpu.memory_space<smem>>
    %c74_121 = arith.constant 74 : index
    %654 = memref.load %arg2[%c74_121] : memref<81xf32, #tpu.memory_space<smem>>
    %c75_122 = arith.constant 75 : index
    %655 = memref.load %arg2[%c75_122] : memref<81xf32, #tpu.memory_space<smem>>
    %c76_123 = arith.constant 76 : index
    %656 = memref.load %arg2[%c76_123] : memref<81xf32, #tpu.memory_space<smem>>
    %c77_124 = arith.constant 77 : index
    %657 = memref.load %arg2[%c77_124] : memref<81xf32, #tpu.memory_space<smem>>
    %c78_125 = arith.constant 78 : index
    %658 = memref.load %arg2[%c78_125] : memref<81xf32, #tpu.memory_space<smem>>
    %c79_126 = arith.constant 79 : index
    %659 = memref.load %arg2[%c79_126] : memref<81xf32, #tpu.memory_space<smem>>
    %c80_127 = arith.constant 80 : index
    %660 = memref.load %arg2[%c80_127] : memref<81xf32, #tpu.memory_space<smem>>
    %c0_128 = arith.constant 0 : index
    %c2_129 = arith.constant 2 : index
    %c8_130 = arith.constant 8 : index
    %c0_131 = arith.constant 0 : index
    %661 = vector.load %arg3[%c0_128, %c2_129, %c8_130, %c0_131] : memref<1x3x16x128xf32, #tpu.memory_space<vmem>>, vector<1x1x8x128xf32>
    %662 = vector.shape_cast %661 : vector<1x1x8x128xf32> to vector<8x128xf32>
    %c0_132 = arith.constant 0 : index
    %c2_133 = arith.constant 2 : index
    %c0_134 = arith.constant 0 : index
    %c0_135 = arith.constant 0 : index
    %663 = vector.load %arg4[%c0_132, %c2_133, %c0_134, %c0_135] : memref<1x3x8x128xf32, #tpu.memory_space<vmem>>, vector<1x1x8x128xf32>
    %664 = vector.shape_cast %663 : vector<1x1x8x128xf32> to vector<8x128xf32>
    %665 = tpu.concatenate %662, %664 in 0 : vector<8x128xf32>, vector<8x128xf32> -> vector<16x128xf32>
    %666 = vector.extract_strided_slice %665 {offsets = [0, 0], sizes = [8, 128], strides = [1, 1]} : vector<16x128xf32> to vector<8x128xf32>
    %667 = vector.broadcast %634 : f32 to vector<8x128xf32>
    %668 = arith.mulf %667, %666 : vector<8x128xf32>
    %669 = arith.addf %627, %668 : vector<8x128xf32>
    %670 = vector.broadcast %643 : f32 to vector<8x128xf32>
    %671 = arith.mulf %670, %666 : vector<8x128xf32>
    %672 = arith.addf %630, %671 : vector<8x128xf32>
    %673 = vector.broadcast %652 : f32 to vector<8x128xf32>
    %674 = arith.mulf %673, %666 : vector<8x128xf32>
    %675 = arith.addf %633, %674 : vector<8x128xf32>
    %676 = vector.extract_strided_slice %665 {offsets = [1, 0], sizes = [8, 128], strides = [1, 1]} : vector<16x128xf32> to vector<8x128xf32>
    %677 = vector.broadcast %637 : f32 to vector<8x128xf32>
    %678 = arith.mulf %677, %676 : vector<8x128xf32>
    %679 = arith.addf %669, %678 : vector<8x128xf32>
    %680 = vector.broadcast %646 : f32 to vector<8x128xf32>
    %681 = arith.mulf %680, %676 : vector<8x128xf32>
    %682 = arith.addf %672, %681 : vector<8x128xf32>
    %683 = vector.broadcast %655 : f32 to vector<8x128xf32>
    %684 = arith.mulf %683, %676 : vector<8x128xf32>
    %685 = arith.addf %675, %684 : vector<8x128xf32>
    %686 = vector.extract_strided_slice %665 {offsets = [2, 0], sizes = [8, 128], strides = [1, 1]} : vector<16x128xf32> to vector<8x128xf32>
    %687 = vector.broadcast %640 : f32 to vector<8x128xf32>
    %688 = arith.mulf %687, %686 : vector<8x128xf32>
    %689 = arith.addf %679, %688 : vector<8x128xf32>
    %690 = vector.broadcast %649 : f32 to vector<8x128xf32>
    %691 = arith.mulf %690, %686 : vector<8x128xf32>
    %692 = arith.addf %682, %691 : vector<8x128xf32>
    %693 = vector.broadcast %658 : f32 to vector<8x128xf32>
    %694 = arith.mulf %693, %686 : vector<8x128xf32>
    %695 = arith.addf %685, %694 : vector<8x128xf32>
    %c127_i32_136 = arith.constant 127 : i32
    %696 = tpu.dynamic_rotate %665 by %c127_i32_136 dim 1 : vector<16x128xf32>, i32 -> vector<16x128xf32>
    %697 = vector.extract_strided_slice %696 {offsets = [0, 0], sizes = [8, 128], strides = [1, 1]} : vector<16x128xf32> to vector<8x128xf32>
    %698 = vector.broadcast %635 : f32 to vector<8x128xf32>
    %699 = arith.mulf %698, %697 : vector<8x128xf32>
    %700 = arith.addf %689, %699 : vector<8x128xf32>
    %701 = vector.broadcast %644 : f32 to vector<8x128xf32>
    %702 = arith.mulf %701, %697 : vector<8x128xf32>
    %703 = arith.addf %692, %702 : vector<8x128xf32>
    %704 = vector.broadcast %653 : f32 to vector<8x128xf32>
    %705 = arith.mulf %704, %697 : vector<8x128xf32>
    %706 = arith.addf %695, %705 : vector<8x128xf32>
    %707 = vector.extract_strided_slice %696 {offsets = [1, 0], sizes = [8, 128], strides = [1, 1]} : vector<16x128xf32> to vector<8x128xf32>
    %708 = vector.broadcast %638 : f32 to vector<8x128xf32>
    %709 = arith.mulf %708, %707 : vector<8x128xf32>
    %710 = arith.addf %700, %709 : vector<8x128xf32>
    %711 = vector.broadcast %647 : f32 to vector<8x128xf32>
    %712 = arith.mulf %711, %707 : vector<8x128xf32>
    %713 = arith.addf %703, %712 : vector<8x128xf32>
    %714 = vector.broadcast %656 : f32 to vector<8x128xf32>
    %715 = arith.mulf %714, %707 : vector<8x128xf32>
    %716 = arith.addf %706, %715 : vector<8x128xf32>
    %717 = vector.extract_strided_slice %696 {offsets = [2, 0], sizes = [8, 128], strides = [1, 1]} : vector<16x128xf32> to vector<8x128xf32>
    %718 = vector.broadcast %641 : f32 to vector<8x128xf32>
    %719 = arith.mulf %718, %717 : vector<8x128xf32>
    %720 = arith.addf %710, %719 : vector<8x128xf32>
    %721 = vector.broadcast %650 : f32 to vector<8x128xf32>
    %722 = arith.mulf %721, %717 : vector<8x128xf32>
    %723 = arith.addf %713, %722 : vector<8x128xf32>
    %724 = vector.broadcast %659 : f32 to vector<8x128xf32>
    %725 = arith.mulf %724, %717 : vector<8x128xf32>
    %726 = arith.addf %716, %725 : vector<8x128xf32>
    %c126_i32_137 = arith.constant 126 : i32
    %727 = tpu.dynamic_rotate %665 by %c126_i32_137 dim 1 : vector<16x128xf32>, i32 -> vector<16x128xf32>
    %728 = vector.extract_strided_slice %727 {offsets = [0, 0], sizes = [8, 128], strides = [1, 1]} : vector<16x128xf32> to vector<8x128xf32>
    %729 = vector.broadcast %636 : f32 to vector<8x128xf32>
    %730 = arith.mulf %729, %728 : vector<8x128xf32>
    %731 = arith.addf %720, %730 : vector<8x128xf32>
    %732 = vector.broadcast %645 : f32 to vector<8x128xf32>
    %733 = arith.mulf %732, %728 : vector<8x128xf32>
    %734 = arith.addf %723, %733 : vector<8x128xf32>
    %735 = vector.broadcast %654 : f32 to vector<8x128xf32>
    %736 = arith.mulf %735, %728 : vector<8x128xf32>
    %737 = arith.addf %726, %736 : vector<8x128xf32>
    %738 = vector.extract_strided_slice %727 {offsets = [1, 0], sizes = [8, 128], strides = [1, 1]} : vector<16x128xf32> to vector<8x128xf32>
    %739 = vector.broadcast %639 : f32 to vector<8x128xf32>
    %740 = arith.mulf %739, %738 : vector<8x128xf32>
    %741 = arith.addf %731, %740 : vector<8x128xf32>
    %742 = vector.broadcast %648 : f32 to vector<8x128xf32>
    %743 = arith.mulf %742, %738 : vector<8x128xf32>
    %744 = arith.addf %734, %743 : vector<8x128xf32>
    %745 = vector.broadcast %657 : f32 to vector<8x128xf32>
    %746 = arith.mulf %745, %738 : vector<8x128xf32>
    %747 = arith.addf %737, %746 : vector<8x128xf32>
    %748 = vector.extract_strided_slice %727 {offsets = [2, 0], sizes = [8, 128], strides = [1, 1]} : vector<16x128xf32> to vector<8x128xf32>
    %749 = vector.broadcast %642 : f32 to vector<8x128xf32>
    %750 = arith.mulf %749, %748 : vector<8x128xf32>
    %751 = arith.addf %741, %750 : vector<8x128xf32>
    %752 = vector.broadcast %651 : f32 to vector<8x128xf32>
    %753 = arith.mulf %752, %748 : vector<8x128xf32>
    %754 = arith.addf %744, %753 : vector<8x128xf32>
    %755 = vector.broadcast %660 : f32 to vector<8x128xf32>
    %756 = arith.mulf %755, %748 : vector<8x128xf32>
    %757 = arith.addf %747, %756 : vector<8x128xf32>
    %c0_138 = arith.constant 0 : index
    %c0_139 = arith.constant 0 : index
    %c8_140 = arith.constant 8 : index
    %c0_141 = arith.constant 0 : index
    %758 = vector.load %arg5[%c0_138, %c0_139, %c8_140, %c0_141] : memref<1x3x16x128xf32, #tpu.memory_space<vmem>>, vector<1x1x8x128xf32>
    %759 = vector.shape_cast %758 : vector<1x1x8x128xf32> to vector<8x128xf32>
    %760 = vector.shape_cast %751 : vector<8x128xf32> to vector<1x1x8x128xf32>
    tpu.vector_store %arg5[%c0_138, %c0_139, %c8_140, %c0_141], %760 {strides = array<i32>} : memref<1x3x16x128xf32, #tpu.memory_space<vmem>>, vector<1x1x8x128xf32>,
    %c0_142 = arith.constant 0 : index
    %c1_143 = arith.constant 1 : index
    %c8_144 = arith.constant 8 : index
    %c0_145 = arith.constant 0 : index
    %761 = vector.load %arg5[%c0_142, %c1_143, %c8_144, %c0_145] : memref<1x3x16x128xf32, #tpu.memory_space<vmem>>, vector<1x1x8x128xf32>
    %762 = vector.shape_cast %761 : vector<1x1x8x128xf32> to vector<8x128xf32>
    %763 = vector.shape_cast %754 : vector<8x128xf32> to vector<1x1x8x128xf32>
    tpu.vector_store %arg5[%c0_142, %c1_143, %c8_144, %c0_145], %763 {strides = array<i32>} : memref<1x3x16x128xf32, #tpu.memory_space<vmem>>, vector<1x1x8x128xf32>,
    %c0_146 = arith.constant 0 : index
    %c2_147 = arith.constant 2 : index
    %c8_148 = arith.constant 8 : index
    %c0_149 = arith.constant 0 : index
    %764 = vector.load %arg5[%c0_146, %c2_147, %c8_148, %c0_149] : memref<1x3x16x128xf32, #tpu.memory_space<vmem>>, vector<1x1x8x128xf32>
    %765 = vector.shape_cast %764 : vector<1x1x8x128xf32> to vector<8x128xf32>
    %766 = vector.shape_cast %757 : vector<8x128xf32> to vector<1x1x8x128xf32>
    tpu.vector_store %arg5[%c0_146, %c2_147, %c8_148, %c0_149], %766 {strides = array<i32>} : memref<1x3x16x128xf32, #tpu.memory_space<vmem>>, vector<1x1x8x128xf32>,
    return
  }
  func.func @transform_0(%arg0: i32, %arg1: i32) -> i32 {
    %c0_i32 = arith.constant 0 : i32
    %c0_i32_0 = arith.constant 0 : i32
    return %c0_i32 : i32
  }
  func.func @transform_1(%arg0: i32, %arg1: i32) -> (i32, i32, i32, i32) {
    %c0_i32 = arith.constant 0 : i32
    %c0_i32_0 = arith.constant 0 : i32
    %c0_i32_1 = arith.constant 0 : i32
    return %arg0, %c0_i32, %arg1, %c0_i32_0 : i32, i32, i32, i32
  }
  func.func @transform_2(%arg0: i32, %arg1: i32) -> (i32, i32, i32, i32) {
    %c1_i32 = arith.constant 1 : i32
    %0 = arith.addi %arg1, %c1_i32 : i32
    %c2_i32 = arith.constant 2 : i32
    %1 = arith.muli %0, %c2_i32 : i32
    %c0_i32 = arith.constant 0 : i32
    %c0_i32_0 = arith.constant 0 : i32
    %c0_i32_1 = arith.constant 0 : i32
    return %arg0, %c0_i32, %1, %c0_i32_0 : i32, i32, i32, i32
  }
  func.func @transform_3(%arg0: i32, %arg1: i32) -> (i32, i32, i32, i32) {
    %c0_i32 = arith.constant 0 : i32
    %c0_i32_0 = arith.constant 0 : i32
    %c0_i32_1 = arith.constant 0 : i32
    return %arg0, %c0_i32, %arg1, %c0_i32_0 : i32, i32, i32, i32
  }
}

</mosaic_0001>

<bundles_post_ra>
// kernel: tpu_custom_call.1
= control target key start
LH: loop header
LB: loop body
LE: loop exit
PB: predicated region body
PF: predicated region fallthrough
CT: control target
= control target key end

     0   :  { %s3861_s0 = inlined_call_operand.hbm [shape: f32[81], index: 0, kind: input, shape index: {}]   ;;  %s3862_s1 = inlined_call_operand.hbm [shape: f32[2,3,24,128], index: 1, kind: input, shape index: {}]   ;;  %s3863_s2 = inlined_call_operand.hbm [shape: f32[2,3,24,128], index: 2, kind: input, shape index: {}]   ;;  %s3864_s3 = inlined_call_operand.hbm [shape: f32[2,3,16,128], index: 3, kind: output, shape index: {}]  }
   0x1   :  { %3912 = sst [smem:[#allocation95_spill]] %s3861_s0 }
   0x2   :  { %3913 = sst [smem:[#allocation96_spill]] %s3862_s1 }
   0x3   :  { %3914 = sst [smem:[#allocation97_spill]] %s3863_s2 }
   0x4   :  { %3915 = sst [smem:[#allocation98_spill]] %s3864_s3 }
   0x5   :  { %8 = vsyncpa [#allocation5], 0 }
   0x6   :  { %9 = vsyncpa [#allocation3], 0 }
   0x7   :  { %11 = vsyncpa [#allocation3 + $0x1], 0 }
   0x8   :  { %12 = vsyncpa [#allocation8], 0 }
   0x9   :  { %14 = vsyncpa [#allocation8 + $0x1], 0 }
   0xa   :  { %15 = vsyncpa [#allocation4], 0 }
   0xb   :  { %17 = vsyncpa [#allocation4 + $0x1], 0  ;;  %s2384_s12 = smov 0   ;;  %s2386_s13 = smov 0  }
   0xc   :  { %s2388_s14 = smov 0   ;;  %s2390_s15 = smov 0  }
   0xd   :  { %s2392_s16 = smov 0   ;;  %s2394_s17 = smov 0  }
   0xe LB: > { %3916 = sst [smem:[#allocation17_spill]] %s2326_s12  ;;  %s1938_s18 = sadd.s32 4294967295, %s2346_s17   ;;  %s2346_s17 = sphi %s2394_s17, %s23_s17   ;;  %s2342_s16 = sphi %s2392_s16, %s4122_s16   ;;  %s2338_s15 = sphi %s2390_s15, %s4121_s15   ;;  %s2334_s14 = sphi %s2388_s14, %s4120_s14   ;;  %s2330_s13 = sphi %s2386_s13, %s4119_s13   ;;  %s2326_s12 = sphi %s2384_s12, %s4118_s12  }
   0xf   : > { %3917 = sst [smem:[#allocation18_spill]] %s2330_s13  ;;  %s1939_s19 = sadd.s32 4294967294, %s2346_s17  }
  0x10   : > { %3918 = sst [smem:[#allocation19_spill]] %s2334_s14  ;;  %s35_s20 = sadd.s32 1, %s2342_s16 }
  0x11   : > { %3919 = sst [smem:[#allocation20_spill]] %s2338_s15  ;;  %s65_s21 = sadd.s32 1, %s2334_s14 }
  0x12   : > { %3920 = sst [smem:[#allocation21_spill]] %s2342_s16  ;;  %p37_p0 = scmp.ge.s32.totalorder %s35_s20, 2 }
  0x13   : > { %3921 = sst [smem:[#allocation22_spill]] %s2346_s17  ;;  %p72_p1 = scmp.ne.s32.totalorder %s2334_s14, %s2330_s13 }
  0x14   : > { %p73_p2 = scmp.eq.s32.totalorder %s2346_s17, 0  ;;  %p78_p3 = scmp.ne.s32.totalorder %s2330_s13, %s2326_s12 }
  0x15   : > { %s4124_s20 = smov (%p37_p0, %s35_s20), 0  ;;  %p2429_p5 = scmp.eq.s32.totalorder %s1938_s18, 0 }
  0x16   : > { %3922 = sst [smem:[#allocation23_spill]] %s4124_s20  ;;  %p2425_p4 = por %p73_p2, %p72_p1 }
  0x17   : > { %s60_s24 = ssub.s32 %s2342_s16, %s4124_s20  ;;  %p136_p6 = scmp.eq.s32.totalorder %s1938_s18, 1 }
  0x18   : > { %p63_p7 = scmp.eq.s32.totalorder %s60_s24, 0  ;;  %p2437_p8 = por %p2429_p5, %p78_p3 }
  0x19   : > { %p2441_p9 = por %p136_p6, %p72_p1  ;;  %p142_p10 = scmp.eq.s32.totalorder %s1939_s19, 1 }
  0x1a   : > { %s2446_s27 = scalar_select %p63_p7, %s2334_s14, %s65_s21  }
  0x1b   : > { %s3926_s26 = scalar_select %p2441_p9, 1, 0 }
  0x1c   : > { %3928 = sst [smem:[#allocation25_spill]] %s2446_s27  ;;  %p2448_p11 = por %p142_p10, %p78_p3 }
  0x1d   : > { %3927 = sst [smem:[#allocation24_spill]] %s3926_s26  ;;  %p1940_p12 = scmp.ge.s32.totalorder %s2346_s17, 1 }
  0x1e   : > { %s3929_s28 = scalar_select %p2448_p11, 1, 0 }
  0x1f   : > { %p149_p13 = scmp.lt.s32.totalorder %s2346_s17, 3  ;;  %s2348_s30 = smov [#allocation2]  }
  0x20   : > { %3930 = sst [smem:[#allocation26_spill]] %s3929_s28  ;;  %p1942_p3 = scmp.ge.s32.totalorder %s2346_s17, 2 }
  0x21   : > { %p2454_p0 = pnand %p1940_p12, %p149_p13  ;;  %s3932_s0 = sld [smem:[#allocation95_spill]] }
  0x23   : > { %p2147_p2 = pneg %p2454_p0  ;;  %167 = sbr.rel (%p1942_p3) target bundleno = 70 (0x46), region = 20 }
  0x25   : > { %p2148_p1 = pnand %p2147_p2, %p2429_p5 }
  0x27   : > { %2150 = dma.hbm_to_smem (!%p2148_p1), %s3932_s0, 16, %s2348_s30, [#allocation5]  }
  0x28   : > { %s2469_s6 = sand.u32 1, %s2334_s14   ;;  %s2125_s7 = smul.u32 1152, %s2342_s16 }
  0x29   : > { %s2124_s8 = smul.u32 48, %s2469_s6  ;;  %s2349_s9 = smov 384  }
  0x2a   : > { %2133 = sst [smem:[#allocation11]] (%p2425_p4), %s2349_s9  ;;  %s2350_s4 = smov 256  }
  0x2b   : > { %s2132_s10 = scalar_select %p2425_p4, [#allocation0], [#allocation12] }
  0x2c   : > { %s3933_s1 = sld [smem:[#allocation96_spill]]  ;;  %s175_s24 = scalar_lea.vmem [#allocation6], %s2124_s8 }
  0x2d   : > { %s195_s21 = sld [smem:[%s2132_s10]]   ;;  %s203_s30 = sshll.u32 %s175_s24, 4  ;;  %s204_s30 = int_to_ptr.vmem [resolvable:$true] %s203_s30 }
  0x2e   : > { %2134 = sst [smem:[#allocation11 + $0x1]] (%p2425_p4), %s2350_s4  ;;  %s2351_s5 = smov 2  }
  0x2f   : > { %2135 = sst [smem:[#allocation11 + $0x2]] (%p2425_p4), %s2351_s5  ;;  %s2352_s0 = smov 128  }
  0x30   : > { %2136 = sst [smem:[#allocation11 + $0x3]] (%p2425_p4), %s2352_s0  ;;  %s2353_s9 = smov 8  }
  0x31   : > { %2137 = sst [smem:[#allocation11 + $0x4]] (%p2425_p4), %s2352_s0  ;;  %s172_s8 = scalar_lea.sflag [#allocation3], %s2469_s6 }
  0x32   : > { %s188_s19 = scalar_lea.hbm %s3933_s1, %s2125_s7  ;;  %2138 = sst [smem:[#allocation11 + $0x5]] (%p2425_p4), %s2353_s9 }
  0x33   : > { %s1944_s11 = sshll.u32 %s195_s21, 26  ;;  %s2354_s18 = smov 131072  }
  0x34   : > { %s1945_s10 = sadd.s32 134217728, %s1944_s11  ;;  %s2126_s24 = smul.u32 24, %s2469_s6 }
  0x35   : > { %2139 = dma.general (%p2425_p4), %s188_s19, 768, %s204_s30, %s172_s8, %s2354_s18, [#allocation11], %s1945_s10, 0  }
  0x36   : > { %s3934_s2 = sld [smem:[#allocation97_spill]]  ;;  %s230_s16 = scalar_lea.vmem [#allocation7], %s2126_s24 }
  0x37   : > { %s240_s0 = sshll.u32 %s230_s16, 4  ;;  %s227_s27 = scalar_lea.sflag [#allocation8], %s2469_s6  ;;  %s241_s0 = int_to_ptr.vmem [resolvable:$true] %s240_s0 }
  0x38   : > { %s2243_s9 = scalar_lea.vmem %s241_s0, 384  ;;  %s2355_s21 = smov [#allocation7]  }
  0x39   : > { %p2244_p6 = scmp.ne.s32.totalorder %s241_s0, %s2243_s9  ;;  %s2247_s19 = sshll.u32 %s2355_s21, 4  ;;  %s2248_s19 = int_to_ptr.vmem [resolvable:$false] %s2247_s19 }
  0x3a   : > { %s2249_s30 = scalar_lea.vmem %s2248_s19, 768  ;;  %p2250_p12 = scmp.lt.s32.totalorder %s241_s0, %s2248_s19 }
  0x3b   : > { %p2245_p7 = pnand %p2244_p6, %p2425_p4  ;;  %p2251_p13 = scmp.lt.s32.totalorder %s2249_s30, %s2243_s9 }
  0x3c   : > { %s1856_s1 = scalar_lea.hbm %s3934_s2, %s2125_s7 }
  0x3d   : > { %s1857_s20 = scalar_lea.hbm %s1856_s1, 256  ;;  %p2246_p10 = pneg %p2245_p7 }
  0x3e   : > { %p2252_p2 = por %p2251_p13, %p2250_p12 }
  0x40   : > { %p2253_p1 = pnand %p2252_p2, %p2246_p10 }
  0x42   : > { %2256 = shalt.err (!%p2253_p1)
}
  0x43   : > { %s2356_s7 = smov 384   ;;  %s2357_s1 = smov 128  }
  0x44   : > { %s2358_s16 = smov 8  }
  0x45   : > { %2140 = dma.hbm_to_vmem [thread:$0]  (%p2425_p4), %s1857_s20, 384, %s241_s0, %s227_s27, %s2356_s7, %s2357_s1, %s2358_s16  }
  0x46 PF: > { %252 = sbr.rel (%p2454_p0) target bundleno = 372 (0x174), region = 32 }
  0x4b   : > { %2309 = dma.done.wait (%p2429_p5), [#allocation5], 16  }
  0x4c   : > { %2311 = vsyncadd (%p2429_p5), [#allocation5], 4294967280  ;;  %s2509_s6 = sand.u32 1, %s2330_s13  }
  0x4d   : > { %3935 = sst [smem:[#allocation27_spill]] %s2509_s6  ;;  %s3867_s11 = smul.u32 48, %s2509_s6 }
  0x4e   : > { %s259_s22 = scalar_lea.sflag [#allocation3], %s2509_s6 }
  0x4f   : > { %s2515_s20 = scalar_lea.vmem [#allocation6], %s3867_s11 }
  0x50   : > { %2313 = dma.done.wait (%p2437_p8), %s259_s22, 768  }
  0x51   : > { %2315 = vsyncadd (%p2437_p8), %s259_s22, 4294966528  ;;  %s2128_s23 = smul.u32 24, %s2509_s6  ;;  %s268_s27 = scalar_lea.sflag [#allocation8], %s2509_s6 }
  0x53   : > { %s2523_s29 = scalar_lea.vmem [#allocation7], %s2128_s23 }
  0x54   : > { %2317 = dma.done.wait (%p2437_p8), %s268_s27, 384  }
  0x55   : > { %2319 = vsyncadd (%p2437_p8), %s268_s27, 4294966912 }
  0x56   : > { %276 = sfence }
  0x57   : > { %v2530_v0 = vld [vmem:[%s2515_s20 + $0x8] sm:$0xff]  ;;  %v2533_v1 = vld [vmem:[%s2515_s20] sm:$0xff]  ;;  %s2359_s10 = smov 127   ;;  %s2360_s25 = smov 126   ;;  %v2558_v4 = vld [vmem:[%s2515_s20 + $0x10] sm:$0xff]  ;;  %vm351_vm0 = vcmask 1046528  }
  0x58   : > { %1149 = vrot.lane.b32.xlu1 %v2530_v0, %s2359_s10  ;;  %408 = vrot.lane.b32.xlu0 %v2533_v1, %s2359_s10  ;;  %v2540_v2 = vld [vmem:[%s2523_s29] sm:$0xff]  ;;  %s1978_s8 = sld [smem:[#allocation2 + $0xc]]  ;;  %v2561_v5 = vld [vmem:[%s2515_s20 + $0x18] sm:$0x3]  ;;  %vm382_vm1 = vcmask 1045504  }
  0x59   : > { %v2543_v3 = vld [vmem:[%s2515_s20 + $0x8] sm:$0x3]  ;;  %s1981_s18 = sld [smem:[#allocation2 + $0xf]]  ;;  %v2572_v7 = vld [vmem:[%s2515_s20 + $0x18] sm:$0xff]  ;;  %v2674_v37 = vld [vmem:[%s2515_s20 + $0x20] sm:$0xff] }
  0x5a   : > { %s1987_s24 = sld [smem:[#allocation2 + $0x27]]  ;;  %v2575_v8 = vld [vmem:[%s2523_s29 + $0x8] sm:$0xff]  ;;  %v2702_v52 = vld [vmem:[%s2523_s29 + $0x10] sm:$0xff] }
  0x5b   : > { %s2563_s4 = sld [smem:[#allocation2 + $0x2a]]  ;;  %v2671_v36 = vld [vmem:[%s2515_s20 + $0x28] sm:$0x3] }
  0x5c   : > { %1151 = vrot.lane.b32.xlu1 %v2540_v2, %s2359_s10  ;;  %410 = vrot.lane.b32.xlu0 %v2543_v3, %s2359_s10  ;;  %s1996_s5 = sld [smem:[#allocation2 + $0x42]]  ;;  %v2705_v53 = vld [vmem:[%s2515_s20 + $0x28] sm:$0xff] }
  0x5d   : > { %s2569_s0 = sld [smem:[#allocation2]] }
  0x5e   : > { %v594_v6 = vstv %s1978_s8  ;;  %s2577_s9 = sld [smem:[#allocation2 + $0x3]] }
  0x5f   : > { %s2579_s21 = sld [smem:[#allocation2 + $0x6]]  ;;  %v2581_v9 = vstv %s1981_s18  ;;  %v2586_v10 = vmul.f32 %v2558_v4, %v594_v6  ;;  %v2595_v11 = vmul.f32 %v2561_v5, %v594_v6  ;;  %v2604_v14 = vmul.f32 %v2572_v7, %v594_v6 }
  0x60   : > { %483 = vrot.lane.b32.xlu1 %v2543_v3, %s2360_s25  ;;  %481 = vrot.lane.b32.xlu0 %v2533_v1, %s2360_s25  ;;  %s2583_s19 = sld [smem:[#allocation2 + $0x1b]]  ;;  %v2597_v12 = vstv %s1987_s24  ;;  %v2601_v13 = vmul.f32 %v2561_v5, %v2581_v9  ;;  %v2609_v16 = vmul.f32 %v2558_v4, %v2581_v9  ;;  %v2612_v17 = vmul.f32 %v2575_v8, %v594_v6 }
  0x61   : > { %s2046_s30 = sld [smem:[#allocation2 + $0x1e]]  ;;  %v599_v15 = vrot.slane %v2586_v10, 1  ;;  %v600_v18 = vrot.slane %v2595_v11, 1  ;;  %v2623_v19 = vmul.f32 %v2558_v4, %v2597_v12  ;;  %v2627_v20 = vmul.f32 %v2561_v5, %v2597_v12 }
  0x62   : > { %s2592_s7 = sld [smem:[#allocation2 + $0x45]]  ;;  %v2629_v21 = vstv %s1996_s5  ;;  %v630_v22 = vrot.slane %v2601_v13, 2  ;;  %v2633_v23 = vstv %s2563_s4 }
  0x63   : > { %s2049_s1 = sld [smem:[#allocation2 + $0x21]]  ;;  %v1080_v25 = vstv %s2569_s0  ;;  %v2664_v34 = vmul.f32 %v2558_v4, %v2629_v21  ;;  %v2668_v35 = vmul.f32 %v2561_v5, %v2629_v21 }
  0x64   : > { %1224 = vrot.lane.b32.xlu1 %v2540_v2, %s2360_s25  ;;  %1222 = vrot.lane.b32.xlu0 %v2530_v0, %s2360_s25  ;;  %s2618_s16 = sld [smem:[#allocation2 + $0x36]]  ;;  %v2641_v27 = vstv %s2577_s9  ;;  %v1081_v44 = vmul.f32 %v1080_v25, %v2530_v0 }
  0x65   : > { %s2636_s22 = sld [smem:[#allocation2 + $0x39]]  ;;  %v2646_v29 = vstv %s2579_s21  ;;  %v1090_v30 = vmul.f32 %v2641_v27, %v2530_v0  ;;  %v1091_v31 = vmul.f32 %v2641_v27, %v2540_v2 }
  0x66   : > { %v1083_v26 = vstv %s2583_s19  ;;  %s2652_s23 = sld [smem:[#allocation2 + $0x3c]]  ;;  %v1120_v39 = vmul.f32 %v2646_v29, %v2530_v0  ;;  %v1121_v42 = vmul.f32 %v2646_v29, %v2540_v2 }
  0x67   : > { %v2643_v28 = vstv %s2046_s30  ;;  %v1084_v45 = vmul.f32 %v1083_v26, %v2530_v0  ;;  %v1094_v46 = vrot.slane %v1090_v30, 1  ;;  %v1095_v47 = vrot.slane %v1091_v31, 1  ;;  %s2762_s20 = sld [smem:[#allocation2 + $0x15]] }
  0x68   : > { %656 = vrot.lane.b32.xlu1 %v2561_v5, %s2359_s10  ;;  %654 = vrot.lane.b32.xlu0 %v2558_v4, %s2359_s10  ;;  %v1100_v32 = vmul.f32 %v2643_v28, %v2530_v0  ;;  %v1101_v38 = vmul.f32 %v2643_v28, %v2540_v2  ;;  %v2681_v40 = vstv %s2592_s7  ;;  %v1124_v57 = vrot.slane %v1120_v39, 2  ;;  %s2770_s27 = sld [smem:[#allocation2 + $0x18]] }
  0x69   : > { %v2660_v33 = vstv %s2049_s1  ;;  %v1125_v58 = vrot.slane %v1121_v42, 2  ;;  %v609_v31 = vrot.slane %v2623_v19, 1  ;;  %v2734_v39 = vmul.f32 %v2561_v5, %v2681_v40  ;;  %s2776_s29 = sld [smem:[#allocation2 + $0x30]] }
  0x6a   : > { %v1086_v41 = vstv %s2618_s16  ;;  %v1130_v43 = vmul.f32 %v2660_v33, %v2530_v0  ;;  %v1104_v48 = vrot.slane %v1100_v32, 1  ;;  %v1105_v49 = vrot.slane %v1101_v38, 1  ;;  %s2787_s8 = sld [smem:[#allocation2 + $0x4b]] }
  0x6b   : > { %v1109_v50 = vstv %s2636_s22  ;;  %v1131_v51 = vmul.f32 %v2660_v33, %v2540_v2  ;;  %v1087_v54 = vmul.f32 %v1086_v41, %v2530_v0  ;;  %v2720_v32 = vmul.f32 %v2558_v4, %v2633_v23  ;;  %s2796_s18 = sld [smem:[#allocation2 + $0x1]] }
  0x6c   : > { %1397 = vrot.lane.b32.xlu1 %v2575_v8, %s2359_s10  ;;  %1395 = vrot.lane.b32.xlu0 %v2572_v7, %s2359_s10  ;;  %v1110_v55 = vmul.f32 %v1109_v50, %v2530_v0  ;;  %v1111_v56 = vmul.f32 %v1109_v50, %v2540_v2  ;;  %v1134_v59 = vrot.slane %v1130_v43, 2  ;;  %v2711_v61 = vstv %s2652_s23  ;;  %s2809_s24 = sld [smem:[#allocation2 + $0x4]] }
  0x6d   : > { %v1135_v60 = vrot.slane %v1131_v51, 2  ;;  %v1140_v6 = vmul.f32 %v2711_v61, %v2530_v0  ;;  %v1141_v30 = vmul.f32 %v2711_v61, %v2540_v2  ;;  %v1096_v38 = vsel %vm351_vm0, %v1094_v46, %v1095_v47  ;;  %s2813_s4 = sld [smem:[#allocation2 + $0x7]] }
  0x6e   : > { %v1114_v62 = vrot.slane %v1110_v55, 1  ;;  %v1115_v63 = vrot.slane %v1111_v56, 1  ;;  %v1106_v0 = vsel %vm351_vm0, %v1104_v48, %v1105_v49  ;;  %v2730_v2 = vmul.f32 %v2561_v5, %v2633_v23  ;;  %s2822_s5 = sld [smem:[#allocation2 + $0x1c]] }
  0x6f   : > { %v1144_v42 = vrot.slane %v1140_v6, 2  ;;  %v1145_v43 = vrot.slane %v1141_v30, 2  ;;  %v1098_v51 = vadd.f32 %v1096_v38, %v1081_v44  ;;  %v1108_v55 = vadd.f32 %v1106_v0, %v1084_v45  ;;  %s2830_s0 = sld [smem:[#allocation2 + $0x1f]] }
  0x70   : > { %729 = vrot.lane.b32.xlu1 %v2561_v5, %s2360_s25  ;;  %727 = vrot.lane.b32.xlu0 %v2558_v4, %s2360_s25  ;;  %v1116_v56 = vsel %vm351_vm0, %v1114_v62, %v1115_v63  ;;  %v1126_v24 = vsel %vm382_vm1, %v1124_v57, %v1125_v58  ;;  %v1136_v47 = vsel %vm382_vm1, %v1134_v59, %v1135_v60  ;;  %v610_v5 = vrot.slane %v2627_v20, 1  ;;  %s2837_s9 = sld [smem:[#allocation2 + $0x22]] }
  0x71   : > { %v1118_v46 = vadd.f32 %v1116_v56, %v1087_v54  ;;  %v1146_v48 = vsel %vm382_vm1, %v1144_v42, %v1145_v43  ;;  %v338_v49 = vmul.f32 %v1080_v25, %v2533_v1  ;;  %v2748_v44 = vadd.f32 %v1126_v24, %v1098_v51  ;;  %s2843_s21 = sld [smem:[#allocation2 + $0x37]] }
  0x72   : > { %v2750_v45 = vadd.f32 %v1136_v47, %v1108_v55  ;;  %v341_v54 = vmul.f32 %v1083_v26, %v2533_v1  ;;  %v344_v58 = vmul.f32 %v1086_v41, %v2533_v1  ;;  %v347_v25 = vmul.f32 %v2641_v27, %v2533_v1  ;;  %s2861_s19 = sld [smem:[#allocation2 + $0x3a]] }
  0x73   : > { %v2755_v57 = vadd.f32 %v1146_v48, %v1118_v46  ;;  %v348_v59 = vmul.f32 %v2641_v27, %v2543_v3  ;;  %v358_v24 = vmul.f32 %v2643_v28, %v2533_v1  ;;  %v359_v60 = vmul.f32 %v2643_v28, %v2543_v3  ;;  %s2868_s30 = sld [smem:[#allocation2 + $0x3d]] }
  0x74   : > { %1470 = vrot.lane.b32.xlu1 %v2575_v8, %s2360_s25  ;;  %1468 = vrot.lane.b32.xlu0 %v2572_v7, %s2360_s25  ;;  %v368_v26 = vmul.f32 %v1109_v50, %v2533_v1  ;;  %v369_v62 = vmul.f32 %v1109_v50, %v2543_v3  ;;  %v352_v41 = vrot.slane %v347_v25, 1  ;;  %v378_v6 = vmul.f32 %v2646_v29, %v2533_v1  ;;  %s2872_s7 = sld [smem:[#allocation2 + $0x5]] }
  0x75   : > { %v353_v63 = vrot.slane %v348_v59, 1  ;;  %v379_v27 = vmul.f32 %v2646_v29, %v2543_v3  ;;  %v362_v28 = vrot.slane %v358_v24, 1  ;;  %v363_v50 = vrot.slane %v359_v60, 1  ;;  %s2874_s1 = sld [smem:[#allocation2 + $0x8]] }
  0x76   : > { %v372_v30 = vrot.slane %v368_v26, 1  ;;  %v373_v38 = vrot.slane %v369_v62, 1  ;;  %v383_v42 = vrot.slane %v378_v6, 2  ;;  %v389_v29 = vmul.f32 %v2660_v33, %v2533_v1  ;;  %s2887_s16 = sld [smem:[#allocation2 + $0x20]] }
  0x77   : > { %v354_v0 = vsel %vm351_vm0, %v352_v41, %v353_v63  ;;  %v384_v43 = vrot.slane %v379_v27, 2  ;;  %v364_v55 = vsel %vm351_vm0, %v362_v28, %v363_v50  ;;  %v390_v46 = vmul.f32 %v2660_v33, %v2543_v3  ;;  %3936 = sst [smem:[#allocation28_spill]] %s2843_s21 }
  0x78   : > { %902 = vrot.lane.b32.xlu1 %v2671_v36, %s2359_s10  ;;  %900 = vrot.lane.b32.xlu0 %v2674_v37, %s2359_s10  ;;  %v356_v51 = vadd.f32 %v354_v0, %v338_v49  ;;  %v374_v56 = vsel %vm351_vm0, %v372_v30, %v373_v38  ;;  %v366_v47 = vadd.f32 %v364_v55, %v341_v54  ;;  %v393_v59 = vrot.slane %v389_v29, 2  ;;  %s2900_s22 = sld [smem:[#allocation2 + $0x23]] }
  0x79   : > { %v376_v48 = vadd.f32 %v374_v56, %v344_v58  ;;  %v385_v25 = vsel %vm382_vm1, %v383_v42, %v384_v43  ;;  %v394_v60 = vrot.slane %v390_v46, 2  ;;  %v399_v49 = vmul.f32 %v2711_v61, %v2533_v1  ;;  %s2902_s23 = sld [smem:[#allocation2 + $0x3b]] }
  0x7a   : > { %v2798_v24 = vadd.f32 %v385_v25, %v356_v51  ;;  %v400_v26 = vmul.f32 %v2711_v61, %v2543_v3  ;;  %v619_v33 = vrot.slane %v2664_v34, 1  ;;  %v620_v62 = vrot.slane %v2668_v35, 1  ;;  %s2904_s11 = sld [smem:[#allocation2 + $0x3e]] }
  0x7b   : > { %v1341_v54 = vrot.slane %v2612_v17, 1  ;;  %v1346_v58 = vmul.f32 %v2572_v7, %v2597_v12  ;;  %v1347_v41 = vmul.f32 %v2575_v8, %v2597_v12  ;;  %v395_v1 = vsel %vm382_vm1, %v393_v59, %v394_v60  ;;  %s2915_s2 = sld [smem:[#allocation2 + $0x2]] }
  0x7c   : > { %1643 = vrot.lane.b32.xlu1 %v2702_v52, %s2359_s10  ;;  %1641 = vrot.lane.b32.xlu0 %v2705_v53, %s2359_s10  ;;  %s2782_s10 = sld [smem:[#allocation2 + $0x33]]  ;;  %v403_v63 = vrot.slane %v399_v49, 2  ;;  %v404_v3 = vrot.slane %v400_v26, 2  ;;  %v645_v34 = vmul.f32 %v2558_v4, %v2681_v40  ;;  %v1356_v17 = vmul.f32 %v2572_v7, %v2629_v21 }
  0x7d   : > { %v1357_v35 = vmul.f32 %v2575_v8, %v2629_v21  ;;  %v2824_v61 = vadd.f32 %v395_v1, %v366_v47  ;;  %v640_v12 = vrot.slane %v2730_v2, 2  ;;  %v650_v6 = vrot.slane %v2734_v39, 2  ;;  %s2917_s14 = sld [smem:[#allocation2 + $0x1d]] }
  0x7e   : > { %v1366_v27 = vmul.f32 %v2572_v7, %v2581_v9  ;;  %v405_v28 = vsel %vm382_vm1, %v403_v63, %v404_v3  ;;  %v1350_v50 = vrot.slane %v1346_v58, 1  ;;  %v1367_v30 = vmul.f32 %v2575_v8, %v2581_v9  ;;  %s2919_s13 = sld [smem:[#allocation2 + $0x38]] }
  0x7f   : > { %v1377_v21 = vmul.f32 %v2575_v8, %v2633_v23  ;;  %v2839_v38 = vadd.f32 %v405_v28, %v376_v48  ;;  %v1351_v2 = vrot.slane %v1347_v41, 1  ;;  %v1387_v39 = vmul.f32 %v2575_v8, %v2681_v40  ;;  %s2921_s17 = sld [smem:[#allocation2 + $0xd]] }
  0x80   : > { %975 = vrot.lane.b32.xlu1 %v2671_v36, %s2360_s25  ;;  %973 = vrot.lane.b32.xlu0 %v2674_v37, %s2360_s25  ;;  %v2850_v0 = vsel %vm351_vm0, %v599_v15, %v600_v18  ;;  %v2857_v9 = vsel %vm351_vm0, %v609_v31, %v610_v5  ;;  %v1360_v42 = vrot.slane %v1356_v17, 1  ;;  %v1361_v43 = vrot.slane %v1357_v35, 1  ;;  %s2923_s28 = sld [smem:[#allocation2 + $0x10]] }
  0x81   : > { %v1376_v8 = vmul.f32 %v2572_v7, %v2633_v23  ;;  %v2864_v11 = vsel %vm351_vm0, %v619_v33, %v620_v62  ;;  %v1386_v10 = vmul.f32 %v2572_v7, %v2681_v40  ;;  %v629_v15 = vrot.slane %v2609_v16, 2  ;;  %3944 = sst [smem:[#allocation35_spill]] %s2915_s2 }
  0x82   : > { %v639_v18 = vrot.slane %v2720_v32, 2  ;;  %v649_v19 = vrot.slane %v645_v34, 2  ;;  %v1371_v20 = vrot.slane %v1367_v30, 2  ;;  %v1381_v31 = vrot.slane %v1377_v21, 2  ;;  %s2931_s12 = sld [smem:[#allocation2 + $0x28]] }
  0x83   : > { %v1391_v23 = vrot.slane %v1387_v39, 2  ;;  %v2879_v5 = vsel %vm382_vm1, %v629_v15, %v630_v22  ;;  %v3937_v32 = vrot.slane %v2604_v14, 1  ;;  %v2895_v51 = vsel %vm351_vm0, %v1350_v50, %v1351_v2  ;;  %3945 = sst [smem:[#allocation36_spill]] %s2917_s14 }
  0x84   : > { %1716 = vrot.lane.b32.xlu1 %v2702_v52, %s2360_s25  ;;  %1714 = vrot.lane.b32.xlu0 %v2705_v53, %s2360_s25  ;;  %s2793_s25 = sld [smem:[#allocation2 + $0x4e]]  ;;  %v2882_v40 = vsel %vm382_vm1, %v639_v18, %v640_v12  ;;  %v2885_v16 = vsel %vm382_vm1, %v649_v19, %v650_v6  ;;  %3939 = vst [vmem:[#allocation30_spill] sm:$0xff] %v2895_v51  ;;  %v1370_v22 = vrot.slane %v1366_v27, 2  ;;  %v1380_v55 = vrot.slane %v1376_v8, 2 }
  0x85   : > { %v2892_v29 = vsel %vm351_vm0, %v3937_v32, %v1341_v54  ;;  %v2898_v13 = vsel %vm351_vm0, %v1360_v42, %v1361_v43  ;;  %v1390_v56 = vrot.slane %v1386_v10, 2  ;;  %3946 = sst [smem:[#allocation37_spill]] %s2919_s13  ;;  %v2926_v48 = vstv %s2762_s20 }
  0x86   : > { %3938 = vst [vmem:[#allocation29_spill] sm:$0xff] %v2892_v29  ;;  %3940 = vst [vmem:[#allocation31_spill] sm:$0xff] %v2898_v13  ;;  %v2907_v14 = vsel %vm382_vm1, %v1370_v22, %v1371_v20  ;;  %v2910_v46 = vsel %vm382_vm1, %v1380_v55, %v1381_v31  ;;  %v2929_v25 = vstv %s2776_s29  ;;  %v2934_v59 = vstv %s2787_s8  ;;  %s2936_s3 = sld [smem:[#allocation2 + $0x2b]] }
  0x87   : > { %3941 = vst [vmem:[#allocation32_spill] sm:$0xff] %v2907_v14  ;;  %3942 = vst [vmem:[#allocation33_spill] sm:$0xff] %v2910_v46  ;;  %v2913_v47 = vsel %vm382_vm1, %v1390_v56, %v1391_v23  ;;  %v2939_v60 = vstv %s2770_s27  ;;  %s2941_s26 = sld [smem:[#allocation2 + $0x43]]  ;;  %v842_v49 = vmul.f32 %v2671_v36, %v2926_v48  ;;  %v852_v26 = vmul.f32 %v2671_v36, %v2929_v25 }
  0x88   : > { %3943 = vst [vmem:[#allocation34_spill] sm:$0xff] %v2913_v47  ;;  %v2948_v33 = vstv %s2782_s10  ;;  %s2950_s20 = sld [smem:[#allocation2 + $0x46]]  ;;  %v862_v62 = vmul.f32 %v2671_v36, %v2934_v59  ;;  %v872_v58 = vmul.f32 %v2671_v36, %v2939_v60  ;;  %v841_v17 = vmul.f32 %v2674_v37, %v2926_v48 }
  0x89   : > { %s2957_s29 = sld [smem:[#allocation2 + $0x9]]  ;;  %v882_v41 = vmul.f32 %v2671_v36, %v2948_v33  ;;  %v846_v1 = vrot.slane %v842_v49, 1  ;;  %v856_v63 = vrot.slane %v852_v26, 1  ;;  %v851_v35 = vmul.f32 %v2674_v37, %v2929_v25 }
  0x8a   : > { %v2955_v54 = vstv %s2793_s25  ;;  %s2961_s27 = sld [smem:[#allocation2 + $0xa]]  ;;  %v866_v34 = vrot.slane %v862_v62, 1  ;;  %v861_v12 = vmul.f32 %v2674_v37, %v2934_v59  ;;  %v876_v6 = vrot.slane %v872_v58, 2 }
  0x8b   : > { %s2965_s8 = sld [smem:[#allocation2 + $0x24]]  ;;  %v892_v3 = vmul.f32 %v2671_v36, %v2955_v54  ;;  %v886_v27 = vrot.slane %v882_v41, 2  ;;  %v845_v36 = vrot.slane %v841_v17, 1  ;;  %v855_v28 = vrot.slane %v851_v35, 1 }
  0x8c   : > { %s2969_s10 = sld [smem:[#allocation2 + $0x25]]  ;;  %v865_v50 = vrot.slane %v861_v12, 1  ;;  %v871_v21 = vmul.f32 %v2674_v37, %v2939_v60  ;;  %v881_v2 = vmul.f32 %v2674_v37, %v2948_v33  ;;  %v891_v39 = vmul.f32 %v2674_v37, %v2955_v54 }
  0x8d   : > { %s2971_s25 = sld [smem:[#allocation2 + $0x3f]]  ;;  %v896_v30 = vrot.slane %v892_v3, 2  ;;  %v2994_v42 = vsel %vm351_vm0, %v845_v36, %v846_v1  ;;  %v2997_v43 = vsel %vm351_vm0, %v855_v28, %v856_v63  ;;  %v1583_v19 = vmul.f32 %v2702_v52, %v2926_v48 }
  0x8e   : > { %3947 = sst [smem:[#allocation38_spill]] %s2950_s20  ;;  %3954 = vst [vmem:[#allocation45_spill] sm:$0xff] %v2994_v42  ;;  %3955 = vst [vmem:[#allocation46_spill] sm:$0xff] %v2997_v43  ;;  %v3000_v8 = vsel %vm351_vm0, %v865_v50, %v866_v34  ;;  %v875_v10 = vrot.slane %v871_v21, 2  ;;  %v885_v15 = vrot.slane %v881_v2, 2  ;;  %v895_v18 = vrot.slane %v891_v39, 2 }
  0x8f   : > { %s2979_s15 = sld [smem:[#allocation2 + $0x40]]  ;;  %3956 = vst [vmem:[#allocation47_spill] sm:$0xff] %v3000_v8  ;;  %v1593_v20 = vmul.f32 %v2702_v52, %v2929_v25  ;;  %v1603_v31 = vmul.f32 %v2702_v52, %v2934_v59  ;;  %v1613_v23 = vmul.f32 %v2702_v52, %v2939_v60  ;;  %v1623_v56 = vmul.f32 %v2702_v52, %v2948_v33 }
  0x90   : > { %3948 = sst [smem:[#allocation39_spill]] %s2961_s27  ;;  %v3017_v32 = vsel %vm382_vm1, %v875_v10, %v876_v6  ;;  %v3020_v22 = vsel %vm382_vm1, %v885_v15, %v886_v27  ;;  %v3023_v55 = vsel %vm382_vm1, %v895_v18, %v896_v30  ;;  %v1633_v49 = vmul.f32 %v2702_v52, %v2955_v54 }
  0x91   : > { %s2981_s6 = sld [smem:[#allocation2 + $0xe]]  ;;  %3960 = vst [vmem:[#allocation51_spill] sm:$0xff] %v3017_v32  ;;  %3961 = vst [vmem:[#allocation52_spill] sm:$0xff] %v3020_v22  ;;  %v1587_v26 = vrot.slane %v1583_v19, 1  ;;  %v1597_v62 = vrot.slane %v1593_v20, 1  ;;  %v1607_v58 = vrot.slane %v1603_v31, 1  ;;  %v1582_v1 = vmul.f32 %v2705_v53, %v2926_v48 }
  0x92   : > { %3949 = sst [smem:[#allocation40_spill]] %s2969_s10  ;;  %3962 = vst [vmem:[#allocation53_spill] sm:$0xff] %v3023_v55  ;;  %v1617_v41 = vrot.slane %v1613_v23, 2  ;;  %v1627_v63 = vrot.slane %v1623_v56, 2  ;;  %v1637_v3 = vrot.slane %v1633_v49, 2  ;;  %v1592_v52 = vmul.f32 %v2705_v53, %v2929_v25 }
  0x93   : > { %s2983_s10 = sld [smem:[#allocation2 + $0x11]]  ;;  %v1602_v34 = vmul.f32 %v2705_v53, %v2934_v59  ;;  %v1586_v17 = vrot.slane %v1582_v1, 1  ;;  %v1612_v35 = vmul.f32 %v2705_v53, %v2939_v60  ;;  %v1622_v12 = vmul.f32 %v2705_v53, %v2948_v33 }
  0x94   : > { %s2991_s27 = sld [smem:[#allocation2 + $0x29]]  ;;  %v1632_v48 = vmul.f32 %v2705_v53, %v2955_v54  ;;  %v1596_v6 = vrot.slane %v1592_v52, 1  ;;  %v3091_v10 = vstv %s2809_s24  ;;  %v3094_v15 = vstv %s2830_s0 }
  0x95   : > { %3950 = sst [smem:[#allocation41_spill]] %s2979_s15  ;;  %v1606_v27 = vrot.slane %v1602_v34, 1  ;;  %v3058_v25 = vsel %vm351_vm0, %v1586_v17, %v1587_v26  ;;  %v1616_v59 = vrot.slane %v1612_v35, 2  ;;  %v1626_v60 = vrot.slane %v1622_v12, 2 }
  0x96   : > { %s3035_s15 = sld [smem:[#allocation2 + $0x12]]  ;;  %3970 = vst [vmem:[#allocation61_spill] sm:$0xff] %v3058_v25  ;;  %v1636_v36 = vrot.slane %v1632_v48, 2  ;;  %v3063_v33 = vsel %vm351_vm0, %v1596_v6, %v1597_v62  ;;  %v3097_v18 = vstv %s2861_s19  ;;  %v3100_v19 = vstv %s2813_s4 }
  0x97   : > { %3951 = sst [smem:[#allocation42_spill]] %s2981_s6  ;;  %3972 = vst [vmem:[#allocation63_spill] sm:$0xff] %v3063_v33  ;;  %v3066_v54 = vsel %vm351_vm0, %v1606_v27, %v1607_v58  ;;  %v3071_v28 = vsel %vm382_vm1, %v1616_v59, %v1617_v41  ;;  %v3074_v50 = vsel %vm382_vm1, %v1626_v60, %v1627_v63  ;;  %v3105_v20 = vstv %s2837_s9 }
  0x98   : > { %s3014_s6 = sld [smem:[#allocation2 + $0x47]]  ;;  %3973 = vst [vmem:[#allocation64_spill] sm:$0xff] %v3066_v54  ;;  %3975 = vst [vmem:[#allocation66_spill] sm:$0xff] %v3071_v28  ;;  %v3077_v30 = vsel %vm382_vm1, %v1636_v36, %v1637_v3  ;;  %v3108_v31 = vstv %s2868_s30  ;;  %v3111_v23 = vstv %s2872_s7  ;;  %v3114_v56 = vstv %s2887_s16 }
  0x99   : > { %3952 = sst [smem:[#allocation43_spill]] %s2983_s10  ;;  %3976 = vst [vmem:[#allocation67_spill] sm:$0xff] %v3074_v50  ;;  %3977 = vst [vmem:[#allocation68_spill] sm:$0xff] %v3077_v30  ;;  %v3119_v49 = vstv %s2902_s23  ;;  %v3122_v26 = vstv %s2874_s1  ;;  %v3125_v62 = vstv %s2900_s22  ;;  %v3128_v58 = vstv %s2904_s11 }
  0x9a   : > { %3953 = sst [smem:[#allocation44_spill]] %s2991_s27  ;;  %v585_v1 = vstv %s2957_s29  ;;  %v588_v63 = vstv %s2965_s8  ;;  %v591_v3 = vstv %s2971_s25  ;;  %v3141_v17 = vstv %s2921_s17 }
  0x9b   : > { %s3002_s10 = sld [smem:[#allocation2 + $0x2c]]  ;;  %v3144_v35 = vstv %s2931_s12  ;;  %v3149_v12 = vstv %s2941_s26  ;;  %v3152_v48 = vstv %s2923_s28  ;;  %v3155_v6 = vstv %s2936_s3 }
  0x9c   : > { %s3010_s27 = sld [smem:[#allocation2 + $0x44]]  ;;  %v3163_v59 = vmul.f32 %v2558_v4, %v585_v1  ;;  %v3166_v60 = vmul.f32 %v2558_v4, %v588_v63  ;;  %v3169_v36 = vmul.f32 %v2558_v4, %v591_v3  ;;  %v3177_v39 = vmul.f32 %v2572_v7, %v585_v1 }
  0x9d   : > { %s3039_s20 = sld [smem:[#allocation2 + $0x16]]  ;;  %v3180_v2 = vmul.f32 %v2572_v7, %v588_v63  ;;  %v3185_v4 = vmul.f32 %v2572_v7, %v591_v3  ;;  %v831_v41 = vstv %s3035_s15 }
  0x9e   : > { %3959 = sst [smem:[#allocation50_spill]] %s3014_s6  ;;  %v3221_v25 = vmul.f32 %v2674_v37, %v831_v41  ;;  %v3242_v42 = vmul.f32 %v2705_v53, %v831_v41 }
  0x9f   : > { %s3033_s6 = sld [smem:[#allocation2 + $0x41]]  ;;  %3994 = vst [vmem:[#allocation70_spill] sm:$0xff] %v3185_v4 }
  0xa0   : > { %s3116_s24 = sld [smem:[#allocation2 + $0x17]]  ;;  %4008 = vst [vmem:[#allocation79_spill] sm:$0xff] %v3221_v25  ;;  %4014 = vst [vmem:[#allocation85_spill] sm:$0xff] %v3242_v42 }
  0xa1   : > { %3957 = sst [smem:[#allocation48_spill]] %s3002_s10 }
  0xa2   : > { %3958 = sst [smem:[#allocation49_spill]] %s3010_s27 }
  0xa3   : > { %s3029_s10 = sld [smem:[#allocation2 + $0xb]] }
  0xa4   : > { %s3031_s27 = sld [smem:[#allocation2 + $0x26]] }
  0xa5   : > { %3965 = sst [smem:[#allocation56_spill]] %s3033_s6 }
  0xa6   : > { %3966 = sst [smem:[#allocation57_spill]] %s3039_s20 }
  0xa7   : > { %s3053_s6 = sld [smem:[#allocation2 + $0x31]] }
  0xa8   : > { %s3055_s20 = sld [smem:[#allocation2 + $0x34]] }
  0xa9   : > { %3963 = sst [smem:[#allocation54_spill]] %s3029_s10 }
  0xaa   : > { %3964 = sst [smem:[#allocation55_spill]] %s3031_s27 }
  0xab   : > { %s3045_s27 = sld [smem:[#allocation2 + $0x19]] }
  0xac   : > { %s3083_s10 = sld [smem:[#allocation2 + $0x2e]] }
  0xad   : > { %3968 = sst [smem:[#allocation59_spill]] %s3053_s6 }
  0xae   : > { %3969 = sst [smem:[#allocation60_spill]] %s3055_s20 }
  0xaf   : > { %s3068_s20 = sld [smem:[#allocation2 + $0x4f]] }
  0xb0   : > { %s3081_s6 = sld [smem:[#allocation2 + $0x2d]] }
  0xb1   : > { %3967 = sst [smem:[#allocation58_spill]] %s3045_s27 }
  0xb2   : > { %s3060_s27 = sld [smem:[#allocation2 + $0x4c]] }
  0xb3   : > { %3978 = sst [smem:[#allocation69_spill]] %s3083_s10 }
  0xb4   : > { %s3102_s10 = sld [smem:[#allocation2 + $0x49]] }
  0xb5   : > { %3974 = sst [smem:[#allocation65_spill]] %s3068_s20 }
  0xb6   : > { %s3088_s20 = sld [smem:[#allocation2 + $0x48]]  ;;  %v834_v28 = vstv %s3081_s6 }
  0xb7   : > { %s3979_s4 = sld [smem:[#allocation38_spill]]  ;;  %v3237_v3 = vmul.f32 %v2674_v37, %v834_v28 }
  0xb8   : > { %3971 = sst [smem:[#allocation62_spill]] %s3060_s27 }
  0xb9   : > { %s3079_s27 = sld [smem:[#allocation2 + $0x13]]  ;;  %4013 = vst [vmem:[#allocation84_spill] sm:$0xff] %v3237_v3  ;;  %v3255_v3 = vstv %s3116_s24 }
  0xba   : > { %s3130_s0 = sld [smem:[#allocation2 + $0x1a]]  ;;  %4018 = vst [vmem:[#allocation89_spill] sm:$0xff] %v3255_v3 }
  0xbb   : > { %s3136_s19 = sld [smem:[#allocation2 + $0x32]] }
  0xbc   : > { %s3146_s1 = sld [smem:[#allocation2 + $0x35]]  ;;  %v837_v55 = vstv %s3088_s20 }
  0xbd   : > { %s3983_s11 = sld [smem:[#allocation42_spill]]  ;;  %v3158_v27 = vstv %s3979_s4  ;;  %v3245_v25 = vmul.f32 %v2674_v37, %v837_v55 }
  0xbe   : > { %s3984_s16 = sld [smem:[#allocation44_spill]] }
  0xbf   : > { %s3160_s22 = sld [smem:[#allocation2 + $0x4d]]  ;;  %4015 = vst [vmem:[#allocation86_spill] sm:$0xff] %v3245_v25 }
  0xc0   : > { %s3985_s17 = sld [smem:[#allocation49_spill]]  ;;  %v3261_v43 = vstv %s3130_s0 }
  0xc1   : > { %s3986_s12 = sld [smem:[#allocation43_spill]]  ;;  %v3258_v8 = vstv %s3136_s19  ;;  %4020 = vst [vmem:[#allocation91_spill] sm:$0xff] %v3261_v43 }
  0xc2   : > { %s3987_s26 = sld [smem:[#allocation48_spill]]  ;;  %4019 = vst [vmem:[#allocation90_spill] sm:$0xff] %v3258_v8  ;;  %v3264_v41 = vstv %s3146_s1 }
  0xc3   : > { %s3988_s28 = sld [smem:[#allocation50_spill]]  ;;  %v3188_v34 = vstv %s3983_s11  ;;  %4022 = vst [vmem:[#allocation92_spill] sm:$0xff] %v3264_v41 }
  0xc4   : > { %s3172_s3 = sld [smem:[#allocation2 + $0x50]]  ;;  %3995 = vst [vmem:[#allocation71_spill] sm:$0xff] %v3188_v34  ;;  %v3191_v52 = vstv %s3984_s16 }
  0xc5   : > { %s3989_s23 = sld [smem:[#allocation54_spill]]  ;;  %3996 = vst [vmem:[#allocation72_spill] sm:$0xff] %v3191_v52  ;;  %v3267_v37 = vstv %s3160_s22 }
  0xc6   : > { %s3990_s29 = sld [smem:[#allocation55_spill]]  ;;  %v3197_v1 = vstv %s3985_s17  ;;  %4023 = vst [vmem:[#allocation93_spill] sm:$0xff] %v3267_v37  ;;  %s2361_s17 = smov [#allocation9]  }
  0xc7   : > { %s3991_s8 = sld [smem:[#allocation56_spill]]  ;;  %4000 = vst [vmem:[#allocation73_spill] sm:$0xff] %v3197_v1  ;;  %v3200_v63 = vstv %s3986_s12  ;;  %s2262_s12 = sshll.u32 %s2361_s17, 4  ;;  %s2263_s12 = int_to_ptr.vmem [resolvable:$false] %s2262_s12 }
  0xc8   : > { %s3992_s25 = sld [smem:[#allocation57_spill]]  ;;  %4002 = vst [vmem:[#allocation74_spill] sm:$0xff] %v3200_v63  ;;  %v3203_v21 = vstv %s3987_s26  ;;  %s2264_s26 = scalar_lea.vmem %s2263_s12, 1536 }
  0xc9   : > { %s3182_s4 = sld [smem:[#allocation2 + $0x14]]  ;;  %4003 = vst [vmem:[#allocation75_spill] sm:$0xff] %v3203_v21  ;;  %v3206_v7 = vstv %s3988_s28 }
  0xca   : > { %s3993_s13 = sld [smem:[#allocation58_spill]]  ;;  %4004 = vst [vmem:[#allocation76_spill] sm:$0xff] %v3206_v7  ;;  %v1150_v42 = vpop.permute.xlu1 %1149  ;;  %v3270_v25 = vstv %s3172_s3  ;;  %v3284_v37 = vpop.permute.xlu0 %408 }
  0xcb   : > { %s3997_s7 = sld [smem:[#allocation59_spill]]  ;;  %4024 = vst [vmem:[#allocation94_spill] sm:$0xff] %v3270_v25  ;;  %v1163_v3 = vmul.f32 %v3091_v10, %v1150_v42  ;;  %v1173_v8 = vmul.f32 %v3094_v15, %v1150_v42  ;;  %v1183_v43 = vmul.f32 %v3097_v18, %v1150_v42  ;;  %v1193_v41 = vmul.f32 %v3100_v19, %v1150_v42 }
  0xcc   : > { %s3998_s30 = sld [smem:[#allocation62_spill]] }
  0xcd   : > { %s3194_s9 = sld [smem:[#allocation2 + $0x2f]]  ;;  %v1197_v7 = vrot.slane %v1193_v41, 2 }
  0xce   : > { %s3999_s14 = sld [smem:[#allocation60_spill]]  ;;  %v3215_v54 = vstv %s3992_s25  ;;  %v1152_v21 = vpop.permute.xlu1 %1151 }
  0xcf   : > { %s4001_s2 = sld [smem:[#allocation65_spill]]  ;;  %4006 = vst [vmem:[#allocation77_spill] sm:$0xff] %v3215_v54  ;;  %v1177_v54 = vrot.slane %v1173_v8, 1  ;;  %v1164_v34 = vmul.f32 %v3091_v10, %v1152_v21  ;;  %v1174_v47 = vmul.f32 %v3094_v15, %v1152_v21  ;;  %v1214_v8 = vmul.f32 %v3108_v31, %v1152_v21 }
  0xd0   : > { %s4005_s11 = sld [smem:[#allocation69_spill]]  ;;  %v3218_v33 = vstv %s3993_s13 }
  0xd1   : > { %s3208_s21 = sld [smem:[#allocation2 + $0x4a]]  ;;  %4007 = vst [vmem:[#allocation78_spill] sm:$0xff] %v3218_v33  ;;  %v3225_v22 = vstv %s3997_s7  ;;  %v3249_v33 = vmul.f32 %v2705_v53, %v834_v28  ;;  %v1167_v28 = vrot.slane %v1163_v3, 1  ;;  %v4028_v3 = vstv %s2796_s18 }
  0xd2   : > { %4009 = vst [vmem:[#allocation80_spill] sm:$0xff] %v3225_v22  ;;  %v3228_v32 = vstv %s3998_s30  ;;  %v1203_v22 = vmul.f32 %v3105_v20, %v1150_v42  ;;  %v413_v41 = vmul.f32 %v4028_v3, %v3284_v37  ;;  %v1218_v14 = vrot.slane %v1214_v8, 2  ;;  %s4031_s13 = sld [smem:[#allocation35_spill]] }
  0xd3   : > { %4010 = vst [vmem:[#allocation81_spill] sm:$0xff] %v3228_v32  ;;  %4016 = vst [vmem:[#allocation87_spill] sm:$0xff] %v3249_v33  ;;  %v4025_v33 = vstv %s2796_s18  ;;  %s4033_s15 = sld [smem:[#allocation37_spill]] }
  0xd4   : > { %v3231_v30 = vstv %s3999_s14  ;;  %v1154_v32 = vmul.f32 %v4025_v33, %v1150_v42  ;;  %v1213_v33 = vmul.f32 %v3108_v31, %v1150_v42  ;;  %v1207_v1 = vrot.slane %v1203_v22, 2  ;;  %s4032_s14 = sld [smem:[#allocation36_spill]] }
  0xd5   : > { %4011 = vst [vmem:[#allocation82_spill] sm:$0xff] %v3231_v30  ;;  %v3234_v50 = vstv %s4001_s2  ;;  %s4021_s2 = sld [smem:[#allocation28_spill]] }
  0xd6   : > { %4012 = vst [vmem:[#allocation83_spill] sm:$0xff] %v3234_v50  ;;  %v3252_v50 = vmul.f32 %v2705_v53, %v837_v55  ;;  %v4026_v53 = vstv %s2822_s5  ;;  %v1217_v52 = vrot.slane %v1213_v33, 2  ;;  %s4040_s6 = sld [smem:[#allocation39_spill]] }
  0xd7   : > { %v1157_v55 = vmul.f32 %v4026_v53, %v1150_v42  ;;  %v1155_v53 = vadd.f32 %v1154_v32, %v2748_v44  ;;  %v1204_v44 = vmul.f32 %v3105_v20, %v1152_v21  ;;  %v1168_v32 = vrot.slane %v1164_v34, 1  ;;  %s4041_s18 = sld [smem:[#allocation40_spill]] }
  0xd8   : > { %4017 = vst [vmem:[#allocation88_spill] sm:$0xff] %v3252_v50  ;;  %v1187_v50 = vrot.slane %v1183_v43, 1  ;;  %v1178_v43 = vrot.slane %v1174_v47, 1  ;;  %v414_v47 = vadd.f32 %v413_v41, %v2798_v24  ;;  %v422_v24 = vmul.f32 %v3091_v10, %v3284_v37  ;;  %s4107_s20 = sld [smem:[#allocation27_spill]] }
  0xd9   : > { %v1158_v63 = vadd.f32 %v1157_v55, %v2750_v45  ;;  %v4029_v45 = vstv %s2822_s5  ;;  %v1208_v46 = vrot.slane %v1204_v44, 2  ;;  %v1169_v51 = vsel %vm351_vm0, %v1167_v28, %v1168_v32  ;;  %s4042_s5 = sld [smem:[#allocation41_spill]] }
  0xda   : > { %v416_v22 = vmul.f32 %v4029_v45, %v3284_v37  ;;  %v1179_v29 = vsel %vm351_vm0, %v1177_v54, %v1178_v43  ;;  %v1171_v34 = vadd.f32 %v1169_v51, %v1155_v53  ;;  %s4112_s24 = sld [smem:[#allocation20_spill]] }
  0xdb   : > { %v4027_v25 = vstv %s4021_s2  ;;  %v1181_v4 = vadd.f32 %v1179_v29, %v1158_v63  ;;  %v1209_v44 = vsel %vm382_vm1, %v1207_v1, %v1208_v46  ;;  %v4030_v54 = vstv %s4021_s2  ;;  %s4114_s7 = sld [smem:[#allocation98_spill]] }
  0xdc   : > { %v1160_v30 = vmul.f32 %v4027_v25, %v1150_v42  ;;  %v1184_v25 = vmul.f32 %v3097_v18, %v1152_v21  ;;  %v1194_v42 = vmul.f32 %v3100_v19, %v1152_v21  ;;  %v411_v21 = vpop.permute.xlu0 %410  ;;  %v417_v45 = vadd.f32 %v416_v22, %v2824_v61 }
  0xdd   : > { %v419_v28 = vmul.f32 %v4030_v54, %v3284_v37  ;;  %v423_v29 = vmul.f32 %v3091_v10, %v411_v21  ;;  %v3320_v51 = vadd.f32 %v1209_v44, %v1181_v4  ;;  %v433_v46 = vmul.f32 %v3094_v15, %v411_v21 }
  0xde   : > { %v1188_v55 = vrot.slane %v1184_v25, 1  ;;  %v1198_v33 = vrot.slane %v1194_v42, 2  ;;  %v1161_v13 = vadd.f32 %v1160_v30, %v2755_v57  ;;  %v1219_v57 = vsel %vm382_vm1, %v1217_v52, %v1218_v14  ;;  %s1793_s16 = scalar_lea.sflag [#allocation4], %s4107_s20 }
  0xdf   : > { %v426_v14 = vrot.slane %v422_v24, 1  ;;  %v442_v52 = vmul.f32 %v3097_v18, %v3284_v37  ;;  %v443_v1 = vmul.f32 %v3097_v18, %v411_v21  ;;  %v452_v10 = vmul.f32 %v3100_v19, %v3284_v37 }
  0xe0   : > { %v1189_v3 = vsel %vm351_vm0, %v1187_v50, %v1188_v55  ;;  %v1199_v42 = vsel %vm382_vm1, %v1197_v7, %v1198_v33  ;;  %v427_v50 = vrot.slane %v423_v29, 1  ;;  %v437_v7 = vrot.slane %v433_v46, 1  ;;  %v484_v55 = vpop.permute.xlu1 %483 }
  0xe1   : > { %v1191_v25 = vadd.f32 %v1189_v3, %v1161_v13  ;;  %v3312_v30 = vadd.f32 %v1199_v42, %v1171_v34  ;;  %v432_v13 = vmul.f32 %v3094_v15, %v3284_v37  ;;  %v453_v4 = vmul.f32 %v3100_v19, %v411_v21 }
  0xe2   : > { %v428_v53 = vsel %vm351_vm0, %v426_v14, %v427_v50  ;;  %v446_v8 = vrot.slane %v442_v52, 1  ;;  %v447_v32 = vrot.slane %v443_v1, 1  ;;  %v462_v15 = vmul.f32 %v3105_v20, %v3284_v37 }
  0xe3   : > { %v3322_v61 = vadd.f32 %v1219_v57, %v1191_v25  ;;  %v436_v63 = vrot.slane %v432_v13, 1  ;;  %v420_v43 = vadd.f32 %v419_v28, %v2839_v38  ;;  %v430_v41 = vadd.f32 %v428_v53, %v414_v47  ;;  %v482_v13 = vpop.permute.xlu0 %481 }
  0xe4   : > { %v457_v18 = vrot.slane %v453_v4, 2  ;;  %v448_v34 = vsel %vm351_vm0, %v446_v8, %v447_v32  ;;  %v456_v3 = vrot.slane %v452_v10, 2  ;;  %v463_v19 = vmul.f32 %v3105_v20, %v411_v21 }
  0xe5   : > { %v438_v22 = vsel %vm351_vm0, %v436_v63, %v437_v7  ;;  %v450_v25 = vadd.f32 %v448_v34, %v420_v43  ;;  %v466_v42 = vrot.slane %v462_v15, 2  ;;  %v472_v44 = vmul.f32 %v3108_v31, %v3284_v37 }
  0xe6   : > { %v440_v33 = vadd.f32 %v438_v22, %v417_v45  ;;  %v473_v57 = vmul.f32 %v3108_v31, %v411_v21  ;;  %v458_v38 = vsel %vm382_vm1, %v456_v3, %v457_v18  ;;  %v467_v47 = vrot.slane %v463_v19, 2  ;;  %v1225_v19 = vpop.permute.xlu1 %1224 }
  0xe7   : > { %v496_v54 = vmul.f32 %v3111_v23, %v484_v55  ;;  %v506_v28 = vmul.f32 %v3114_v56, %v484_v55  ;;  %v476_v45 = vrot.slane %v472_v44, 2  ;;  %v516_v20 = vmul.f32 %v3119_v49, %v484_v55 }
  0xe8   : > { %v477_v24 = vrot.slane %v473_v57, 2  ;;  %v526_v29 = vmul.f32 %v3122_v26, %v484_v55  ;;  %v460_v37 = vadd.f32 %v458_v38, %v430_v41  ;;  %v468_v31 = vsel %vm382_vm1, %v466_v42, %v467_v47 }
  0xe9   : > { %v500_v21 = vrot.slane %v496_v54, 1  ;;  %v536_v46 = vmul.f32 %v3125_v62, %v484_v55  ;;  %v470_v14 = vadd.f32 %v468_v31, %v440_v33  ;;  %v510_v52 = vrot.slane %v506_v28, 1 }
  0xea   : > { %v478_v50 = vsel %vm382_vm1, %v476_v45, %v477_v24  ;;  %v520_v1 = vrot.slane %v516_v20, 1  ;;  %v530_v7 = vrot.slane %v526_v29, 2  ;;  %v4034_v4 = vstv %s4031_s13 }
  0xeb   : > { %v480_v63 = vadd.f32 %v478_v50, %v450_v25  ;;  %v540_v10 = vrot.slane %v536_v46, 2  ;;  %v486_v53 = vmul.f32 %v4034_v4, %v482_v13  ;;  %v4035_v8 = vstv %s4032_s14 }
  0xec   : > { %v489_v32 = vmul.f32 %v4035_v8, %v482_v13  ;;  %v4036_v15 = vstv %s4033_s15  ;;  %v495_v41 = vmul.f32 %v3111_v23, %v482_v13  ;;  %v505_v22 = vmul.f32 %v3114_v56, %v482_v13  ;;  %v1223_v8 = vpop.permute.xlu0 %1222 }
  0xed   : > { %v492_v43 = vmul.f32 %v4036_v15, %v482_v13  ;;  %v546_v18 = vmul.f32 %v3128_v58, %v484_v55  ;;  %v487_v33 = vadd.f32 %v486_v53, %v460_v37  ;;  %v515_v34 = vmul.f32 %v3119_v49, %v482_v13 }
  0xee   : > { %v525_v3 = vmul.f32 %v3122_v26, %v482_v13  ;;  %v490_v25 = vadd.f32 %v489_v32, %v470_v14  ;;  %v499_v44 = vrot.slane %v495_v41, 1  ;;  %v509_v57 = vrot.slane %v505_v22, 1 }
  0xef   : > { %v493_v42 = vadd.f32 %v492_v43, %v480_v63  ;;  %v519_v38 = vrot.slane %v515_v34, 1  ;;  %v535_v54 = vmul.f32 %v3125_v62, %v482_v13  ;;  %v545_v28 = vmul.f32 %v3128_v58, %v482_v13 }
  0xf0   : > { %v529_v47 = vrot.slane %v525_v3, 2  ;;  %v501_v45 = vsel %vm351_vm0, %v499_v44, %v500_v21  ;;  %v511_v55 = vsel %vm351_vm0, %v509_v57, %v510_v52  ;;  %v1237_v24 = vmul.f32 %v1225_v19, %v3111_v23 }
  0xf1   : > { %v1247_v20 = vmul.f32 %v1225_v19, %v3114_v56  ;;  %v550_v29 = vrot.slane %v546_v18, 2  ;;  %v503_v37 = vadd.f32 %v501_v45, %v487_v33  ;;  %v513_v31 = vadd.f32 %v511_v55, %v490_v25 }
  0xf2   : > { %v521_v46 = vsel %vm351_vm0, %v519_v38, %v520_v1  ;;  %v531_v50 = vsel %vm382_vm1, %v529_v47, %v530_v7  ;;  %v539_v63 = vrot.slane %v535_v54, 2  ;;  %v549_v4 = vrot.slane %v545_v28, 2 }
  0xf3   : > { %v523_v14 = vadd.f32 %v521_v46, %v493_v42  ;;  %v533_v13 = vadd.f32 %v531_v50, %v503_v37  ;;  %v1241_v21 = vrot.slane %v1237_v24, 1  ;;  %v1257_v52 = vmul.f32 %v1225_v19, %v3119_v49 }
  0xf4   : > { %v1267_v53 = vmul.f32 %v1225_v19, %v3122_v26  ;;  %v541_v32 = vsel %vm382_vm1, %v539_v63, %v540_v10  ;;  %v1251_v15 = vrot.slane %v1247_v20, 1  ;;  %v1277_v1 = vmul.f32 %v1225_v19, %v3125_v62 }
  0xf5   : > { %v1287_v43 = vmul.f32 %v1225_v19, %v3128_v58  ;;  %v543_v7 = vadd.f32 %v541_v32, %v513_v31  ;;  %v551_v41 = vsel %vm382_vm1, %v549_v4, %v550_v29  ;;  %v1261_v22 = vrot.slane %v1257_v52, 1  ;;  %v657_v19 = vpop.permute.xlu1 %656 }
  0xf6   : > { %v1271_v18 = vrot.slane %v1267_v53, 2  ;;  %v1281_v33 = vrot.slane %v1277_v1, 2  ;;  %v4037_v3 = vstv %s4031_s13  ;;  %v4038_v42 = vstv %s4032_s14 }
  0xf7   : > { %v1291_v34 = vrot.slane %v1287_v43, 2  ;;  %v1227_v25 = vmul.f32 %v1223_v8, %v4037_v3  ;;  %v1230_v44 = vmul.f32 %v1223_v8, %v4038_v42  ;;  %v4039_v57 = vstv %s4033_s15 }
  0xf8   : > { %v1233_v38 = vmul.f32 %v1223_v8, %v4039_v57  ;;  %v1236_v10 = vmul.f32 %v1223_v8, %v3111_v23  ;;  %v1246_v47 = vmul.f32 %v1223_v8, %v3114_v56  ;;  %v1256_v54 = vmul.f32 %v1223_v8, %v3119_v49 }
  0xf9   : > { %v1228_v28 = vadd.f32 %v1227_v25, %v3312_v30  ;;  %v1231_v45 = vadd.f32 %v1230_v44, %v3320_v51  ;;  %v1266_v55 = vmul.f32 %v1223_v8, %v3122_v26  ;;  %v1276_v24 = vmul.f32 %v1223_v8, %v3125_v62 }
  0xfa   : > { %v1234_v20 = vadd.f32 %v1233_v38, %v3322_v61  ;;  %v1240_v29 = vrot.slane %v1236_v10, 1  ;;  %v1250_v37 = vrot.slane %v1246_v47, 1  ;;  %v1260_v31 = vrot.slane %v1256_v54, 1 }
  0xfb   : > { %v1270_v46 = vrot.slane %v1266_v55, 2  ;;  %v1280_v23 = vrot.slane %v1276_v24, 2  ;;  %v1286_v56 = vmul.f32 %v1223_v8, %v3128_v58  ;;  %v669_v49 = vmul.f32 %v3141_v17, %v657_v19 }
  0xfc   : > { %v1242_v50 = vsel %vm351_vm0, %v1240_v29, %v1241_v21  ;;  %v1252_v30 = vsel %vm351_vm0, %v1250_v37, %v1251_v15  ;;  %v1262_v51 = vsel %vm351_vm0, %v1260_v31, %v1261_v22  ;;  %v679_v26 = vmul.f32 %v3144_v35, %v657_v19  ;;  %v655_v22 = vpop.permute.xlu0 %654 }
  0xfd   : > { %v553_v62 = vadd.f32 %v551_v41, %v523_v14  ;;  %v1244_v63 = vadd.f32 %v1242_v50, %v1228_v28  ;;  %v1254_v61 = vadd.f32 %v1252_v30, %v1231_v45  ;;  %v1264_v4 = vadd.f32 %v1262_v51, %v1234_v20 }
  0xfe   : > { %v1272_v52 = vsel %vm382_vm1, %v1270_v46, %v1271_v18  ;;  %v1282_v53 = vsel %vm382_vm1, %v1280_v23, %v1281_v33  ;;  %v1290_v32 = vrot.slane %v1286_v56, 2  ;;  %v673_v58 = vrot.slane %v669_v49, 1 }
  0xff   : > { %v1274_v8 = vadd.f32 %v1272_v52, %v1244_v63  ;;  %v683_v1 = vrot.slane %v679_v26, 1  ;;  %v689_v21 = vmul.f32 %v3149_v12, %v657_v19  ;;  %v3400_v15 = vmul.f32 %v3152_v48, %v657_v19 }
 0x100   : > { %v1284_v43 = vadd.f32 %v1282_v53, %v1254_v61  ;;  %v1292_v14 = vsel %vm382_vm1, %v1290_v32, %v1291_v34  ;;  %v3404_v41 = vmul.f32 %v3155_v6, %v657_v19  ;;  %v587_v18 = vadd.f32 %v3163_v59, %v533_v13 }
 0x101   : > { %v1294_v33 = vadd.f32 %v1292_v14, %v1264_v4  ;;  %v693_v3 = vrot.slane %v689_v21, 1  ;;  %v3408_v25 = vmul.f32 %v3158_v27, %v657_v19  ;;  %v590_v42 = vadd.f32 %v3166_v60, %v543_v7  ;;  %v1396_v21 = vpop.permute.xlu0 %1395 }
 0x102   : > { %v703_v44 = vrot.slane %v3400_v15, 2  ;;  %v713_v57 = vrot.slane %v3404_v41, 2  ;;  %v593_v38 = vadd.f32 %v3169_v36, %v553_v62  ;;  %v603_v34 = vadd.f32 %v2850_v0, %v587_v18 }
 0x103   : > { %v613_v10 = vadd.f32 %v2857_v9, %v590_v42  ;;  %v4043_v47 = vstv %s4040_s6  ;;  %v4044_v59 = vstv %s4041_s18  ;;  %v4045_v28 = vstv %s4042_s5 }
 0x104   : > { %v659_v54 = vmul.f32 %v4043_v47, %v655_v22  ;;  %v662_v13 = vmul.f32 %v4044_v59, %v655_v22  ;;  %v665_v45 = vmul.f32 %v4045_v28, %v655_v22  ;;  %v623_v19 = vadd.f32 %v2864_v11, %v593_v38 }
 0x105   : > { %v633_v60 = vadd.f32 %v2879_v5, %v603_v34  ;;  %v668_v7 = vmul.f32 %v3141_v17, %v655_v22  ;;  %v678_v55 = vmul.f32 %v3144_v35, %v655_v22  ;;  %v643_v36 = vadd.f32 %v2882_v40, %v613_v10  ;;  %v1398_v5 = vpop.permute.xlu1 %1397  ;;  %v4046_v10 = vld [vmem:[#allocation70_spill] sm:$0xff] }
 0x106   : > { %v688_v0 = vmul.f32 %v3149_v12, %v655_v22  ;;  %v3429_v9 = vmul.f32 %v3152_v48, %v655_v22  ;;  %v3432_v24 = vmul.f32 %v3155_v6, %v655_v22  ;;  %v653_v20 = vadd.f32 %v2885_v16, %v623_v19 }
 0x107   : > { %v660_v29 = vadd.f32 %v659_v54, %v633_v60  ;;  %v672_v11 = vrot.slane %v668_v7, 1  ;;  %v682_v37 = vrot.slane %v678_v55, 1  ;;  %v723_v31 = vrot.slane %v3408_v25, 2  ;;  %v4047_v54 = vld [vmem:[#allocation29_spill] sm:$0xff]  ;;  %v4051_v55 = vld [vmem:[#allocation31_spill] sm:$0xff] }
 0x108   : > { %v663_v46 = vadd.f32 %v662_v13, %v643_v36  ;;  %v692_v23 = vrot.slane %v688_v0, 1  ;;  %v702_v40 = vrot.slane %v3429_v9, 2  ;;  %v666_v56 = vadd.f32 %v665_v45, %v653_v20  ;;  %v4048_v13 = vld [vmem:[#allocation30_spill] sm:$0xff]  ;;  %v4053_v0 = vld [vmem:[#allocation32_spill] sm:$0xff] }
 0x109   : > { %v674_v49 = vsel %vm351_vm0, %v672_v11, %v673_v58  ;;  %v712_v50 = vrot.slane %v3432_v24, 2  ;;  %v3440_v30 = vmul.f32 %v3158_v27, %v655_v22  ;;  %v684_v16 = vsel %vm351_vm0, %v682_v37, %v683_v1 }
 0x10a   : > { %v3442_v51 = vadd.f32 %v674_v49, %v660_v29  ;;  %v694_v26 = vsel %vm351_vm0, %v692_v23, %v693_v3  ;;  %v1410_v62 = vmul.f32 %v1398_v5, %v3141_v17  ;;  %v3447_v63 = vadd.f32 %v684_v16, %v663_v46  ;;  %v4054_v29 = vld [vmem:[#allocation33_spill] sm:$0xff] }
 0x10b   : > { %v3449_v61 = vadd.f32 %v694_v26, %v666_v56  ;;  %v1420_v4 = vmul.f32 %v1398_v5, %v3144_v35  ;;  %v1430_v52 = vmul.f32 %v1398_v5, %v3149_v12  ;;  %v722_v53 = vrot.slane %v3440_v30, 2  ;;  %v730_v26 = vpop.permute.xlu1 %729 }
 0x10c   : > { %v1414_v32 = vrot.slane %v1410_v62, 1  ;;  %v3455_v58 = vmul.f32 %v1398_v5, %v3152_v48  ;;  %v3458_v1 = vmul.f32 %v1398_v5, %v3155_v6  ;;  %v3461_v22 = vmul.f32 %v1398_v5, %v3158_v27  ;;  %v4055_v5 = vld [vmem:[#allocation34_spill] sm:$0xff] }
 0x10d   : > { %v1424_v14 = vrot.slane %v1420_v4, 1  ;;  %v1328_v18 = vadd.f32 %v3177_v39, %v1274_v8  ;;  %v1331_v3 = vadd.f32 %v3180_v2, %v1284_v43  ;;  %v1434_v42 = vrot.slane %v1430_v52, 1 }
 0x10e   : > { %v1444_v38 = vrot.slane %v3455_v58, 2  ;;  %v1454_v34 = vrot.slane %v3458_v1, 2  ;;  %v1334_v47 = vadd.f32 %v4046_v10, %v1294_v33  ;;  %v4049_v45 = vstv %s4040_s6 }
 0x10f   : > { %v1344_v59 = vadd.f32 %v4047_v54, %v1328_v18  ;;  %v1354_v28 = vadd.f32 %v4048_v13, %v1331_v3  ;;  %v1400_v19 = vmul.f32 %v1396_v21, %v4049_v45  ;;  %v4050_v60 = vstv %s4041_s18 }
 0x110   : > { %v1403_v7 = vmul.f32 %v1396_v21, %v4050_v60  ;;  %v1364_v36 = vadd.f32 %v4051_v55, %v1334_v47  ;;  %v4052_v39 = vstv %s4042_s5  ;;  %v1409_v2 = vmul.f32 %v1396_v21, %v3141_v17  ;;  %v4056_v47 = vld [vmem:[#allocation71_spill] sm:$0xff] }
 0x111   : > { %v1406_v8 = vmul.f32 %v1396_v21, %v4052_v39  ;;  %v1419_v43 = vmul.f32 %v1396_v21, %v3144_v35  ;;  %v1374_v20 = vadd.f32 %v4053_v0, %v1344_v59  ;;  %v1384_v33 = vadd.f32 %v4054_v29, %v1354_v28  ;;  %v4057_v59 = vld [vmem:[#allocation72_spill] sm:$0xff] }
 0x112   : > { %v1429_v11 = vmul.f32 %v1396_v21, %v3149_v12  ;;  %v3483_v37 = vmul.f32 %v1396_v21, %v3152_v48  ;;  %v1394_v46 = vadd.f32 %v4055_v5, %v1364_v36  ;;  %v1413_v23 = vrot.slane %v1409_v2, 1  ;;  %v4061_v39 = vld [vmem:[#allocation76_spill] sm:$0xff] }
 0x113   : > { %v1423_v56 = vrot.slane %v1419_v43, 1  ;;  %v3487_v49 = vmul.f32 %v1396_v21, %v3155_v6  ;;  %v1464_v17 = vrot.slane %v3461_v22, 2  ;;  %v1401_v30 = vadd.f32 %v1400_v19, %v1374_v20  ;;  %v4059_v19 = vld [vmem:[#allocation74_spill] sm:$0xff] }
 0x114   : > { %v1404_v35 = vadd.f32 %v1403_v7, %v1384_v33  ;;  %v1433_v16 = vrot.slane %v1429_v11, 1  ;;  %v1407_v62 = vadd.f32 %v1406_v8, %v1394_v46  ;;  %v1415_v4 = vsel %vm351_vm0, %v1413_v23, %v1414_v32  ;;  %v4058_v32 = vld [vmem:[#allocation73_spill] sm:$0xff]  ;;  %v4060_v7 = vld [vmem:[#allocation75_spill] sm:$0xff] }
 0x115   : > { %v1425_v12 = vsel %vm351_vm0, %v1423_v56, %v1424_v14  ;;  %v1443_v48 = vrot.slane %v3483_v37, 2  ;;  %v3493_v52 = vadd.f32 %v1415_v4, %v1401_v30  ;;  %v1453_v6 = vrot.slane %v3487_v49, 2 }
 0x116   : > { %v3495_v18 = vadd.f32 %v1425_v12, %v1404_v35  ;;  %v3499_v3 = vmul.f32 %v1396_v21, %v3158_v27  ;;  %v1435_v10 = vsel %vm351_vm0, %v1433_v16, %v1434_v42  ;;  %v742_v54 = vmul.f32 %v4056_v47, %v730_v26  ;;  %v728_v27 = vpop.permute.xlu0 %727 }
 0x117   : > { %v752_v13 = vmul.f32 %v4057_v59, %v730_v26  ;;  %v762_v28 = vmul.f32 %v4058_v32, %v730_v26  ;;  %v3505_v14 = vadd.f32 %v1435_v10, %v1407_v62  ;;  %v772_v60 = vmul.f32 %v4059_v19, %v730_v26 }
 0x118   : > { %v1463_v45 = vrot.slane %v3499_v3, 2  ;;  %v782_v55 = vmul.f32 %v4060_v7, %v730_v26  ;;  %v746_v21 = vrot.slane %v742_v54, 1  ;;  %v792_v8 = vmul.f32 %v4061_v39, %v730_v26 }
 0x119   : > { %v756_v42 = vrot.slane %v752_v13, 1  ;;  %v766_v36 = vrot.slane %v762_v28, 1  ;;  %v776_v2 = vrot.slane %v772_v60, 2  ;;  %v704_v0 = vsel %vm382_vm1, %v702_v40, %v703_v44 }
 0x11a   : > { %v786_v43 = vrot.slane %v782_v55, 2  ;;  %v714_v20 = vsel %vm382_vm1, %v712_v50, %v713_v57  ;;  %v724_v29 = vsel %vm382_vm1, %v722_v53, %v723_v31  ;;  %v706_v33 = vadd.f32 %v704_v0, %v3442_v51  ;;  %v1471_v50 = vpop.permute.xlu1 %1470 }
 0x11b   : > { %v716_v11 = vadd.f32 %v714_v20, %v3447_v63  ;;  %v4062_v5 = vstv %s3989_s23  ;;  %v726_v9 = vadd.f32 %v724_v29, %v3449_v61  ;;  %v4063_v46 = vstv %s3990_s29 }
 0x11c   : > { %v732_v15 = vmul.f32 %v4062_v5, %v728_v27  ;;  %v735_v44 = vmul.f32 %v4063_v46, %v728_v27  ;;  %v4064_v40 = vstv %s3991_s8  ;;  %v741_v24 = vmul.f32 %v4056_v47, %v728_v27 }
 0x11d   : > { %v738_v41 = vmul.f32 %v4064_v40, %v728_v27  ;;  %v751_v57 = vmul.f32 %v4057_v59, %v728_v27  ;;  %v761_v25 = vmul.f32 %v4058_v32, %v728_v27  ;;  %v771_v31 = vmul.f32 %v4059_v19, %v728_v27 }
 0x11e   : > { %v733_v23 = vadd.f32 %v732_v15, %v706_v33  ;;  %v736_v51 = vadd.f32 %v735_v44, %v716_v11  ;;  %v745_v53 = vrot.slane %v741_v24, 1  ;;  %v781_v56 = vmul.f32 %v4060_v7, %v728_v27  ;;  %v903_v3 = vpop.permute.xlu1 %902 }
 0x11f   : > { %v739_v63 = vadd.f32 %v738_v41, %v726_v9  ;;  %v755_v61 = vrot.slane %v751_v57, 1  ;;  %v765_v30 = vrot.slane %v761_v25, 1  ;;  %v775_v35 = vrot.slane %v771_v31, 2 }
 0x120   : > { %v791_v16 = vmul.f32 %v4061_v39, %v728_v27  ;;  %v747_v26 = vsel %vm351_vm0, %v745_v53, %v746_v21  ;;  %v785_v62 = vrot.slane %v781_v56, 2  ;;  %v1483_v4 = vmul.f32 %v1471_v50, %v4056_v47 }
 0x121   : > { %v1493_v12 = vmul.f32 %v1471_v50, %v4057_v59  ;;  %v796_v10 = vrot.slane %v792_v8, 2  ;;  %v749_v54 = vadd.f32 %v747_v26, %v733_v23  ;;  %v757_v13 = vsel %vm351_vm0, %v755_v61, %v756_v42  ;;  %v4068_v61 = vld [vmem:[#allocation77_spill] sm:$0xff] }
 0x122   : > { %v767_v28 = vsel %vm351_vm0, %v765_v30, %v766_v36  ;;  %v759_v60 = vadd.f32 %v757_v13, %v736_v51  ;;  %v777_v0 = vsel %vm382_vm1, %v775_v35, %v776_v2  ;;  %v795_v20 = vrot.slane %v791_v16, 2  ;;  %v1469_v36 = vpop.permute.xlu0 %1468  ;;  %v4069_v30 = vld [vmem:[#allocation80_spill] sm:$0xff]  ;;  %v4070_v13 = vld [vmem:[#allocation81_spill] sm:$0xff] }
 0x123   : > { %v769_v55 = vadd.f32 %v767_v28, %v739_v63  ;;  %v779_v29 = vadd.f32 %v777_v0, %v749_v54  ;;  %v787_v27 = vsel %vm382_vm1, %v785_v62, %v786_v43  ;;  %v1487_v21 = vrot.slane %v1483_v4, 1  ;;  %v4071_v0 = vld [vmem:[#allocation78_spill] sm:$0xff] }
 0x124   : > { %v1503_v33 = vmul.f32 %v1471_v50, %v4058_v32  ;;  %v789_v11 = vadd.f32 %v787_v27, %v759_v60  ;;  %v1497_v5 = vrot.slane %v1493_v12, 1  ;;  %v1513_v8 = vmul.f32 %v1471_v50, %v4059_v19  ;;  %v4072_v27 = vld [vmem:[#allocation82_spill] sm:$0xff] }
 0x125   : > { %v1523_v42 = vmul.f32 %v1471_v50, %v4060_v7  ;;  %v797_v15 = vsel %vm382_vm1, %v795_v20, %v796_v10  ;;  %v1533_v9 = vmul.f32 %v1471_v50, %v4061_v39  ;;  %v1445_v43 = vsel %vm382_vm1, %v1443_v48, %v1444_v38 }
 0x126   : > { %v1507_v2 = vrot.slane %v1503_v33, 1  ;;  %v1517_v46 = vrot.slane %v1513_v8, 2  ;;  %v1447_v40 = vadd.f32 %v1445_v43, %v3493_v52  ;;  %v1455_v41 = vsel %vm382_vm1, %v1453_v6, %v1454_v34  ;;  %v901_v33 = vpop.permute.xlu0 %900 }
 0x127   : > { %v1527_v44 = vrot.slane %v1523_v42, 2  ;;  %v1537_v24 = vrot.slane %v1533_v9, 2  ;;  %v1457_v23 = vadd.f32 %v1455_v41, %v3495_v18  ;;  %v1465_v58 = vsel %vm382_vm1, %v1463_v45, %v1464_v17  ;;  %v4074_v9 = vld [vmem:[#allocation83_spill] sm:$0xff] }
 0x128   : > { %v4065_v38 = vstv %s3989_s23  ;;  %v1467_v48 = vadd.f32 %v1465_v58, %v3505_v14  ;;  %v4066_v52 = vstv %s3990_s29  ;;  %v4067_v1 = vstv %s3991_s8 }
 0x129   : > { %v1473_v37 = vmul.f32 %v1469_v36, %v4065_v38  ;;  %v1476_v57 = vmul.f32 %v1469_v36, %v4066_v52  ;;  %v1479_v25 = vmul.f32 %v1469_v36, %v4067_v1  ;;  %v1482_v49 = vmul.f32 %v1469_v36, %v4056_v47 }
 0x12a   : > { %v1492_v6 = vmul.f32 %v1469_v36, %v4057_v59  ;;  %v1502_v18 = vmul.f32 %v1469_v36, %v4058_v32  ;;  %v1512_v22 = vmul.f32 %v1469_v36, %v4059_v19  ;;  %v1522_v50 = vmul.f32 %v1469_v36, %v4060_v7 }
 0x12b   : > { %v1474_v34 = vadd.f32 %v1473_v37, %v1447_v40  ;;  %v1477_v31 = vadd.f32 %v1476_v57, %v1457_v23  ;;  %v1480_v17 = vadd.f32 %v1479_v25, %v1467_v48  ;;  %v1486_v45 = vrot.slane %v1482_v49, 1  ;;  %v4076_v40 = vld [vmem:[#allocation86_spill] sm:$0xff]  ;;  %v4080_v57 = vld [vmem:[#allocation46_spill] sm:$0xff] }
 0x12c   : > { %v1496_v14 = vrot.slane %v1492_v6, 1  ;;  %v1506_v51 = vrot.slane %v1502_v18, 1  ;;  %v1516_v63 = vrot.slane %v1512_v22, 2  ;;  %v1532_v53 = vmul.f32 %v1469_v36, %v4061_v39  ;;  %v4073_v36 = vld [vmem:[#allocation79_spill] sm:$0xff]  ;;  %v4077_v23 = vld [vmem:[#allocation45_spill] sm:$0xff]  ;;  %v4083_v18 = vld [vmem:[#allocation51_spill] sm:$0xff] }
 0x12d   : > { %v1488_v47 = vsel %vm351_vm0, %v1486_v45, %v1487_v21  ;;  %v1526_v56 = vrot.slane %v1522_v50, 2  ;;  %v915_v59 = vmul.f32 %v4068_v61, %v903_v3  ;;  %v925_v32 = vmul.f32 %v4069_v30, %v903_v3  ;;  %v4085_v50 = vld [vmem:[#allocation53_spill] sm:$0xff] }
 0x12e   : > { %v799_v35 = vadd.f32 %v797_v15, %v769_v55  ;;  %v1490_v19 = vadd.f32 %v1488_v47, %v1474_v34  ;;  %v1498_v16 = vsel %vm351_vm0, %v1496_v14, %v1497_v5  ;;  %v1508_v26 = vsel %vm351_vm0, %v1506_v51, %v1507_v2 }
 0x12f   : > { %v1500_v62 = vadd.f32 %v1498_v16, %v1477_v31  ;;  %v1510_v7 = vadd.f32 %v1508_v26, %v1480_v17  ;;  %v1518_v4 = vsel %vm382_vm1, %v1516_v63, %v1517_v46  ;;  %v1536_v12 = vrot.slane %v1532_v53, 2  ;;  %v4075_v46 = vld [vmem:[#allocation84_spill] sm:$0xff]  ;;  %v4084_v17 = vld [vmem:[#allocation52_spill] sm:$0xff] }
 0x130   : > { %v1520_v10 = vadd.f32 %v1518_v4, %v1490_v19  ;;  %v1528_v39 = vsel %vm382_vm1, %v1526_v56, %v1527_v44  ;;  %v919_v54 = vrot.slane %v915_v59, 1  ;;  %v935_v28 = vmul.f32 %v4070_v13, %v903_v3 }
 0x131   : > { %v1538_v60 = vsel %vm382_vm1, %v1536_v12, %v1537_v24  ;;  %v929_v55 = vrot.slane %v925_v32, 1  ;;  %v3591_v20 = vmul.f32 %v4071_v0, %v903_v3  ;;  %v3594_v21 = vmul.f32 %v4072_v27, %v903_v3  ;;  %v1644_v32 = vpop.permute.xlu1 %1643 }
 0x132   : > { %v1530_v5 = vadd.f32 %v1528_v39, %v1500_v62  ;;  %v1540_v8 = vadd.f32 %v1538_v60, %v1510_v7  ;;  %v939_v42 = vrot.slane %v935_v28, 1  ;;  %v833_v15 = vadd.f32 %v4073_v36, %v779_v29  ;;  %v4081_v29 = vld [vmem:[#allocation47_spill] sm:$0xff] }
 0x133   : > { %v949_v2 = vrot.slane %v3591_v20, 2  ;;  %v3599_v43 = vmul.f32 %v4074_v9, %v903_v3  ;;  %v836_v44 = vadd.f32 %v4075_v46, %v789_v11  ;;  %v839_v41 = vadd.f32 %v4076_v40, %v799_v35  ;;  %v4086_v40 = vld [vmem:[#allocation85_spill] sm:$0xff] }
 0x134   : > { %v959_v24 = vrot.slane %v3594_v21, 2  ;;  %v849_v58 = vadd.f32 %v4077_v23, %v833_v15  ;;  %v4078_v38 = vstv %s3079_s27  ;;  %v4079_v48 = vstv %s4005_s11  ;;  %v1642_v23 = vpop.permute.xlu0 %1641 }
 0x135   : > { %v905_v37 = vmul.f32 %v4078_v38, %v901_v33  ;;  %v908_v52 = vmul.f32 %v4079_v48, %v901_v33  ;;  %v859_v1 = vadd.f32 %v4080_v57, %v836_v44  ;;  %v869_v25 = vadd.f32 %v4081_v29, %v839_v41  ;;  %v4087_v48 = vld [vmem:[#allocation87_spill] sm:$0xff]  ;;  %v4088_v29 = vld [vmem:[#allocation88_spill] sm:$0xff] }
 0x136   : > { %v4082_v49 = vstv %s3102_s10  ;;  %v914_v6 = vmul.f32 %v4068_v61, %v901_v33  ;;  %v879_v11 = vadd.f32 %v4083_v18, %v849_v58  ;;  %v924_v22 = vmul.f32 %v4069_v30, %v901_v33 }
 0x137   : > { %v911_v34 = vmul.f32 %v4082_v49, %v901_v33  ;;  %v934_v3 = vmul.f32 %v4070_v13, %v901_v33  ;;  %v3618_v31 = vmul.f32 %v4071_v0, %v901_v33  ;;  %v889_v45 = vadd.f32 %v4084_v17, %v859_v1  ;;  %v4089_v49 = vld [vmem:[#allocation61_spill] sm:$0xff] }
 0x138   : > { %v899_v14 = vadd.f32 %v4085_v50, %v869_v25  ;;  %v918_v51 = vrot.slane %v914_v6, 1  ;;  %v3623_v63 = vmul.f32 %v4072_v27, %v901_v33  ;;  %v969_v53 = vrot.slane %v3599_v43, 2  ;;  %v4090_v6 = vld [vmem:[#allocation63_spill] sm:$0xff] }
 0x139   : > { %v906_v47 = vadd.f32 %v905_v37, %v879_v11  ;;  %v928_v56 = vrot.slane %v924_v22, 1  ;;  %v938_v59 = vrot.slane %v934_v3, 1  ;;  %v909_v35 = vadd.f32 %v908_v52, %v889_v45  ;;  %v4093_v45 = vld [vmem:[#allocation64_spill] sm:$0xff] }
 0x13a   : > { %v912_v19 = vadd.f32 %v911_v34, %v899_v14  ;;  %v920_v16 = vsel %vm351_vm0, %v918_v51, %v919_v54  ;;  %v948_v26 = vrot.slane %v3618_v31, 2  ;;  %v958_v4 = vrot.slane %v3623_v63, 2  ;;  %v4095_v63 = vld [vmem:[#allocation67_spill] sm:$0xff] }
 0x13b   : > { %v3628_v62 = vadd.f32 %v920_v16, %v906_v47  ;;  %v930_v7 = vsel %vm351_vm0, %v928_v56, %v929_v55  ;;  %v964_v12 = vmul.f32 %v4074_v9, %v901_v33  ;;  %v940_v28 = vsel %vm351_vm0, %v938_v59, %v939_v42 }
 0x13c   : > { %v932_v39 = vadd.f32 %v930_v7, %v909_v35  ;;  %v3635_v60 = vmul.f32 %v1644_v32, %v4068_v61  ;;  %v3638_v36 = vmul.f32 %v1644_v32, %v4069_v30  ;;  %v942_v54 = vadd.f32 %v940_v28, %v912_v19  ;;  %v976_v35 = vpop.permute.xlu1 %975  ;;  %v4097_v19 = vld [vmem:[#allocation68_spill] sm:$0xff] }
 0x13d   : > { %v3641_v15 = vmul.f32 %v1644_v32, %v4070_v13  ;;  %v3644_v46 = vmul.f32 %v1644_v32, %v4071_v0  ;;  %v3647_v55 = vmul.f32 %v1644_v32, %v4072_v27  ;;  %v968_v33 = vrot.slane %v964_v12, 2 }
 0x13e   : > { %v1660_v42 = vrot.slane %v3635_v60, 1  ;;  %v3651_v44 = vmul.f32 %v1644_v32, %v4074_v9  ;;  %v1574_v41 = vadd.f32 %v4086_v40, %v1520_v10  ;;  %v1670_v58 = vrot.slane %v3638_v36, 1 }
 0x13f   : > { %v1680_v38 = vrot.slane %v3641_v15, 1  ;;  %v1690_v37 = vrot.slane %v3644_v46, 2  ;;  %v1577_v52 = vadd.f32 %v4087_v48, %v1530_v5  ;;  %v1700_v57 = vrot.slane %v3647_v55, 2  ;;  %v4094_v5 = vld [vmem:[#allocation66_spill] sm:$0xff] }
 0x140   : > { %v1710_v1 = vrot.slane %v3651_v44, 2  ;;  %v1580_v25 = vadd.f32 %v4088_v29, %v1540_v8  ;;  %v1590_v34 = vadd.f32 %v4089_v49, %v1574_v41  ;;  %v4091_v18 = vstv %s3079_s27  ;;  %v4098_v41 = vld [vmem:[#allocation89_spill] sm:$0xff]  ;;  %s4108_s27 = smul.u32 48, %s4107_s20 }
 0x141   : > { %v1600_v10 = vadd.f32 %v4090_v6, %v1577_v52  ;;  %v1646_v11 = vmul.f32 %v1642_v23, %v4091_v18  ;;  %v4092_v22 = vstv %s4005_s11  ;;  %v3668_v17 = vmul.f32 %v1642_v23, %v4068_v61  ;;  %v4099_v52 = vld [vmem:[#allocation90_spill] sm:$0xff] }
 0x142   : > { %v1649_v3 = vmul.f32 %v1642_v23, %v4092_v22  ;;  %v1610_v50 = vadd.f32 %v4093_v45, %v1580_v25  ;;  %v1620_v14 = vadd.f32 %v4094_v5, %v1590_v34  ;;  %v3673_v51 = vmul.f32 %v1642_v23, %v4069_v30  ;;  %v4100_v25 = vld [vmem:[#allocation93_spill] sm:$0xff] }
 0x143   : > { %v3676_v8 = vmul.f32 %v1642_v23, %v4070_v13  ;;  %v1630_v47 = vadd.f32 %v4095_v63, %v1600_v10  ;;  %v4096_v56 = vstv %s3102_s10  ;;  %v3682_v32 = vmul.f32 %v1642_v23, %v4071_v0  ;;  %v4101_v10 = vld [vmem:[#allocation91_spill] sm:$0xff]  ;;  %s3751_s10 = scalar_lea.vmem [#allocation9], %s4108_s27 }
 0x144   : > { %v1652_v59 = vmul.f32 %v1642_v23, %v4096_v56  ;;  %v3685_v61 = vmul.f32 %v1642_v23, %v4072_v27  ;;  %v1640_v16 = vadd.f32 %v4097_v19, %v1610_v50  ;;  %v3688_v7 = vadd.f32 %v1646_v11, %v1620_v14  ;;  %v4102_v11 = vld [vmem:[#allocation92_spill] sm:$0xff]  ;;  %v4103_v50 = vld [vmem:[#allocation94_spill] sm:$0xff] }
 0x145   : > { %v1659_v30 = vrot.slane %v3668_v17, 1  ;;  %v1669_v13 = vrot.slane %v3673_v51, 1  ;;  %v3692_v12 = vadd.f32 %v1649_v3, %v1630_v47  ;;  %v1679_v28 = vrot.slane %v3676_v8, 1 }
 0x146   : > { %v1689_v40 = vrot.slane %v3682_v32, 2  ;;  %v3697_v0 = vmul.f32 %v1642_v23, %v4074_v9  ;;  %v1699_v27 = vrot.slane %v3685_v61, 2  ;;  %v988_v48 = vmul.f32 %v4098_v41, %v976_v35  ;;  %v974_v9 = vpop.permute.xlu0 %973 }
 0x147   : > { %v998_v29 = vmul.f32 %v4099_v52, %v976_v35  ;;  %v1008_v49 = vmul.f32 %v4100_v25, %v976_v35  ;;  %v3703_v34 = vadd.f32 %v1652_v59, %v1640_v16  ;;  %v1018_v18 = vmul.f32 %v4101_v10, %v976_v35 }
 0x148   : > { %v1709_v6 = vrot.slane %v3697_v0, 2  ;;  %v1028_v22 = vmul.f32 %v4102_v11, %v976_v35  ;;  %v992_v23 = vrot.slane %v988_v48, 1  ;;  %v1038_v5 = vmul.f32 %v4103_v50, %v976_v35 }
 0x149   : > { %v1002_v3 = vrot.slane %v998_v29, 1  ;;  %v1012_v45 = vrot.slane %v1008_v49, 1  ;;  %v1022_v14 = vrot.slane %v1018_v18, 2  ;;  %v950_v47 = vsel %vm382_vm1, %v948_v26, %v949_v2 }
 0x14a   : > { %v1032_v63 = vrot.slane %v1028_v22, 2  ;;  %v960_v56 = vsel %vm382_vm1, %v958_v4, %v959_v24  ;;  %v970_v59 = vsel %vm382_vm1, %v968_v33, %v969_v53  ;;  %v952_v19 = vadd.f32 %v950_v47, %v3628_v62  ;;  %v1717_v53 = vpop.permute.xlu1 %1716 }
 0x14b   : > { %v962_v16 = vadd.f32 %v960_v56, %v932_v39  ;;  %v4104_v35 = vstv %s3182_s4  ;;  %v972_v29 = vadd.f32 %v970_v59, %v942_v54  ;;  %v4105_v49 = vstv %s3194_s9 }
 0x14c   : > { %v978_v48 = vmul.f32 %v4104_v35, %v974_v9  ;;  %v981_v20 = vmul.f32 %v4105_v49, %v974_v9  ;;  %v4106_v18 = vstv %s3208_s21  ;;  %v987_v2 = vmul.f32 %v4098_v41, %v974_v9 }
 0x14d   : > { %v984_v31 = vmul.f32 %v4106_v18, %v974_v9  ;;  %v997_v21 = vmul.f32 %v4099_v52, %v974_v9  ;;  %v1007_v24 = vmul.f32 %v4100_v25, %v974_v9  ;;  %v1017_v43 = vmul.f32 %v4101_v10, %v974_v9 }
 0x14e   : > { %v979_v26 = vadd.f32 %v978_v48, %v952_v19  ;;  %v982_v4 = vadd.f32 %v981_v20, %v962_v16  ;;  %v991_v39 = vrot.slane %v987_v2, 1  ;;  %v1027_v33 = vmul.f32 %v4102_v11, %v974_v9 }
 0x14f   : > { %v985_v62 = vadd.f32 %v984_v31, %v972_v29  ;;  %v1001_v54 = vrot.slane %v997_v21, 1  ;;  %v1011_v22 = vrot.slane %v1007_v24, 1  ;;  %v1021_v47 = vrot.slane %v1017_v43, 2 }
 0x150   : > { %v1037_v56 = vmul.f32 %v4103_v50, %v974_v9  ;;  %v1042_v59 = vrot.slane %v1038_v5, 2  ;;  %v993_v19 = vsel %vm351_vm0, %v991_v39, %v992_v23  ;;  %v1031_v35 = vrot.slane %v1027_v33, 2 }
 0x151   : > { %v1729_v48 = vmul.f32 %v1717_v53, %v4098_v41  ;;  %v995_v49 = vadd.f32 %v993_v19, %v979_v26  ;;  %v1003_v18 = vsel %vm351_vm0, %v1001_v54, %v1002_v3  ;;  %v1013_v16 = vsel %vm351_vm0, %v1011_v22, %v1012_v45 }
 0x152   : > { %v1739_v29 = vmul.f32 %v1717_v53, %v4099_v52  ;;  %v1005_v20 = vadd.f32 %v1003_v18, %v982_v4  ;;  %v1015_v31 = vadd.f32 %v1013_v16, %v985_v62  ;;  %v1023_v2 = vsel %vm382_vm1, %v1021_v47, %v1022_v14 }
 0x153   : > { %v1041_v21 = vrot.slane %v1037_v56, 2  ;;  %v1025_v9 = vadd.f32 %v1023_v2, %v995_v49  ;;  %v1033_v5 = vsel %vm382_vm1, %v1031_v35, %v1032_v63  ;;  %v1733_v23 = vrot.slane %v1729_v48, 1 }
 0x154   : > { %v1749_v24 = vmul.f32 %v1717_v53, %v4100_v25  ;;  %v1035_v43 = vadd.f32 %v1033_v5, %v1005_v20  ;;  %v1759_v3 = vmul.f32 %v1717_v53, %v4101_v10  ;;  %v1769_v45 = vmul.f32 %v1717_v53, %v4102_v11 }
 0x155   : > { %v1043_v26 = vsel %vm382_vm1, %v1041_v21, %v1042_v59  ;;  %v1743_v4 = vrot.slane %v1739_v29, 1  ;;  %v1661_v14 = vsel %vm351_vm0, %v1659_v30, %v1660_v42  ;;  %1046 = vst [vmem:[%s3751_s10] sm:$0xff] %v1025_v9  ;;  %v1779_v62 = vmul.f32 %v1717_v53, %v4103_v50  ;;  %v1715_v42 = vpop.permute.xlu0 %1714 }
 0x156   : > { %v1045_v39 = vadd.f32 %v1043_v26, %v1015_v31  ;;  %v1753_v33 = vrot.slane %v1749_v24, 1  ;;  %v1763_v63 = vrot.slane %v1759_v3, 2  ;;  %v1663_v54 = vadd.f32 %v1661_v14, %v3688_v7  ;;  %2033 = vst [vmem:[%s3751_s10 + $0x10] sm:$0xff] %v1035_v43 }
 0x157   : > { %v1671_v60 = vsel %vm351_vm0, %v1669_v13, %v1670_v58  ;;  %v1773_v17 = vrot.slane %v1769_v45, 2  ;;  %v1681_v53 = vsel %vm351_vm0, %v1679_v28, %v1680_v38  ;;  %v1691_v36 = vsel %vm382_vm1, %v1689_v40, %v1690_v37 }
 0x158   : > { %v1673_v30 = vadd.f32 %v1671_v60, %v3692_v12  ;;  %2034 = vst [vmem:[%s3751_s10 + $0x20] sm:$0xff] %v1045_v39  ;;  %v1683_v58 = vadd.f32 %v1681_v53, %v3703_v34  ;;  %v1693_v51 = vadd.f32 %v1691_v36, %v1663_v54  ;;  %v1701_v15 = vsel %vm382_vm1, %v1699_v27, %v1700_v57 }
 0x159   : > { %v1711_v46 = vsel %vm382_vm1, %v1709_v6, %v1710_v1  ;;  %v4109_v8 = vstv %s3182_s4  ;;  %v4110_v37 = vstv %s3194_s9  ;;  %v4111_v13 = vstv %s3208_s21  ;;  %s2129_s21 = smul.u32 768, %s4112_s24  ;;  %s1808_s9 = sshll.u32 %s3751_s10, 4  ;;  %s3812_s9 = int_to_ptr.vmem [resolvable:$true] %s1808_s9 }
 0x15a   : > { %v1703_v38 = vadd.f32 %v1701_v15, %v1673_v30  ;;  %v1719_v32 = vmul.f32 %v1715_v42, %v4109_v8  ;;  %v1722_v7 = vmul.f32 %v1715_v42, %v4110_v37  ;;  %v1725_v12 = vmul.f32 %v1715_v42, %v4111_v13  ;;  %s2258_s22 = scalar_lea.vmem %s3812_s9, 768  ;;  %p2265_p0 = scmp.lt.s32.totalorder %s3812_s9, %s2263_s12 }
 0x15b   : > { %v1713_v28 = vadd.f32 %v1711_v46, %v1683_v58  ;;  %v1728_v55 = vmul.f32 %v1715_v42, %v4098_v41  ;;  %v1738_v61 = vmul.f32 %v1715_v42, %v4099_v52  ;;  %v1748_v57 = vmul.f32 %v1715_v42, %v4100_v25  ;;  %s3808_s1 = scalar_lea.hbm %s4114_s7, %s2129_s21  ;;  %p2259_p4 = scmp.ne.s32.totalorder %s3812_s9, %s2258_s22 }
 0x15c   : > { %v1720_v44 = vadd.f32 %v1719_v32, %v1693_v51  ;;  %v1723_v40 = vadd.f32 %v1722_v7, %v1703_v38  ;;  %v1758_v0 = vmul.f32 %v1715_v42, %v4101_v10  ;;  %v1768_v1 = vmul.f32 %v1715_v42, %v4102_v11  ;;  %p2266_p6 = scmp.lt.s32.totalorder %s2264_s26, %s2258_s22 }
 0x15d   : > { %v1726_v27 = vadd.f32 %v1725_v12, %v1713_v28  ;;  %v1732_v34 = vrot.slane %v1728_v55, 1  ;;  %v1742_v6 = vrot.slane %v1738_v61, 1  ;;  %v1752_v22 = vrot.slane %v1748_v57, 1  ;;  %p2260_p5 = pnand %p2259_p4, %p2441_p9 }
 0x15e   : > { %v1762_v47 = vrot.slane %v1758_v0, 2  ;;  %v1772_v56 = vrot.slane %v1768_v1, 2  ;;  %v1778_v41 = vmul.f32 %v1715_v42, %v4103_v50  ;;  %v1783_v59 = vrot.slane %v1779_v62, 2  ;;  %p2267_p7 = por %p2266_p6, %p2265_p0 }
 0x15f   : > { %v1734_v52 = vsel %vm351_vm0, %v1732_v34, %v1733_v23  ;;  %v1744_v25 = vsel %vm351_vm0, %v1742_v6, %v1743_v4  ;;  %v1754_v10 = vsel %vm351_vm0, %v1752_v22, %v1753_v33  ;;  %p2261_p8 = pneg %p2260_p5 }
 0x160   : > { %v1736_v11 = vadd.f32 %v1734_v52, %v1720_v44  ;;  %v1746_v19 = vadd.f32 %v1744_v25, %v1723_v40  ;;  %v1756_v35 = vadd.f32 %v1754_v10, %v1726_v27  ;;  %v1764_v48 = vsel %vm382_vm1, %v1762_v47, %v1763_v63 }
 0x161   : > { %v1774_v50 = vsel %vm382_vm1, %v1772_v56, %v1773_v17  ;;  %v1782_v49 = vrot.slane %v1778_v41, 2  ;;  %p2268_p10 = pnand %p2267_p7, %p2261_p8 }
 0x162   : > { %v1766_v18 = vadd.f32 %v1764_v48, %v1736_v11  ;;  %v1776_v16 = vadd.f32 %v1774_v50, %v1746_v19 }
 0x163   : > { %v1784_v29 = vsel %vm382_vm1, %v1782_v49, %v1783_v59 }
 0x164   : > { %v1786_v20 = vadd.f32 %v1784_v29, %v1756_v35  ;;  %1787 = vst [vmem:[%s3751_s10 + $0x8] sm:$0xff] %v1766_v18  ;;  %2119 = vst [vmem:[%s3751_s10 + $0x18] sm:$0xff] %v1776_v16 }
 0x166   : > { %2120 = vst [vmem:[%s3751_s10 + $0x28] sm:$0xff] %v1786_v20 }
 0x167   : > { %2271 = shalt.err (!%p2268_p10)
}
 0x168   : > { %s2272_s28 = scalar_lea.hbm %s3808_s1, 768  ;;  %s2276_s29 = scalar_lea.hbm %s4114_s7, 1536 }
 0x169   : > { %p2273_p12 = scmp.ne.s32.totalorder %s3808_s1, %s2272_s28  ;;  %p2277_p1 = scmp.lt.s32.totalorder %s3808_s1, %s4114_s7 }
 0x16a   : > { %p2278_p4 = scmp.lt.s32.totalorder %s2276_s29, %s2272_s28 }
 0x16b   : > { %p2274_p13 = pnand %p2273_p12, %p2441_p9 }
 0x16c   : > { %p2279_p5 = por %p2278_p4, %p2277_p1 }
 0x16d   : > { %p2275_p2 = pneg %p2274_p13 }
 0x16f   : > { %p2280_p8 = pnand %p2279_p5, %p2275_p2 }
 0x171   : > { %2283 = shalt.err (!%p2280_p8)
}
 0x172   : > { %s2362_s4 = smov 128   ;;  %s2363_s11 = smov 8  }
 0x173   : > { %2145 = dma.vmem_to_hbm [thread:$0]  (%p2441_p9), %s3812_s9, 768, %s3808_s1, %s1793_s16, %s2362_s4, %s2362_s4, %s2363_s11  }
 0x174 PF: > { %s4115_s2 = sld [smem:[#allocation17_spill]]  ;;  %p2152_p0 = pnand %p1942_p3, %p2448_p11 }
 0x175   : > { %s4117_s14 = sld [smem:[#allocation22_spill]] }
 0x176   : > { %p2153_p6 = pneg %p2152_p0 }
 0x17a   : > { %s1823_s15 = sand.u32 1, %s4115_s2  }
 0x17b   : > { %s1824_s6 = scalar_lea.sflag [#allocation4], %s1823_s15 }
 0x17c   : > { %2321 = dma.done.wait (%p2153_p6), %s1824_s6, 768  }
 0x17d   : > { %2323 = vsyncadd (%p2153_p6), %s1824_s6, 4294966528  ;;  %s23_s17 = sadd.s32 1, %s4117_s14   ;;  %s4118_s12 = sld [smem:[#allocation18_spill]] }
 0x17e   : > { %p20_p7 = scmp.ge.s32.totalorder %s23_s17, 4   ;;  %s4119_s13 = sld [smem:[#allocation19_spill]] }
 0x17f   : > { %s4120_s14 = sld [smem:[#allocation25_spill]] }
 0x180   : > { %s4121_s15 = sld [smem:[#allocation21_spill]]  ;;  %22 = sbr.rel (!%p20_p7) target bundleno = 14 (0xe), region = 110 }
 0x181   : > { %s4122_s16 = sld [smem:[#allocation23_spill]] }
 0x185   :  { %1829 = vsyncpa [#allocation3], 1 }
 0x186   :  { %1831 = vsyncpa [#allocation3 + $0x1], 1 }
 0x187   :  { %1832 = vsyncpa [#allocation8], 1 }
 0x188   :  { %1834 = vsyncpa [#allocation8 + $0x1], 1 }
 0x189   :  { %1835 = vsyncpa [#allocation4], 1 }
 0x18a   :  { %1837 = vsyncpa [#allocation4 + $0x1], 1 }
 0x18b   :  { %1838 = vsyncpa [#allocation5], 1 }
 0x18c   :  { %1840 = vsyncpa [#allocation5 + $0x1], 1 }

</bundles_post_ra>
